<compile_context>
chip_gen: v7x
topology: tpu7x:2x2x1
jax: 0.10.0
libtpu: 0.0.40
codegen_flags: <defaults>
</compile_context>

<pallas_src>
import math

import jax
import jax.numpy as jnp
from jax.experimental import pallas as pl
from jax.experimental.pallas import tpu as pltpu

# ---------------------------------------------------------------------------
# Config (scaled-down ModelArgs)
# ---------------------------------------------------------------------------
VOCAB_SIZE = 7
DIM = 256             # hidden dim (2 x 128 lanes)
N_LAYERS = 2
N_HEADS = 2
HEAD_DIM = DIM // N_HEADS      # 128 -> lane-aligned head slices
MULTIPLE_OF = 256
NORM_EPS = 1e-5
ROPE_THETA = 21000.0
BATCH = 2
SEQ = 8
VOCAB_PAD = 128       # lane-dense padded vocab width for the final projection
MASK_BIAS = -1e30     # large finite negative bias (NaN-safe, diagonal always unmasked)


def _ffn_hidden_dim(dim, multiple_of):
    hidden = 4 * dim
    hidden = int(2 * hidden / 3)
    return multiple_of * ((hidden + multiple_of - 1) // multiple_of)


FFN_HIDDEN = _ffn_hidden_dim(DIM, MULTIPLE_OF)   # 768


# ---------------------------------------------------------------------------
# In-kernel helpers
# ---------------------------------------------------------------------------
def _rmsnorm(x, w, eps=NORM_EPS):
    # x: (R, D); w broadcastable to (R, D).  Kept in f32 (v5e has no bf16 VPU).
    var = jnp.mean(x * x, axis=-1, keepdims=True)
    return x * jax.lax.rsqrt(var + eps) * w


def _apply_rope(x, cos, sin_e, sin_o):
    # Interleaved-pair RoPE with sign-folded sin tables:
    #   out[2i]   = x[2i]*cos - x[2i+1]*sin     (sin_e = -sin on even lanes, else 0)
    #   out[2i+1] = x[2i+1]*cos + x[2i]*sin     (sin_o = +sin on odd lanes,  else 0)
    # pltpu.roll is XLU-slot (cheap); wrap-around lanes are masked by the zeros in
    # sin_e / sin_o (requires D even and pairs not crossing head boundaries).
    n = x.shape[-1]
    left = pltpu.roll(x, n - 1, 1)    # x[j+1] lands at j
    right = pltpu.roll(x, 1, 1)       # x[j-1] lands at j
    return x * cos + left * sin_e + right * sin_o


# ---------------------------------------------------------------------------
# Fused Pallas kernel: all layers + final norm + vocab projection
# ---------------------------------------------------------------------------
def fused_transformer_kernel(x_ref, cos_ref, sin_e_ref, sin_o_ref, bias_ref,
                             attn_norm_ref, wqkv_ref, wo_ref,
                             ffn_norm_ref, w13_ref, w2_ref,
                             final_norm_ref, wp_ref, bp_ref,
                             o_ref, act_ref):
    l = pl.program_id(0)
    n_layers = pl.num_programs(0)

    # Load the embedded tokens into the resident activation scratch once.
    @pl.when(l == 0)
    def _():
        act_ref[...] = x_ref[...]

    x = act_ref[...]                       # (B*S, D) f32, resident across layers
    cos = cos_ref[...]
    sin_e = sin_e_ref[...]
    sin_o = sin_o_ref[...]
    bias = bias_ref[...]                   # (S, S) additive causal bias (0 / -1e30)

    BS = x.shape[0]
    S = bias.shape[0]
    B = BS // S
    scale = 1.0 / math.sqrt(HEAD_DIM)

    # ---- attention sub-block: RMSNorm -> fused QKV -> RoPE -> causal MHA -> out-proj ----
    xn = _rmsnorm(x, attn_norm_ref[...]).astype(jnp.bfloat16)
    qkv = jnp.dot(xn, wqkv_ref[...], preferred_element_type=jnp.float32)  # (B*S, 3D)
    q = _apply_rope(qkv[:, :DIM], cos, sin_e, sin_o)
    k = _apply_rope(qkv[:, DIM:2 * DIM], cos, sin_e, sin_o)
    v = qkv[:, 2 * DIM:]

    wo = wo_ref[...]                        # (D, D) bf16
    attn = jnp.zeros((BS, DIM), jnp.float32)
    for h in range(N_HEADS):                # static loop, 128-lane-aligned head slices
        sl = slice(h * HEAD_DIM, (h + 1) * HEAD_DIM)
        qh = q[:, sl].reshape(B, S, HEAD_DIM).astype(jnp.bfloat16)
        kh = k[:, sl].reshape(B, S, HEAD_DIM).astype(jnp.bfloat16)
        vh = v[:, sl].reshape(B, S, HEAD_DIM).astype(jnp.bfloat16)
        # Contract last dims directly (no materialized K transpose); bf16 MXU, f32 acc.
        s = jnp.einsum('bqd,bkd->bqk', qh, kh, preferred_element_type=jnp.float32)
        s = s * scale + bias[None, :, :]
        p = jnp.exp(s - jnp.max(s, axis=-1, keepdims=True))
        p = p * pl.reciprocal(jnp.sum(p, axis=-1, keepdims=True), approx=True)
        oh = jnp.einsum('bqk,bkd->bqd', p.astype(jnp.bfloat16), vh,
                        preferred_element_type=jnp.float32)
        # Fold the output projection per head (no concat / relayout of (B*S, D)).
        attn = attn + jnp.dot(oh.reshape(BS, HEAD_DIM).astype(jnp.bfloat16), wo[sl, :],
                              preferred_element_type=jnp.float32)
    h1 = x + attn

    # ---- SwiGLU feed-forward sub-block (fused W1|W3) ----
    hn = _rmsnorm(h1, ffn_norm_ref[...]).astype(jnp.bfloat16)
    gu = jnp.dot(hn, w13_ref[...], preferred_element_type=jnp.float32)    # (B*S, 2H)
    g = gu[:, :FFN_HIDDEN]
    u = gu[:, FFN_HIDDEN:]
    f = jnp.dot((jax.nn.silu(g) * u).astype(jnp.bfloat16), w2_ref[...],
                preferred_element_type=jnp.float32)
    h2 = h1 + f
    act_ref[...] = h2                       # activation stays resident across layers

    # ---- final RMSNorm + lane-dense vocab projection on the last layer step ----
    @pl.when(l == n_layers - 1)
    def _():
        xf = _rmsnorm(h2, final_norm_ref[...]).astype(jnp.bfloat16)
        o_ref[...] = (jnp.dot(xf, wp_ref[...], preferred_element_type=jnp.float32)
                      + bp_ref[...])


# ---------------------------------------------------------------------------
# pallas_call wrapper (consumes the pre-stacked / pre-cast weight blob)
# ---------------------------------------------------------------------------
def inner_transformer_forward(tokens, packed, cos, sin_e, sin_o, bias):
    B, S = tokens.shape
    D, H, L = DIM, FFN_HIDDEN, N_LAYERS
    BS = B * S

    # Embedding lookup is plain-JAX glue (gather); all heavy compute is in the kernel.
    x = jnp.take(packed["emb"], tokens, axis=0).reshape(BS, D)        # (B*S, D) f32

    def layer_spec(shape):
        return pl.BlockSpec(shape, lambda l: (0, 0, 0))

    def shared2d(shape):
        return pl.BlockSpec(shape, lambda l: (0, 0))

    # Stacked per-layer weights: leading L axis streamed across the (sole) grid axis.
    def stacked(shape):
        return pl.BlockSpec(shape, lambda l: (l, 0, 0))

    out = pl.pallas_call(
        fused_transformer_kernel,
        out_shape=jax.ShapeDtypeStruct((BS, VOCAB_PAD), jnp.float32),
        grid=(L,),
        in_specs=[
            shared2d((BS, D)),                                     # x (embeddings)
            shared2d((BS, D)),                                     # cos (tiled over batch)
            shared2d((BS, D)),                                     # sin (even, sign-folded)
            shared2d((BS, D)),                                     # sin (odd, sign-folded)
            shared2d((S, S)),                                      # additive causal bias
            stacked((None, 1, D)),                                 # attn_norm
            stacked((None, D, 3 * D)),                             # wqkv (fused)
            stacked((None, D, D)),                                 # wo
            stacked((None, 1, D)),                                 # ffn_norm
            stacked((None, D, 2 * H)),                             # w1|w3 (fused)
            stacked((None, H, D)),                                 # w2
            shared2d((1, D)),                                      # final_norm
            shared2d((D, VOCAB_PAD)),                              # wp (padded, bf16)
            shared2d((1, VOCAB_PAD)),                              # bp (padded)
        ],
        out_specs=pl.BlockSpec((BS, VOCAB_PAD), lambda l: (0, 0)),
        scratch_shapes=[pltpu.VMEM((BS, D), jnp.float32)],         # resident activations
        compiler_params=pltpu.CompilerParams(
            dimension_semantics=("arbitrary",)),
    )(x, cos, sin_e, sin_o, bias,
      packed["attn_norm"], packed["wqkv"], packed["wo"],
      packed["ffn_norm"], packed["w13"], packed["w2"],
      packed["final_norm"], packed["wp"], packed["bp"])

    return out.reshape(B, S, VOCAB_PAD)[:, :, :VOCAB_SIZE]


# ---------------------------------------------------------------------------
# Weight packing (done ONCE, outside jit): stack layers, fuse QKV / W1|W3, cast to bf16
# ---------------------------------------------------------------------------
def pack_weights(params):
    L, D = N_LAYERS, DIM

    def stack(i):
        return jnp.stack([lp[i] for lp in params["layers"]], axis=0)

    packed = {
        "emb": params["emb"].astype(jnp.float32),
        "attn_norm": stack(0).astype(jnp.float32).reshape(L, 1, D),
        "wqkv": jnp.concatenate([stack(1), stack(2), stack(3)], axis=-1
                                ).astype(jnp.bfloat16),              # (L, D, 3D)
        "wo": stack(4).astype(jnp.bfloat16),                          # (L, D, D)
        "ffn_norm": stack(5).astype(jnp.float32).reshape(L, 1, D),
        "w13": jnp.concatenate([stack(6), stack(7)], axis=-1
                               ).astype(jnp.bfloat16),                # (L, D, 2H)
        "w2": stack(8).astype(jnp.bfloat16),                          # (L, H, D)
        "final_norm": params["final_norm"].astype(jnp.float32).reshape(1, D),
        "wp": jnp.zeros((D, VOCAB_PAD), jnp.float32).at[:, :VOCAB_SIZE].set(
            params["wp"]).astype(jnp.bfloat16),
        "bp": jnp.zeros((1, VOCAB_PAD), jnp.float32).at[:, :VOCAB_SIZE].set(
            params["bp"].reshape(1, VOCAB_SIZE)),
    }
    return packed


# ---------------------------------------------------------------------------
# Parameters / RoPE tables / causal bias (deterministic)
# ---------------------------------------------------------------------------
def rope_tables(seq_len, head_dim, n_heads, theta):
    inv = 1.0 / (theta ** (jnp.arange(0, head_dim, 2, dtype=jnp.float32) / head_dim))
    t = jnp.arange(seq_len, dtype=jnp.float32)
    ang = jnp.outer(t, inv)                                         # (S, head_dim/2)
    cos = jnp.tile(jnp.repeat(jnp.cos(ang), 2, axis=-1), (1, n_heads))   # (S, D)
    sin = jnp.tile(jnp.repeat(jnp.sin(ang), 2, axis=-1), (1, n_heads))   # (S, D)
    lane = jnp.arange(cos.shape[-1]) % 2
    sin_e = jnp.where(lane == 0, -sin, 0.0)    # multiplies x[j+1] at even lanes
    sin_o = jnp.where(lane == 1, sin, 0.0)     # multiplies x[j-1] at odd lanes
    return cos, sin, sin_e, sin_o


def causal_bias(seq_len):
    row = jnp.arange(seq_len)[:, None]
    col = jnp.arange(seq_len)[None, :]
    return jnp.where(col <= row, 0.0, MASK_BIAS).astype(jnp.float32)


def init_params(key):
    keys = jax.random.split(key, 3 + N_LAYERS)
    scale = 0.05
    params = {
        "emb": jax.random.normal(keys[0], (VOCAB_SIZE, DIM), jnp.float32),
        "final_norm": jnp.ones((DIM,), jnp.float32),
        "wp": scale * jax.random.normal(keys[1], (DIM, VOCAB_SIZE), jnp.float32),
        "bp": scale * jax.random.normal(keys[2], (VOCAB_SIZE,), jnp.float32),
        "layers": [],
    }
    for i in range(N_LAYERS):
        lk = jax.random.split(keys[3 + i], 7)
        layer = (
            jnp.ones((DIM,), jnp.float32),                                     # attn_norm
            scale * jax.random.normal(lk[0], (DIM, DIM), jnp.float32),          # wq
            scale * jax.random.normal(lk[1], (DIM, DIM), jnp.float32),          # wk
            scale * jax.random.normal(lk[2], (DIM, DIM), jnp.float32),          # wv
            scale * jax.random.normal(lk[3], (DIM, DIM), jnp.float32),          # wo
            jnp.ones((DIM,), jnp.float32),                                     # ffn_norm
            scale * jax.random.normal(lk[4], (DIM, FFN_HIDDEN), jnp.float32),    # w1
            scale * jax.random.normal(lk[5], (DIM, FFN_HIDDEN), jnp.float32),    # w3
            scale * jax.random.normal(lk[6], (FFN_HIDDEN, DIM), jnp.float32),    # w2
        )
        params["layers"].append(layer)
    return params


# ---------------------------------------------------------------------------
# Pure-JAX reference (mirrors the PyTorch forward and the kernel's bf16 cast points)
# ---------------------------------------------------------------------------
def _bf(x):
    return x.astype(jnp.bfloat16)


def _ref_rotate(x):
    S, D = x.shape
    xr = x.reshape(S, D // 2, 2)
    out = jnp.stack([-xr[..., 1], xr[..., 0]], axis=-1)
    return out.reshape(S, D)


def ref_single(tokens, params, cos, sin):
    x = params["emb"][tokens]                            # (S, D)
    S = x.shape[0]
    mask = jnp.tril(jnp.ones((S, S), dtype=bool))
    for lp in params["layers"]:
        attn_norm, wq, wk, wv, wo, ffn_norm, w1, w3, w2 = lp
        xn = _rmsnorm(x, attn_norm)
        q = jnp.dot(_bf(xn), _bf(wq), preferred_element_type=jnp.float32)
        k = jnp.dot(_bf(xn), _bf(wk), preferred_element_type=jnp.float32)
        v = jnp.dot(_bf(xn), _bf(wv), preferred_element_type=jnp.float32)
        q = q * cos + _ref_rotate(q) * sin
        k = k * cos + _ref_rotate(k) * sin
        attn = jnp.zeros((S, DIM), jnp.float32)
        for h in range(N_HEADS):
            sl = slice(h * HEAD_DIM, (h + 1) * HEAD_DIM)
            qh, kh, vh = q[:, sl], k[:, sl], v[:, sl]
            s = jnp.dot(_bf(qh), _bf(kh).T,
                        preferred_element_type=jnp.float32) / math.sqrt(HEAD_DIM)
            s = jnp.where(mask, s, -jnp.inf)
            p = jax.nn.softmax(s, axis=-1)
            oh = jnp.dot(_bf(p), _bf(vh), preferred_element_type=jnp.float32)
            attn = attn + jnp.dot(_bf(oh), _bf(wo[sl, :]),
                                  preferred_element_type=jnp.float32)
        h1 = x + attn
        hn = _rmsnorm(h1, ffn_norm)
        g = jnp.dot(_bf(hn), _bf(w1), preferred_element_type=jnp.float32)
        u = jnp.dot(_bf(hn), _bf(w3), preferred_element_type=jnp.float32)
        x = h1 + jnp.dot(_bf(jax.nn.silu(g) * u), _bf(w2),
                         preferred_element_type=jnp.float32)
    xn = _rmsnorm(x, params["final_norm"])
    return (jnp.dot(_bf(xn), _bf(params["wp"]), preferred_element_type=jnp.float32)
            + params["bp"])


# ---------------------------------------------------------------------------
if __name__ == "__main__":
    key = jax.random.PRNGKey(0)
    pkey, tkey = jax.random.split(key)
    params = init_params(pkey)
    tokens = jax.random.randint(tkey, (BATCH, SEQ), 0, VOCAB_SIZE, dtype=jnp.int32)

    # Constants built ONCE outside the jitted forward (no per-call stack/cast HBM pass).
    packed = jax.block_until_ready(pack_weights(params))
    cos, sin, sin_e, sin_o = rope_tables(SEQ, HEAD_DIM, N_HEADS, ROPE_THETA)
    cos_bs = jnp.tile(cos, (BATCH, 1))       # (B*S, D) -- batch folded into the row dim
    sin_e_bs = jnp.tile(sin_e, (BATCH, 1))
    sin_o_bs = jnp.tile(sin_o, (BATCH, 1))
    bias = causal_bias(SEQ)

    fwd = jax.jit(inner_transformer_forward)
    out = jax.block_until_ready(fwd(tokens, packed, cos_bs, sin_e_bs, sin_o_bs, bias))
    assert out.shape == (BATCH, SEQ, VOCAB_SIZE)

    ref = jax.vmap(lambda t: ref_single(t, params, cos, sin))(tokens)
    assert bool(jnp.all(jnp.isfinite(out)))
    max_err = float(jnp.max(jnp.abs(out - ref)))
    # NOTE: pl.reciprocal(approx=True) in the softmax denominator is a documented (tiny)
    # deviation from the exact division in the reference.
    assert bool(jnp.allclose(out, ref, atol=2e-2, rtol=2e-2)), max_err

    print("KERNEL_OK")
</pallas_src>

<mosaic_0001>
module attributes {stable_mosaic.version = 11 : i64} {
  func.func @fused_transformer_kernel(%arg0: i32, %arg1: memref<16x256xf32, #tpu.memory_space<vmem>>, %arg2: memref<16x256xf32, #tpu.memory_space<vmem>>, %arg3: memref<16x256xf32, #tpu.memory_space<vmem>>, %arg4: memref<16x256xf32, #tpu.memory_space<vmem>>, %arg5: memref<8x8xf32, #tpu.memory_space<vmem>>, %arg6: memref<1x1x256xf32, #tpu.memory_space<vmem>>, %arg7: memref<1x256x768xbf16, #tpu.memory_space<vmem>>, %arg8: memref<1x256x256xbf16, #tpu.memory_space<vmem>>, %arg9: memref<1x1x256xf32, #tpu.memory_space<vmem>>, %arg10: memref<1x256x1536xbf16, #tpu.memory_space<vmem>>, %arg11: memref<1x768x256xbf16, #tpu.memory_space<vmem>>, %arg12: memref<1x256xf32, #tpu.memory_space<vmem>>, %arg13: memref<256x128xbf16, #tpu.memory_space<vmem>>, %arg14: memref<1x128xf32, #tpu.memory_space<vmem>>, %arg15: memref<16x128xf32, #tpu.memory_space<vmem>>, %arg16: memref<16x256xf32, #tpu.memory_space<vmem>>) attributes {dimension_semantics = [#tpu.dimension_semantics<arbitrary>], iteration_bounds = array<i64: 2>, scalar_prefetch = 0 : i64, scratch_operands = 1 : i64, tpu.core_type = #tpu.core_type<tc>, window_params = [{pipeline_mode = #tpu.pipeline_mode<synchronous>, transform_indices = @transform_0, window_bounds = array<i64: 16, 256>}, {pipeline_mode = #tpu.pipeline_mode<synchronous>, transform_indices = @transform_1, window_bounds = array<i64: 16, 256>}, {pipeline_mode = #tpu.pipeline_mode<synchronous>, transform_indices = @transform_2, window_bounds = array<i64: 16, 256>}, {pipeline_mode = #tpu.pipeline_mode<synchronous>, transform_indices = @transform_3, window_bounds = array<i64: 16, 256>}, {pipeline_mode = #tpu.pipeline_mode<synchronous>, transform_indices = @transform_4, window_bounds = array<i64: 8, 8>}, {transform_indices = @transform_5, window_bounds = array<i64: 1, 1, 256>}, {transform_indices = @transform_6, window_bounds = array<i64: 1, 256, 768>}, {transform_indices = @transform_7, window_bounds = array<i64: 1, 256, 256>}, {transform_indices = @transform_8, window_bounds = array<i64: 1, 1, 256>}, {transform_indices = @transform_9, window_bounds = array<i64: 1, 256, 1536>}, {transform_indices = @transform_10, window_bounds = array<i64: 1, 768, 256>}, {pipeline_mode = #tpu.pipeline_mode<synchronous>, transform_indices = @transform_11, window_bounds = array<i64: 1, 256>}, {pipeline_mode = #tpu.pipeline_mode<synchronous>, transform_indices = @transform_12, window_bounds = array<i64: 256, 128>}, {pipeline_mode = #tpu.pipeline_mode<synchronous>, transform_indices = @transform_13, window_bounds = array<i64: 1, 128>}, {pipeline_mode = #tpu.pipeline_mode<synchronous>, transform_indices = @transform_14, window_bounds = array<i64: 16, 128>}]} {
    %c0_i32 = arith.constant 0 : i32
    %0 = arith.cmpi eq, %arg0, %c0_i32 : i32
    %1 = arith.extui %0 : i1 to i32
    %c0_i32_0 = arith.constant 0 : i32
    %2 = arith.cmpi ne, %1, %c0_i32_0 : i32
    scf.if %2 {
      %c0_56 = arith.constant 0 : index
      %c0_57 = arith.constant 0 : index
      %147 = vector.load %arg1[%c0_56, %c0_57] : memref<16x256xf32, #tpu.memory_space<vmem>>, vector<16x256xf32>
      %c0_58 = arith.constant 0 : index
      %c0_59 = arith.constant 0 : index
      %148 = vector.load %arg16[%c0_58, %c0_59] : memref<16x256xf32, #tpu.memory_space<vmem>>, vector<16x256xf32>
      tpu.vector_store %arg16[%c0_58, %c0_59], %147 {strides = array<i32>} : memref<16x256xf32, #tpu.memory_space<vmem>>, vector<16x256xf32>,
    } else {
    }
    %c0 = arith.constant 0 : index
    %c0_1 = arith.constant 0 : index
    %3 = vector.load %arg16[%c0, %c0_1] : memref<16x256xf32, #tpu.memory_space<vmem>>, vector<16x256xf32>
    %c0_2 = arith.constant 0 : index
    %c0_3 = arith.constant 0 : index
    %4 = vector.load %arg2[%c0_2, %c0_3] : memref<16x256xf32, #tpu.memory_space<vmem>>, vector<16x256xf32>
    %c0_4 = arith.constant 0 : index
    %c0_5 = arith.constant 0 : index
    %5 = vector.load %arg3[%c0_4, %c0_5] : memref<16x256xf32, #tpu.memory_space<vmem>>, vector<16x256xf32>
    %c0_6 = arith.constant 0 : index
    %c0_7 = arith.constant 0 : index
    %6 = vector.load %arg4[%c0_6, %c0_7] : memref<16x256xf32, #tpu.memory_space<vmem>>, vector<16x256xf32>
    %c0_8 = arith.constant 0 : index
    %c0_9 = arith.constant 0 : index
    %7 = vector.load %arg5[%c0_8, %c0_9] : memref<8x8xf32, #tpu.memory_space<vmem>>, vector<8x8xf32>
    %c0_10 = arith.constant 0 : index
    %c0_11 = arith.constant 0 : index
    %c0_12 = arith.constant 0 : index
    %8 = vector.load %arg6[%c0_10, %c0_11, %c0_12] : memref<1x1x256xf32, #tpu.memory_space<vmem>>, vector<1x1x256xf32>
    %9 = vector.shape_cast %8 : vector<1x1x256xf32> to vector<1x256xf32>
    %10 = arith.mulf %3, %3 : vector<16x256xf32>
    %cst = arith.constant dense<0.000000e+00> : vector<16xf32>
    %11 = vector.multi_reduction <add>, %10, %cst [1] : vector<16x256xf32> to vector<16xf32>
    %12 = vector.shape_cast %11 : vector<16xf32> to vector<16x1xf32>
    %cst_13 = arith.constant 2.560000e+02 : f32
    %13 = vector.broadcast %cst_13 : f32 to vector<16x1xf32>
    %14 = arith.divf %12, %13 : vector<16x1xf32>
    %cst_14 = arith.constant 9.99999974E-6 : f32
    %15 = vector.broadcast %cst_14 : f32 to vector<16x1xf32>
    %16 = arith.addf %14, %15 : vector<16x1xf32>
    %17 = math.rsqrt %16 : vector<16x1xf32>
    %18 = vector.broadcast %17 : vector<16x1xf32> to vector<16x256xf32>
    %19 = arith.mulf %3, %18 : vector<16x256xf32>
    %20 = vector.broadcast %9 : vector<1x256xf32> to vector<16x256xf32>
    %21 = arith.mulf %19, %20 : vector<16x256xf32>
    %22 = arith.truncf %21 : vector<16x256xf32> to vector<16x256xbf16>
    %c0_15 = arith.constant 0 : index
    %c0_16 = arith.constant 0 : index
    %c0_17 = arith.constant 0 : index
    %23 = vector.load %arg7[%c0_15, %c0_16, %c0_17] : memref<1x256x768xbf16, #tpu.memory_space<vmem>>, vector<1x256x768xbf16>
    %24 = vector.shape_cast %23 : vector<1x256x768xbf16> to vector<256x768xbf16>
    %cst_18 = arith.constant dense<0.000000e+00> : vector<16x768xf32>
    %25 = tpu.matmul %22, %24, %cst_18 {dimension_numbers = #tpu.dot_dimension_numbers<[1], [0], [0], [1], [0, 0, 1, 1], [], []>} : vector<16x256xbf16>, vector<256x768xbf16>, vector<16x768xf32> -> vector<16x768xf32>
    %26 = vector.extract_strided_slice %25 {offsets = [0, 0], sizes = [16, 256], strides = [1, 1]} : vector<16x768xf32> to vector<16x256xf32>
    %c255_i32 = arith.constant 255 : i32
    %27 = tpu.dynamic_rotate %26 by %c255_i32 dim 1 : vector<16x256xf32>, i32 -> vector<16x256xf32>
    %c1_i32 = arith.constant 1 : i32
    %28 = tpu.dynamic_rotate %26 by %c1_i32 dim 1 : vector<16x256xf32>, i32 -> vector<16x256xf32>
    %29 = arith.mulf %26, %4 : vector<16x256xf32>
    %30 = arith.mulf %27, %5 : vector<16x256xf32>
    %31 = arith.addf %29, %30 : vector<16x256xf32>
    %32 = arith.mulf %28, %6 : vector<16x256xf32>
    %33 = arith.addf %31, %32 : vector<16x256xf32>
    %34 = vector.extract_strided_slice %25 {offsets = [0, 256], sizes = [16, 256], strides = [1, 1]} : vector<16x768xf32> to vector<16x256xf32>
    %c255_i32_19 = arith.constant 255 : i32
    %35 = tpu.dynamic_rotate %34 by %c255_i32_19 dim 1 : vector<16x256xf32>, i32 -> vector<16x256xf32>
    %c1_i32_20 = arith.constant 1 : i32
    %36 = tpu.dynamic_rotate %34 by %c1_i32_20 dim 1 : vector<16x256xf32>, i32 -> vector<16x256xf32>
    %37 = arith.mulf %34, %4 : vector<16x256xf32>
    %38 = arith.mulf %35, %5 : vector<16x256xf32>
    %39 = arith.addf %37, %38 : vector<16x256xf32>
    %40 = arith.mulf %36, %6 : vector<16x256xf32>
    %41 = arith.addf %39, %40 : vector<16x256xf32>
    %42 = vector.extract_strided_slice %25 {offsets = [0, 512], sizes = [16, 256], strides = [1, 1]} : vector<16x768xf32> to vector<16x256xf32>
    %c0_21 = arith.constant 0 : index
    %c0_22 = arith.constant 0 : index
    %c0_23 = arith.constant 0 : index
    %43 = vector.load %arg8[%c0_21, %c0_22, %c0_23] : memref<1x256x256xbf16, #tpu.memory_space<vmem>>, vector<1x256x256xbf16>
    %44 = vector.shape_cast %43 : vector<1x256x256xbf16> to vector<256x256xbf16>
    %cst_24 = arith.constant 0.000000e+00 : f32
    %45 = vector.broadcast %cst_24 : f32 to vector<16x256xf32>
    %46 = vector.extract_strided_slice %33 {offsets = [0, 0], sizes = [16, 128], strides = [1, 1]} : vector<16x256xf32> to vector<16x128xf32>
    %47 = vector.shape_cast %46 : vector<16x128xf32> to vector<2x8x128xf32>
    %48 = arith.truncf %47 : vector<2x8x128xf32> to vector<2x8x128xbf16>
    %49 = vector.extract_strided_slice %41 {offsets = [0, 0], sizes = [16, 128], strides = [1, 1]} : vector<16x256xf32> to vector<16x128xf32>
    %50 = vector.shape_cast %49 : vector<16x128xf32> to vector<2x8x128xf32>
    %51 = arith.truncf %50 : vector<2x8x128xf32> to vector<2x8x128xbf16>
    %52 = vector.extract_strided_slice %42 {offsets = [0, 0], sizes = [16, 128], strides = [1, 1]} : vector<16x256xf32> to vector<16x128xf32>
    %53 = vector.shape_cast %52 : vector<16x128xf32> to vector<2x8x128xf32>
    %54 = arith.truncf %53 : vector<2x8x128xf32> to vector<2x8x128xbf16>
    "tpu.trace_start"() <{level = 10 : i32, message = "bqd,bkd->bqk"}> : () -> ()
    %cst_25 = arith.constant dense<0.000000e+00> : vector<2x8x8xf32>
    %55 = tpu.matmul %48, %51, %cst_25 {dimension_numbers = #tpu.dot_dimension_numbers<[2], [2], [1], [1], [0, 0, 0, 1, 1, 1], [0], [0]>} : vector<2x8x128xbf16>, vector<2x8x128xbf16>, vector<2x8x8xf32> -> vector<2x8x8xf32>
    "tpu.trace_stop"() : () -> ()
    %cst_26 = arith.constant 0.0883883461 : f32
    %56 = vector.broadcast %cst_26 : f32 to vector<2x8x8xf32>
    %57 = arith.mulf %55, %56 : vector<2x8x8xf32>
    %58 = vector.shape_cast %7 : vector<8x8xf32> to vector<1x8x8xf32>
    %59 = vector.broadcast %58 : vector<1x8x8xf32> to vector<2x8x8xf32>
    %60 = arith.addf %57, %59 : vector<2x8x8xf32>
    %cst_27 = arith.constant dense<0xFF800000> : vector<2x8xf32>
    %61 = vector.multi_reduction <maximumf>, %60, %cst_27 [2] : vector<2x8x8xf32> to vector<2x8xf32>
    %62 = vector.shape_cast %61 : vector<2x8xf32> to vector<2x8x1xf32>
    %63 = vector.broadcast %62 : vector<2x8x1xf32> to vector<2x8x8xf32>
    %64 = arith.subf %60, %63 : vector<2x8x8xf32>
    %65 = math.exp %64 : vector<2x8x8xf32>
    %cst_28 = arith.constant dense<0.000000e+00> : vector<2x8xf32>
    %66 = vector.multi_reduction <add>, %65, %cst_28 [2] : vector<2x8x8xf32> to vector<2x8xf32>
    %67 = vector.shape_cast %66 : vector<2x8xf32> to vector<2x8x1xf32>
    %68 = tpu.reciprocal %67 {approx = true} : vector<2x8x1xf32> -> vector<2x8x1xf32>
    %69 = vector.broadcast %68 : vector<2x8x1xf32> to vector<2x8x8xf32>
    %70 = arith.mulf %65, %69 : vector<2x8x8xf32>
    %71 = arith.truncf %70 : vector<2x8x8xf32> to vector<2x8x8xbf16>
    "tpu.trace_start"() <{level = 10 : i32, message = "bqk,bkd->bqd"}> : () -> ()
    %cst_29 = arith.constant dense<0.000000e+00> : vector<2x8x128xf32>
    %72 = tpu.matmul %71, %54, %cst_29 {dimension_numbers = #tpu.dot_dimension_numbers<[2], [1], [1], [2], [0, 0, 0, 1, 1, 2], [0], [0]>} : vector<2x8x8xbf16>, vector<2x8x128xbf16>, vector<2x8x128xf32> -> vector<2x8x128xf32>
    "tpu.trace_stop"() : () -> ()
    %73 = vector.shape_cast %72 : vector<2x8x128xf32> to vector<16x128xf32>
    %74 = arith.truncf %73 : vector<16x128xf32> to vector<16x128xbf16>
    %75 = vector.extract_strided_slice %44 {offsets = [0, 0], sizes = [128, 256], strides = [1, 1]} : vector<256x256xbf16> to vector<128x256xbf16>
    %cst_30 = arith.constant dense<0.000000e+00> : vector<16x256xf32>
    %76 = tpu.matmul %74, %75, %cst_30 {dimension_numbers = #tpu.dot_dimension_numbers<[1], [0], [0], [1], [0, 0, 1, 1], [], []>} : vector<16x128xbf16>, vector<128x256xbf16>, vector<16x256xf32> -> vector<16x256xf32>
    %77 = arith.addf %45, %76 : vector<16x256xf32>
    %78 = vector.extract_strided_slice %33 {offsets = [0, 128], sizes = [16, 128], strides = [1, 1]} : vector<16x256xf32> to vector<16x128xf32>
    %79 = vector.shape_cast %78 : vector<16x128xf32> to vector<2x8x128xf32>
    %80 = arith.truncf %79 : vector<2x8x128xf32> to vector<2x8x128xbf16>
    %81 = vector.extract_strided_slice %41 {offsets = [0, 128], sizes = [16, 128], strides = [1, 1]} : vector<16x256xf32> to vector<16x128xf32>
    %82 = vector.shape_cast %81 : vector<16x128xf32> to vector<2x8x128xf32>
    %83 = arith.truncf %82 : vector<2x8x128xf32> to vector<2x8x128xbf16>
    %84 = vector.extract_strided_slice %42 {offsets = [0, 128], sizes = [16, 128], strides = [1, 1]} : vector<16x256xf32> to vector<16x128xf32>
    %85 = vector.shape_cast %84 : vector<16x128xf32> to vector<2x8x128xf32>
    %86 = arith.truncf %85 : vector<2x8x128xf32> to vector<2x8x128xbf16>
    "tpu.trace_start"() <{level = 10 : i32, message = "bqd,bkd->bqk"}> : () -> ()
    %cst_31 = arith.constant dense<0.000000e+00> : vector<2x8x8xf32>
    %87 = tpu.matmul %80, %83, %cst_31 {dimension_numbers = #tpu.dot_dimension_numbers<[2], [2], [1], [1], [0, 0, 0, 1, 1, 1], [0], [0]>} : vector<2x8x128xbf16>, vector<2x8x128xbf16>, vector<2x8x8xf32> -> vector<2x8x8xf32>
    "tpu.trace_stop"() : () -> ()
    %cst_32 = arith.constant 0.0883883461 : f32
    %88 = vector.broadcast %cst_32 : f32 to vector<2x8x8xf32>
    %89 = arith.mulf %87, %88 : vector<2x8x8xf32>
    %90 = vector.shape_cast %7 : vector<8x8xf32> to vector<1x8x8xf32>
    %91 = vector.broadcast %90 : vector<1x8x8xf32> to vector<2x8x8xf32>
    %92 = arith.addf %89, %91 : vector<2x8x8xf32>
    %cst_33 = arith.constant dense<0xFF800000> : vector<2x8xf32>
    %93 = vector.multi_reduction <maximumf>, %92, %cst_33 [2] : vector<2x8x8xf32> to vector<2x8xf32>
    %94 = vector.shape_cast %93 : vector<2x8xf32> to vector<2x8x1xf32>
    %95 = vector.broadcast %94 : vector<2x8x1xf32> to vector<2x8x8xf32>
    %96 = arith.subf %92, %95 : vector<2x8x8xf32>
    %97 = math.exp %96 : vector<2x8x8xf32>
    %cst_34 = arith.constant dense<0.000000e+00> : vector<2x8xf32>
    %98 = vector.multi_reduction <add>, %97, %cst_34 [2] : vector<2x8x8xf32> to vector<2x8xf32>
    %99 = vector.shape_cast %98 : vector<2x8xf32> to vector<2x8x1xf32>
    %100 = tpu.reciprocal %99 {approx = true} : vector<2x8x1xf32> -> vector<2x8x1xf32>
    %101 = vector.broadcast %100 : vector<2x8x1xf32> to vector<2x8x8xf32>
    %102 = arith.mulf %97, %101 : vector<2x8x8xf32>
    %103 = arith.truncf %102 : vector<2x8x8xf32> to vector<2x8x8xbf16>
    "tpu.trace_start"() <{level = 10 : i32, message = "bqk,bkd->bqd"}> : () -> ()
    %cst_35 = arith.constant dense<0.000000e+00> : vector<2x8x128xf32>
    %104 = tpu.matmul %103, %86, %cst_35 {dimension_numbers = #tpu.dot_dimension_numbers<[2], [1], [1], [2], [0, 0, 0, 1, 1, 2], [0], [0]>} : vector<2x8x8xbf16>, vector<2x8x128xbf16>, vector<2x8x128xf32> -> vector<2x8x128xf32>
    "tpu.trace_stop"() : () -> ()
    %105 = vector.shape_cast %104 : vector<2x8x128xf32> to vector<16x128xf32>
    %106 = arith.truncf %105 : vector<16x128xf32> to vector<16x128xbf16>
    %107 = vector.extract_strided_slice %44 {offsets = [128, 0], sizes = [128, 256], strides = [1, 1]} : vector<256x256xbf16> to vector<128x256xbf16>
    %cst_36 = arith.constant dense<0.000000e+00> : vector<16x256xf32>
    %108 = tpu.matmul %106, %107, %cst_36 {dimension_numbers = #tpu.dot_dimension_numbers<[1], [0], [0], [1], [0, 0, 1, 1], [], []>} : vector<16x128xbf16>, vector<128x256xbf16>, vector<16x256xf32> -> vector<16x256xf32>
    %109 = arith.addf %77, %108 : vector<16x256xf32>
    %110 = arith.addf %3, %109 : vector<16x256xf32>
    %c0_37 = arith.constant 0 : index
    %c0_38 = arith.constant 0 : index
    %c0_39 = arith.constant 0 : index
    %111 = vector.load %arg9[%c0_37, %c0_38, %c0_39] : memref<1x1x256xf32, #tpu.memory_space<vmem>>, vector<1x1x256xf32>
    %112 = vector.shape_cast %111 : vector<1x1x256xf32> to vector<1x256xf32>
    %113 = arith.mulf %110, %110 : vector<16x256xf32>
    %cst_40 = arith.constant dense<0.000000e+00> : vector<16xf32>
    %114 = vector.multi_reduction <add>, %113, %cst_40 [1] : vector<16x256xf32> to vector<16xf32>
    %115 = vector.shape_cast %114 : vector<16xf32> to vector<16x1xf32>
    %cst_41 = arith.constant 2.560000e+02 : f32
    %116 = vector.broadcast %cst_41 : f32 to vector<16x1xf32>
    %117 = arith.divf %115, %116 : vector<16x1xf32>
    %cst_42 = arith.constant 9.99999974E-6 : f32
    %118 = vector.broadcast %cst_42 : f32 to vector<16x1xf32>
    %119 = arith.addf %117, %118 : vector<16x1xf32>
    %120 = math.rsqrt %119 : vector<16x1xf32>
    %121 = vector.broadcast %120 : vector<16x1xf32> to vector<16x256xf32>
    %122 = arith.mulf %110, %121 : vector<16x256xf32>
    %123 = vector.broadcast %112 : vector<1x256xf32> to vector<16x256xf32>
    %124 = arith.mulf %122, %123 : vector<16x256xf32>
    %125 = arith.truncf %124 : vector<16x256xf32> to vector<16x256xbf16>
    %c0_43 = arith.constant 0 : index
    %c0_44 = arith.constant 0 : index
    %c0_45 = arith.constant 0 : index
    %126 = vector.load %arg10[%c0_43, %c0_44, %c0_45] : memref<1x256x1536xbf16, #tpu.memory_space<vmem>>, vector<1x256x1536xbf16>
    %127 = vector.shape_cast %126 : vector<1x256x1536xbf16> to vector<256x1536xbf16>
    %cst_46 = arith.constant dense<0.000000e+00> : vector<16x1536xf32>
    %128 = tpu.matmul %125, %127, %cst_46 {dimension_numbers = #tpu.dot_dimension_numbers<[1], [0], [0], [1], [0, 0, 1, 1], [], []>} : vector<16x256xbf16>, vector<256x1536xbf16>, vector<16x1536xf32> -> vector<16x1536xf32>
    %129 = vector.extract_strided_slice %128 {offsets = [0, 0], sizes = [16, 768], strides = [1, 1]} : vector<16x1536xf32> to vector<16x768xf32>
    %130 = vector.extract_strided_slice %128 {offsets = [0, 768], sizes = [16, 768], strides = [1, 1]} : vector<16x1536xf32> to vector<16x768xf32>
    %131 = arith.negf %129 : vector<16x768xf32>
    %132 = math.exp %131 : vector<16x768xf32>
    %cst_47 = arith.constant 1.000000e+00 : f32
    %133 = vector.broadcast %cst_47 : f32 to vector<16x768xf32>
    %134 = arith.addf %133, %132 : vector<16x768xf32>
    %135 = arith.divf %133, %134 : vector<16x768xf32>
    %136 = arith.mulf %129, %135 : vector<16x768xf32>
    %137 = arith.mulf %136, %130 : vector<16x768xf32>
    %138 = arith.truncf %137 : vector<16x768xf32> to vector<16x768xbf16>
    %c0_48 = arith.constant 0 : index
    %c0_49 = arith.constant 0 : index
    %c0_50 = arith.constant 0 : index
    %139 = vector.load %arg11[%c0_48, %c0_49, %c0_50] : memref<1x768x256xbf16, #tpu.memory_space<vmem>>, vector<1x768x256xbf16>
    %140 = vector.shape_cast %139 : vector<1x768x256xbf16> to vector<768x256xbf16>
    %cst_51 = arith.constant dense<0.000000e+00> : vector<16x256xf32>
    %141 = tpu.matmul %138, %140, %cst_51 {dimension_numbers = #tpu.dot_dimension_numbers<[1], [0], [0], [1], [0, 0, 1, 1], [], []>} : vector<16x768xbf16>, vector<768x256xbf16>, vector<16x256xf32> -> vector<16x256xf32>
    %142 = arith.addf %110, %141 : vector<16x256xf32>
    %c0_52 = arith.constant 0 : index
    %c0_53 = arith.constant 0 : index
    %143 = vector.load %arg16[%c0_52, %c0_53] : memref<16x256xf32, #tpu.memory_space<vmem>>, vector<16x256xf32>
    tpu.vector_store %arg16[%c0_52, %c0_53], %142 {strides = array<i32>} : memref<16x256xf32, #tpu.memory_space<vmem>>, vector<16x256xf32>,
    %c1_i32_54 = arith.constant 1 : i32
    %144 = arith.cmpi eq, %arg0, %c1_i32_54 : i32
    %145 = arith.extui %144 : i1 to i32
    %c0_i32_55 = arith.constant 0 : i32
    %146 = arith.cmpi ne, %145, %c0_i32_55 : i32
    scf.if %146 {
      %c0_56 = arith.constant 0 : index
      %c0_57 = arith.constant 0 : index
      %147 = vector.load %arg12[%c0_56, %c0_57] : memref<1x256xf32, #tpu.memory_space<vmem>>, vector<1x256xf32>
      %148 = arith.mulf %142, %142 : vector<16x256xf32>
      %cst_58 = arith.constant dense<0.000000e+00> : vector<16xf32>
      %149 = vector.multi_reduction <add>, %148, %cst_58 [1] : vector<16x256xf32> to vector<16xf32>
      %150 = vector.shape_cast %149 : vector<16xf32> to vector<16x1xf32>
      %cst_59 = arith.constant 2.560000e+02 : f32
      %151 = vector.broadcast %cst_59 : f32 to vector<16x1xf32>
      %152 = arith.divf %150, %151 : vector<16x1xf32>
      %cst_60 = arith.constant 9.99999974E-6 : f32
      %153 = vector.broadcast %cst_60 : f32 to vector<16x1xf32>
      %154 = arith.addf %152, %153 : vector<16x1xf32>
      %155 = math.rsqrt %154 : vector<16x1xf32>
      %156 = vector.broadcast %155 : vector<16x1xf32> to vector<16x256xf32>
      %157 = arith.mulf %142, %156 : vector<16x256xf32>
      %158 = vector.broadcast %147 : vector<1x256xf32> to vector<16x256xf32>
      %159 = arith.mulf %157, %158 : vector<16x256xf32>
      %160 = arith.truncf %159 : vector<16x256xf32> to vector<16x256xbf16>
      %c0_61 = arith.constant 0 : index
      %c0_62 = arith.constant 0 : index
      %161 = vector.load %arg13[%c0_61, %c0_62] : memref<256x128xbf16, #tpu.memory_space<vmem>>, vector<256x128xbf16>
      %cst_63 = arith.constant dense<0.000000e+00> : vector<16x128xf32>
      %162 = tpu.matmul %160, %161, %cst_63 {dimension_numbers = #tpu.dot_dimension_numbers<[1], [0], [0], [1], [0, 0, 1, 1], [], []>} : vector<16x256xbf16>, vector<256x128xbf16>, vector<16x128xf32> -> vector<16x128xf32>
      %c0_64 = arith.constant 0 : index
      %c0_65 = arith.constant 0 : index
      %163 = vector.load %arg14[%c0_64, %c0_65] : memref<1x128xf32, #tpu.memory_space<vmem>>, vector<1x128xf32>
      %164 = vector.broadcast %163 : vector<1x128xf32> to vector<16x128xf32>
      %165 = arith.addf %162, %164 : vector<16x128xf32>
      %c0_66 = arith.constant 0 : index
      %c0_67 = arith.constant 0 : index
      %166 = vector.load %arg15[%c0_66, %c0_67] : memref<16x128xf32, #tpu.memory_space<vmem>>, vector<16x128xf32>
      tpu.vector_store %arg15[%c0_66, %c0_67], %165 {strides = array<i32>} : memref<16x128xf32, #tpu.memory_space<vmem>>, vector<16x128xf32>,
    } else {
    }
    return
  }
  func.func @transform_0(%arg0: i32) -> (i32, i32) {
    %c0_i32 = arith.constant 0 : i32
    %c0_i32_0 = arith.constant 0 : i32
    %c0_i32_1 = arith.constant 0 : i32
    return %c0_i32, %c0_i32_0 : i32, i32
  }
  func.func @transform_1(%arg0: i32) -> (i32, i32) {
    %c0_i32 = arith.constant 0 : i32
    %c0_i32_0 = arith.constant 0 : i32
    %c0_i32_1 = arith.constant 0 : i32
    return %c0_i32, %c0_i32_0 : i32, i32
  }
  func.func @transform_2(%arg0: i32) -> (i32, i32) {
    %c0_i32 = arith.constant 0 : i32
    %c0_i32_0 = arith.constant 0 : i32
    %c0_i32_1 = arith.constant 0 : i32
    return %c0_i32, %c0_i32_0 : i32, i32
  }
  func.func @transform_3(%arg0: i32) -> (i32, i32) {
    %c0_i32 = arith.constant 0 : i32
    %c0_i32_0 = arith.constant 0 : i32
    %c0_i32_1 = arith.constant 0 : i32
    return %c0_i32, %c0_i32_0 : i32, i32
  }
  func.func @transform_4(%arg0: i32) -> (i32, i32) {
    %c0_i32 = arith.constant 0 : i32
    %c0_i32_0 = arith.constant 0 : i32
    %c0_i32_1 = arith.constant 0 : i32
    return %c0_i32, %c0_i32_0 : i32, i32
  }
  func.func @transform_5(%arg0: i32) -> (i32, i32, i32) {
    %c0_i32 = arith.constant 0 : i32
    %c0_i32_0 = arith.constant 0 : i32
    %c0_i32_1 = arith.constant 0 : i32
    return %arg0, %c0_i32, %c0_i32_0 : i32, i32, i32
  }
  func.func @transform_6(%arg0: i32) -> (i32, i32, i32) {
    %c0_i32 = arith.constant 0 : i32
    %c0_i32_0 = arith.constant 0 : i32
    %c0_i32_1 = arith.constant 0 : i32
    return %arg0, %c0_i32, %c0_i32_0 : i32, i32, i32
  }
  func.func @transform_7(%arg0: i32) -> (i32, i32, i32) {
    %c0_i32 = arith.constant 0 : i32
    %c0_i32_0 = arith.constant 0 : i32
    %c0_i32_1 = arith.constant 0 : i32
    return %arg0, %c0_i32, %c0_i32_0 : i32, i32, i32
  }
  func.func @transform_8(%arg0: i32) -> (i32, i32, i32) {
    %c0_i32 = arith.constant 0 : i32
    %c0_i32_0 = arith.constant 0 : i32
    %c0_i32_1 = arith.constant 0 : i32
    return %arg0, %c0_i32, %c0_i32_0 : i32, i32, i32
  }
  func.func @transform_9(%arg0: i32) -> (i32, i32, i32) {
    %c0_i32 = arith.constant 0 : i32
    %c0_i32_0 = arith.constant 0 : i32
    %c0_i32_1 = arith.constant 0 : i32
    return %arg0, %c0_i32, %c0_i32_0 : i32, i32, i32
  }
  func.func @transform_10(%arg0: i32) -> (i32, i32, i32) {
    %c0_i32 = arith.constant 0 : i32
    %c0_i32_0 = arith.constant 0 : i32
    %c0_i32_1 = arith.constant 0 : i32
    return %arg0, %c0_i32, %c0_i32_0 : i32, i32, i32
  }
  func.func @transform_11(%arg0: i32) -> (i32, i32) {
    %c0_i32 = arith.constant 0 : i32
    %c0_i32_0 = arith.constant 0 : i32
    %c0_i32_1 = arith.constant 0 : i32
    return %c0_i32, %c0_i32_0 : i32, i32
  }
  func.func @transform_12(%arg0: i32) -> (i32, i32) {
    %c0_i32 = arith.constant 0 : i32
    %c0_i32_0 = arith.constant 0 : i32
    %c0_i32_1 = arith.constant 0 : i32
    return %c0_i32, %c0_i32_0 : i32, i32
  }
  func.func @transform_13(%arg0: i32) -> (i32, i32) {
    %c0_i32 = arith.constant 0 : i32
    %c0_i32_0 = arith.constant 0 : i32
    %c0_i32_1 = arith.constant 0 : i32
    return %c0_i32, %c0_i32_0 : i32, i32
  }
  func.func @transform_14(%arg0: i32) -> (i32, i32) {
    %c0_i32 = arith.constant 0 : i32
    %c0_i32_0 = arith.constant 0 : i32
    %c0_i32_1 = arith.constant 0 : i32
    return %c0_i32, %c0_i32_0 : i32, i32
  }
}

</mosaic_0001>

<bundles_post_ra>
// kernel: inner_transformer_forward.1
= control target key start
LH: loop header
LB: loop body
LE: loop exit
PB: predicated region body
PF: predicated region fallthrough
CT: control target
= control target key end

     0   :  { %s8194_s0 = inlined_call_operand.vmem [shape: f32[16,256], index: 0, kind: input, shape index: {}]   ;;  %s8195_s1 = inlined_call_operand.hbm [shape: f32[16,256], index: 1, kind: input, shape index: {}]   ;;  %s8196_s2 = inlined_call_operand.hbm [shape: f32[16,256], index: 2, kind: input, shape index: {}]   ;;  %s8197_s3 = inlined_call_operand.hbm [shape: f32[16,256], index: 3, kind: input, shape index: {}]   ;;  %s8198_s4 = inlined_call_operand.hbm [shape: f32[8,8], index: 4, kind: input, shape index: {}]   ;;  %s8199_s5 = inlined_call_operand.hbm [shape: f32[2,1,256], index: 5, kind: input, shape index: {}]   ;;  %s8200_s6 = inlined_call_operand.hbm [shape: bf16[2,256,768], index: 6, kind: input, shape index: {}]   ;;  %s8201_s7 = inlined_call_operand.hbm [shape: bf16[2,256,256], index: 7, kind: input, shape index: {}]   ;;  %s8202_s8 = inlined_call_operand.hbm [shape: f32[2,1,256], index: 8, kind: input, shape index: {}]   ;;  %s8203_s9 = inlined_call_operand.hbm [shape: bf16[2,256,1536], index: 9, kind: input, shape index: {}]   ;;  %s8204_s10 = inlined_call_operand.hbm [shape: bf16[2,768,256], index: 10, kind: input, shape index: {}]   ;;  %s8205_s11 = inlined_call_operand.hbm [shape: f32[1,256], index: 11, kind: input, shape index: {}]   ;;  %s8206_s12 = inlined_call_operand.hbm [shape: bf16[256,128], index: 12, kind: input, shape index: {}]   ;;  %s8207_s13 = inlined_call_operand.hbm [shape: f32[1,128], index: 13, kind: input, shape index: {}]   ;;  %s8208_s14 = inlined_call_operand.vmem [shape: f32[16,128], index: 14, kind: output, shape index: {}]  }
   0x1   :  { %8246 = sst [smem:[#allocation34_spill]] %s8194_s0 }
   0x2   :  { %8247 = sst [smem:[#allocation35_spill]] %s8195_s1 }
   0x3   :  { %8248 = sst [smem:[#allocation36_spill]] %s8196_s2 }
   0x4   :  { %8249 = sst [smem:[#allocation37_spill]] %s8199_s5 }
   0x5   :  { %8250 = sst [smem:[#allocation38_spill]] %s8200_s6 }
   0x6   :  { %8251 = sst [smem:[#allocation39_spill]] %s8201_s7 }
   0x7   :  { %8252 = sst [smem:[#allocation40_spill]] %s8204_s10 }
   0x8   :  { %8253 = sst [smem:[#allocation41_spill]] %s8206_s12 }
   0x9   :  { %8254 = sst [smem:[#allocation42_spill]] %s8207_s13 }
   0xa   :  { %8255 = sst [smem:[#allocation43_spill]] %s8208_s14 }
   0xb   :  { %19 = vsyncpa [#allocation4], 0 }
   0xc   :  { %20 = vsyncpa [#allocation6], 0 }
   0xd   :  { %21 = vsyncpa [#allocation9], 0 }
   0xe   :  { %22 = vsyncpa [#allocation19], 0  ;;  %s7003_s29 = smov 0   ;;  %s7005_s30 = smov 0  }
   0xf   :  { %s7007_s15 = smov 0   ;;  %s7009_s16 = smov 0  }
  0x10 LB: > { %8256 = sst [smem:[#allocation27_spill]] %s6890_s30  ;;  %s6900_s17 = smov [#allocation3]   ;;  %s6898_s16 = sphi %s7009_s16, %s8319_s16   ;;  %s6894_s15 = sphi %s7007_s15, %s8322_s15   ;;  %s6890_s30 = sphi %s7005_s30, %s8321_s30   ;;  %s6886_s29 = sphi %s7003_s29, %s8320_s29  }
  0x11   : > { %8257 = sst [smem:[#allocation28_spill]] %s6894_s15  ;;  %s393_s18 = sshll.u32 %s6900_s17, 4  ;;  %s394_s18 = int_to_ptr.vmem [resolvable:$true] %s393_s18 }
  0x12   : > { %s7024_s19 = sadd.s32 4294967295, %s6898_s16   ;;  %p5000_p0 = scmp.ge.s32.totalorder %s6898_s16, 1 }
  0x13   : > { %8258 = sst [smem:[#allocation29_spill]] %s7024_s19  ;;  %p8210_p1 = scmp.eq.s32.totalorder %s7024_s19, 0 }
  0x14   : > { %p378_p2 = scmp.lt.s32.totalorder %s6898_s16, 3  ;;  %s7043_s22 = sadd.s32 1, %s6898_s16  }
  0x15   : > { %8262 = sst [smem:[#allocation31_spill]] %s7043_s22  ;;  %s8263_s1 = sld [smem:[#allocation35_spill]] }
  0x16   : > { %p7030_p4 = pnand %p5000_p0, %p378_p2 }
  0x18   : > { %s8259_s20 = scalar_select %p7030_p4, 1, 0 }
  0x19   : > { %p5634_p5 = pneg %p7030_p4 }
  0x1a   : > { %8260 = sst [smem:[#allocation30_spill]] %s8259_s20 }
  0x1b   : > { %p7038_p6 = pnand %p5634_p5, %p8210_p1  ;;  %s6464_s25 = scalar_lea.hbm %s8263_s1, 512 }
  0x1c   : > { %p6465_p7 = scmp.ne.s32.totalorder %s8263_s1, %s6464_s25  ;;  %p6471_p11 = scmp.lt.u32.totalorder %s6464_s25, %s8263_s1 }
  0x1d   : > { %s8261_s21 = scalar_select %p7038_p6, 1, 0 }
  0x1e   : > { %p7053_p8 = pneg %p7038_p6 }
  0x20   : > { %s8264_s28 = scalar_select %p7053_p8, 1, 0 }
  0x21   : > { %p6467_p9 = pnand %p7053_p8, %p6465_p7 }
  0x23   : > { %p6468_p10 = pneg %p6467_p9 }
  0x25   : > { %p6473_p12 = pnand %p6471_p11, %p6468_p10 }
  0x27   : > { %6476 = shalt.err (!%p6473_p12)
}
  0x28   : > { %s6477_s23 = scalar_lea.vmem %s394_s18, 512  ;;  %p6485_p5 = scmp.lt.s32.totalorder %s394_s18, %s394_s18 }
  0x29   : > { %p6478_p13 = scmp.ne.s32.totalorder %s394_s18, %s6477_s23  ;;  %p6486_p3 = scmp.lt.s32.totalorder %s6477_s23, %s6477_s23 }
  0x2b   : > { %p6480_p0 = pnand %p6478_p13, %p7053_p8  ;;  %p6487_p1 = por %p6486_p3, %p6485_p5 }
  0x2d   : > { %p6481_p2 = pneg %p6480_p0 }
  0x2f   : > { %p6488_p4 = pnand %p6487_p1, %p6481_p2 }
  0x31   : > { %6491 = shalt.err (!%p6488_p4)
}
  0x32   : > { %s8214_s24 = smov 256   ;;  %s8216_s14 = smov 16  }
  0x33   : > { %5637 = dma.hbm_to_vmem [thread:$0]  (!%p7038_p6), %s8263_s1, 512, %s394_s18, [#allocation4], %s8214_s24, %s8214_s24, %s8216_s14  }
  0x34   : > { %s137_s27 = ssub.s32 %s6898_s16, %s7043_s22  ;;  %s140_s17 = sadd.s32 1, %s6894_s15 }
  0x35   : > { %p138_p1 = scmp.eq.s32.totalorder %s137_s27, 0  ;;  %p147_p3 = scmp.ne.s32.totalorder %s6894_s15, %s6890_s30 }
  0x36   : > { %p148_p4 = scmp.eq.s32.totalorder %s6898_s16, 0  ;;  %p153_p7 = scmp.ne.s32.totalorder %s6890_s30, %s6886_s29 }
  0x37   : > { %s7081_s23 = scalar_select %p138_p1, %s6894_s15, %s140_s17  }
  0x38   : > { %p149_p9 = por %p148_p4, %p147_p3  ;;  %p8266_p10 = scmp.eq.s32.totalorder %s7024_s19, 0 }
  0x39   : > { %8265 = sst [smem:[#allocation32_spill]] %s7081_s23  ;;  %p5682_p12 = scmp.lt.s32.totalorder %s6898_s16, 2 }
  0x3a   : > { %p7085_p11 = por %p8266_p10, %p153_p7  ;;  %s479_s20 = sand.u32 1, %s6898_s16  }
  0x3b   : > { %s7092_s25 = sand.u32 1, %s6894_s15   ;;  %s8222_s26 = sshll.u32 %s6898_s16, 5 }
  0x3c   : > { %s8267_s0 = scalar_select %p7085_p11, 1, 0 }
  0x3d   : > { %s8221_s18 = sshll.u32 %s7092_s25, 1  ;;  %s8269_s5 = sld [smem:[#allocation37_spill]] }
  0x3e   : > { %8268 = sst [smem:[#allocation33_spill]] %s8267_s0  ;;  %s483_s24 = scalar_lea.vmem [#allocation10], %s8221_s18 }
  0x3f   : > { %s491_s14 = sshll.u32 %s483_s24, 4  ;;  %p7105_p13 = pnand %p5682_p12, %p149_p9  ;;  %s7109_s14 = int_to_ptr.vmem [resolvable:$true] %s491_s14 }
  0x40   : > { %s8230_s15 = smul.u32 12288, %s6898_s16  ;;  %s7113_s22 = scalar_lea.sflag [#allocation4], %s479_s20 }
  0x41   : > { %s8270_s1 = scalar_select %p7105_p13, 1, 0 }
  0x42   : > { %p7119_p2 = pneg %p7105_p13 }
  0x43   : > { %s7101_s17 = scalar_lea.hbm %s8269_s5, %s8222_s26  ;;  %s6497_s26 = scalar_lea.hbm %s8269_s5, 64 }
  0x44   : > { %s6492_s27 = scalar_lea.hbm %s7101_s17, 32  ;;  %p6498_p3 = scmp.lt.u32.totalorder %s7101_s17, %s8269_s5 }
  0x45   : > { %p6493_p0 = scmp.ne.s32.totalorder %s7101_s17, %s6492_s27  ;;  %p6499_p4 = scmp.lt.u32.totalorder %s6497_s26, %s6492_s27 }
  0x46   : > { %s8271_s29 = scalar_select %p7119_p2, 1, 0 }
  0x47   : > { %p6495_p5 = pnand %p7119_p2, %p6493_p0  ;;  %p6500_p7 = por %p6499_p4, %p6498_p3 }
  0x48   : > { %p6501_p9 = scmp.lt.u32.totalorder %s6492_s27, %s7101_s17 }
  0x49   : > { %p6496_p1 = pneg %p6495_p5 }
  0x4a   : > { %p6502_p10 = por %p6501_p9, %p6500_p7 }
  0x4c   : > { %p6503_p12 = pnand %p6502_p10, %p6496_p1 }
  0x4e   : > { %6506 = shalt.err (!%p6503_p12)
}
  0x4f   : > { %s6507_s20 = scalar_lea.vmem %s7109_s14, 32  ;;  %s6903_s18 = smov [#allocation10]  }
  0x50   : > { %p6508_p0 = scmp.ne.s32.totalorder %s7109_s14, %s6507_s20  ;;  %s6512_s24 = sshll.u32 %s6903_s18, 4  ;;  %s6513_s24 = int_to_ptr.vmem [resolvable:$false] %s6512_s24 }
  0x51   : > { %s6514_s0 = scalar_lea.vmem %s6513_s24, 64  ;;  %p6515_p6 = scmp.lt.s32.totalorder %s7109_s14, %s6513_s24 }
  0x52   : > { %p6510_p5 = pnand %p6508_p0, %p7119_p2  ;;  %p6516_p8 = scmp.lt.s32.totalorder %s6514_s0, %s6507_s20 }
  0x54   : > { %p6511_p11 = pneg %p6510_p5  ;;  %p6517_p3 = por %p6516_p8, %p6515_p6 }
  0x56   : > { %p6518_p4 = pnand %p6517_p3, %p6511_p11 }
  0x58   : > { %6521 = shalt.err (!%p6518_p4)
}
  0x59   : > { %5659 = dma.hbm_to_vmem [thread:$0]  (!%p7105_p13), %s7101_s17, 32, %s7109_s14, %s7113_s22  }
  0x5a   : > { %s8272_s6 = sld [smem:[#allocation38_spill]]  ;;  %s8273_s18 = smul.u32 768, %s7092_s25 }
  0x5c   : > { %s502_s20 = scalar_lea.vmem [#allocation11], %s8273_s18 }
  0x5d   : > { %s509_s24 = sshll.u32 %s502_s20, 4  ;;  %s7152_s24 = int_to_ptr.vmem [resolvable:$true] %s509_s24 }
  0x60   : > { %s7148_s27 = scalar_lea.hbm %s8272_s6, %s8230_s15  ;;  %s6527_s23 = scalar_lea.hbm %s8272_s6, 24576 }
  0x61   : > { %s6522_s0 = scalar_lea.hbm %s7148_s27, 12288  ;;  %p6528_p1 = scmp.lt.u32.totalorder %s7148_s27, %s8272_s6 }
  0x62   : > { %p6523_p6 = scmp.ne.s32.totalorder %s7148_s27, %s6522_s0  ;;  %p6529_p7 = scmp.lt.u32.totalorder %s6527_s23, %s6522_s0 }
  0x63   : > { %p6531_p10 = scmp.lt.u32.totalorder %s6522_s0, %s7148_s27 }
  0x64   : > { %p6525_p8 = pnand %p6523_p6, %p7119_p2  ;;  %p6530_p9 = por %p6529_p7, %p6528_p1 }
  0x66   : > { %p6526_p11 = pneg %p6525_p8  ;;  %p6532_p12 = por %p6531_p10, %p6530_p9 }
  0x68   : > { %p6533_p0 = pnand %p6532_p12, %p6526_p11 }
  0x6a   : > { %6536 = shalt.err (!%p6533_p0)
}
  0x6b   : > { %s6537_s18 = scalar_lea.vmem %s7152_s24, 12288  ;;  %s6904_s20 = smov [#allocation11]  }
  0x6c   : > { %p6538_p5 = scmp.ne.s32.totalorder %s7152_s24, %s6537_s18  ;;  %s6542_s14 = sshll.u32 %s6904_s20, 4  ;;  %s6543_s14 = int_to_ptr.vmem [resolvable:$false] %s6542_s14 }
  0x6d   : > { %s6544_s15 = scalar_lea.vmem %s6543_s14, 24576  ;;  %p6545_p6 = scmp.lt.s32.totalorder %s7152_s24, %s6543_s14 }
  0x6e   : > { %p6540_p3 = pnand %p6538_p5, %p7119_p2  ;;  %p6546_p8 = scmp.lt.s32.totalorder %s6544_s15, %s6537_s18 }
  0x70   : > { %p6541_p4 = pneg %p6540_p3  ;;  %p6547_p1 = por %p6546_p8, %p6545_p6 }
  0x72   : > { %p6548_p7 = pnand %p6547_p1, %p6541_p4 }
  0x74   : > { %6551 = shalt.err (!%p6548_p7)
}
  0x75   : > { %s6905_s0 = smov 384   ;;  %s6906_s17 = smov 24  }
  0x76   : > { %5662 = dma.hbm_to_vmem [thread:$0]  (!%p7105_p13), %s7148_s27, 12288, %s7152_s24, %s7113_s22, %s6905_s0, %s6905_s0, %s6906_s17  }
  0x77   : > { %s5013_s23 = sshll.u32 %s7092_s25, 8  ;;  %s5486_s26 = sshll.u32 %s6898_s16, 12 }
  0x78   : > { %s8274_s7 = sld [smem:[#allocation39_spill]]  ;;  %s523_s14 = scalar_lea.vmem [#allocation12], %s5013_s23 }
  0x79   : > { %s530_s15 = sshll.u32 %s523_s14, 4  ;;  %s7183_s15 = int_to_ptr.vmem [resolvable:$true] %s530_s15 }
  0x7e   : > { %s7181_s18 = scalar_lea.hbm %s8274_s7, %s5486_s26  ;;  %s6557_s0 = scalar_lea.hbm %s8274_s7, 8192 }
  0x7f   : > { %s6552_s6 = scalar_lea.hbm %s7181_s18, 4096  ;;  %p6558_p12 = scmp.lt.u32.totalorder %s7181_s18, %s8274_s7 }
  0x80   : > { %p6553_p11 = scmp.ne.s32.totalorder %s7181_s18, %s6552_s6  ;;  %p6559_p0 = scmp.lt.u32.totalorder %s6557_s0, %s6552_s6 }
  0x81   : > { %p6561_p3 = scmp.lt.u32.totalorder %s6552_s6, %s7181_s18 }
  0x82   : > { %p6555_p9 = pnand %p6553_p11, %p7119_p2  ;;  %p6560_p5 = por %p6559_p0, %p6558_p12 }
  0x84   : > { %p6556_p10 = pneg %p6555_p9  ;;  %p6562_p4 = por %p6561_p3, %p6560_p5 }
  0x86   : > { %p6563_p6 = pnand %p6562_p4, %p6556_p10 }
  0x88   : > { %6566 = shalt.err (!%p6563_p6)
}
  0x89   : > { %s6567_s23 = scalar_lea.vmem %s7183_s15, 4096  ;;  %s6907_s26 = smov [#allocation12]  }
  0x8a   : > { %p6568_p8 = scmp.ne.s32.totalorder %s7183_s15, %s6567_s23  ;;  %s6572_s20 = sshll.u32 %s6907_s26, 4  ;;  %s6573_s20 = int_to_ptr.vmem [resolvable:$false] %s6572_s20 }
  0x8b   : > { %s6574_s14 = scalar_lea.vmem %s6573_s20, 8192  ;;  %p6575_p11 = scmp.lt.s32.totalorder %s7183_s15, %s6573_s20 }
  0x8c   : > { %p6570_p1 = pnand %p6568_p8, %p7119_p2  ;;  %p6576_p9 = scmp.lt.s32.totalorder %s6574_s14, %s6567_s23 }
  0x8e   : > { %p6571_p7 = pneg %p6570_p1  ;;  %p6577_p12 = por %p6576_p9, %p6575_p11 }
  0x90   : > { %p6578_p0 = pnand %p6577_p12, %p6571_p7 }
  0x92   : > { %6581 = shalt.err (!%p6578_p0)
}
  0x93   : > { %s8244_s6 = smov 128   ;;  %s8245_s27 = smov 8  }
  0x94   : > { %5665 = dma.hbm_to_vmem [thread:$0]  (!%p7105_p13), %s7181_s18, 4096, %s7183_s15, %s7113_s22, %s8244_s6, %s8244_s6, %s8245_s27  }
  0x95   : > { %s6910_s24 = smov [#allocation5]   ;;  %s8275_s5 = sshll.u32 %s6898_s16, 5 }
  0x96   : > { %s406_s0 = sshll.u32 %s6910_s24, 4  ;;  %s7215_s26 = scalar_lea.hbm %s8202_s8, %s8275_s5  ;;  %s407_s0 = int_to_ptr.vmem [resolvable:$true] %s406_s0 }
  0x97   : > { %s8276_s20 = sshll.u32 %s7092_s25, 1  ;;  %s8277_s2 = sld [smem:[#allocation36_spill]] }
  0x98   : > { %s544_s14 = scalar_lea.vmem [#allocation13], %s8276_s20  ;;  %p8278_p5 = scmp.ne.s32.totalorder %s8264_s28, 0 }
  0x99   : > { %s552_s7 = sshll.u32 %s544_s14, 4  ;;  %s553_s7 = int_to_ptr.vmem [resolvable:$true] %s552_s7 }
  0x9d   : > { %s6582_s13 = scalar_lea.hbm %s8277_s2, 512 }
  0x9e   : > { %p6583_p10 = scmp.ne.s32.totalorder %s8277_s2, %s6582_s13  ;;  %p6589_p6 = scmp.lt.u32.totalorder %s6582_s13, %s8277_s2 }
  0xa0   : > { %p6585_p3 = pnand %p6583_p10, %p8278_p5 }
  0xa2   : > { %p6586_p4 = pneg %p6585_p3 }
  0xa4   : > { %p6591_p8 = pnand %p6589_p6, %p6586_p4 }
  0xa6   : > { %6594 = shalt.err (!%p6591_p8)
}
  0xa7   : > { %s6595_s24 = scalar_lea.vmem %s407_s0, 512  ;;  %p6603_p9 = scmp.lt.s32.totalorder %s407_s0, %s407_s0 }
  0xa8   : > { %p6596_p1 = scmp.ne.s32.totalorder %s407_s0, %s6595_s24  ;;  %p6604_p12 = scmp.lt.s32.totalorder %s6595_s24, %s6595_s24 }
  0xaa   : > { %p6598_p7 = pnand %p6596_p1, %p8278_p5  ;;  %p6605_p0 = por %p6604_p12, %p6603_p9 }
  0xac   : > { %p6599_p11 = pneg %p6598_p7 }
  0xae   : > { %p6606_p13 = pnand %p6605_p0, %p6599_p11 }
  0xb0   : > { %6609 = shalt.err (!%p6606_p13)
}
  0xb1   : > { %p8279_p10 = scmp.ne.s32.totalorder %s8261_s21, 0  ;;  %s8280_s10 = smov 16  }
  0xb2   : > { %s8281_s12 = smov 256   ;;  %s6610_s19 = scalar_lea.hbm %s7215_s26, 32 }
  0xb3   : > { %5640 = dma.hbm_to_vmem [thread:$0]  (!%p8279_p10), %s8277_s2, 512, %s407_s0, [#allocation6], %s8281_s12, %s8281_s12, %s8280_s10  }
  0xb4   : > { %p6611_p3 = scmp.ne.s32.totalorder %s7215_s26, %s6610_s19  ;;  %s6615_s23 = scalar_lea.hbm %s8202_s8, 64 }
  0xb5   : > { %p6616_p6 = scmp.lt.u32.totalorder %s7215_s26, %s8202_s8  ;;  %p6617_p8 = scmp.lt.u32.totalorder %s6615_s23, %s6610_s19 }
  0xb6   : > { %p6613_p4 = pnand %p6611_p3, %p7119_p2  ;;  %p6619_p7 = scmp.lt.u32.totalorder %s6610_s19, %s7215_s26 }
  0xb7   : > { %p6618_p1 = por %p6617_p8, %p6616_p6 }
  0xb8   : > { %p6614_p13 = pneg %p6613_p4 }
  0xb9   : > { %p6620_p11 = por %p6619_p7, %p6618_p1 }
  0xbb   : > { %p6621_p9 = pnand %p6620_p11, %p6614_p13 }
  0xbd   : > { %6624 = shalt.err (!%p6621_p9)
}
  0xbe   : > { %s6625_s0 = scalar_lea.vmem %s553_s7, 32  ;;  %s6911_s18 = smov [#allocation13]  }
  0xbf   : > { %p6626_p12 = scmp.ne.s32.totalorder %s553_s7, %s6625_s0  ;;  %s6630_s15 = sshll.u32 %s6911_s18, 4  ;;  %s6631_s15 = int_to_ptr.vmem [resolvable:$false] %s6630_s15 }
  0xc0   : > { %s6632_s24 = scalar_lea.vmem %s6631_s15, 64  ;;  %p6633_p4 = scmp.lt.s32.totalorder %s553_s7, %s6631_s15 }
  0xc1   : > { %p6628_p0 = pnand %p6626_p12, %p7119_p2  ;;  %p6634_p10 = scmp.lt.s32.totalorder %s6632_s24, %s6625_s0 }
  0xc3   : > { %p6629_p3 = pneg %p6628_p0  ;;  %p6635_p5 = por %p6634_p10, %p6633_p4 }
  0xc5   : > { %p6636_p6 = pnand %p6635_p5, %p6629_p3 }
  0xc7   : > { %6639 = shalt.err (!%p6636_p6)
}
  0xc8   : > { %p8282_p8 = scmp.ne.s32.totalorder %s8270_s1, 0  ;;  %s6912_s30 = smov [#allocation7]  }
  0xc9   : > { %s419_s13 = sshll.u32 %s6912_s30, 4  ;;  %s6913_s19 = smov [#allocation8]   ;;  %s420_s13 = int_to_ptr.vmem [resolvable:$true] %s419_s13 }
  0xca   : > { %5668 = dma.hbm_to_vmem [thread:$0]  (!%p8282_p8), %s7215_s26, 32, %s553_s7, %s7113_s22  }
  0xcb   : > { %s433_s5 = sshll.u32 %s6913_s19, 4  ;;  %s6640_s20 = scalar_lea.hbm %s8197_s3, 512  ;;  %s434_s5 = int_to_ptr.vmem [resolvable:$true] %s433_s5 }
  0xcc   : > { %p6641_p5 = scmp.ne.s32.totalorder %s8197_s3, %s6640_s20  ;;  %p8283_p10 = scmp.ne.s32.totalorder %s8264_s28, 0 }
  0xcd   : > { %p6647_p7 = scmp.lt.u32.totalorder %s6640_s20, %s8197_s3 }
  0xce   : > { %p6643_p13 = pnand %p6641_p5, %p8283_p10 }
  0xd0   : > { %p6644_p1 = pneg %p6643_p13 }
  0xd2   : > { %p6649_p11 = pnand %p6647_p7, %p6644_p1 }
  0xd4   : > { %6652 = shalt.err (!%p6649_p11)
}
  0xd5   : > { %s6653_s7 = scalar_lea.vmem %s420_s13, 512  ;;  %p6661_p3 = scmp.lt.s32.totalorder %s420_s13, %s420_s13 }
  0xd6   : > { %p6654_p9 = scmp.ne.s32.totalorder %s420_s13, %s6653_s7  ;;  %p6662_p4 = scmp.lt.s32.totalorder %s6653_s7, %s6653_s7 }
  0xd8   : > { %p6656_p12 = pnand %p6654_p9, %p8283_p10  ;;  %p6663_p6 = por %p6662_p4, %p6661_p3 }
  0xda   : > { %p6657_p0 = pneg %p6656_p12 }
  0xdc   : > { %p6664_p8 = pnand %p6663_p6, %p6657_p0 }
  0xde   : > { %6667 = shalt.err (!%p6664_p8)
}
  0xdf   : > { %p8284_p5 = scmp.ne.s32.totalorder %s8261_s21, 0  ;;  %s5588_s30 = smul.u32 1536, %s7092_s25 }
  0xe0   : > { %s6668_s23 = scalar_lea.hbm %s8198_s4, 128 }
  0xe1   : > { %5643 = dma.hbm_to_vmem [thread:$0]  (!%p8284_p5), %s8197_s3, 512, %s420_s13, [#allocation6], %s8281_s12, %s8281_s12, %s8280_s10  }
  0xe2   : > { %p6669_p8 = scmp.ne.s32.totalorder %s8198_s4, %s6668_s23  ;;  %p6675_p7 = scmp.lt.u32.totalorder %s6668_s23, %s8198_s4 }
  0xe4   : > { %p6671_p13 = pnand %p6669_p8, %p8283_p10 }
  0xe6   : > { %p6672_p1 = pneg %p6671_p13 }
  0xe8   : > { %p6677_p11 = pnand %p6675_p7, %p6672_p1 }
  0xea   : > { %6680 = shalt.err (!%p6677_p11)
}
  0xeb   : > { %s6681_s10 = scalar_lea.vmem %s434_s5, 128  ;;  %p6689_p3 = scmp.lt.s32.totalorder %s434_s5, %s434_s5 }
  0xec   : > { %p6682_p9 = scmp.ne.s32.totalorder %s434_s5, %s6681_s10  ;;  %p6690_p4 = scmp.lt.s32.totalorder %s6681_s10, %s6681_s10 }
  0xee   : > { %p6684_p12 = pnand %p6682_p9, %p8283_p10  ;;  %p6691_p6 = por %p6690_p4, %p6689_p3 }
  0xf0   : > { %p6685_p0 = pneg %p6684_p12 }
  0xf2   : > { %p6692_p2 = pnand %p6691_p6, %p6685_p0 }
  0xf4   : > { %6695 = shalt.err (!%p6692_p2)
}
  0xf5   : > { %5646 = dma.hbm_to_vmem [thread:$0]  (!%p8284_p5), %s8198_s4, 128, %s434_s5, [#allocation9]  }
  0xf6   : > { %s5589_s15 = smul.u32 24576, %s6898_s16  ;;  %s563_s7 = scalar_lea.vmem [#allocation14], %s5588_s30 }
  0xf7   : > { %s570_s26 = sshll.u32 %s563_s7, 4  ;;  %p8285_p8 = scmp.ne.s32.totalorder %s8271_s29, 0  ;;  %s7304_s26 = int_to_ptr.vmem [resolvable:$true] %s570_s26 }
  0xf8   : > { %s7302_s17 = scalar_lea.hbm %s8203_s9, %s5589_s15  ;;  %s6701_s30 = scalar_lea.hbm %s8203_s9, 49152 }
  0xf9   : > { %s6696_s23 = scalar_lea.hbm %s7302_s17, 24576  ;;  %p6702_p7 = scmp.lt.u32.totalorder %s7302_s17, %s8203_s9 }
  0xfa   : > { %p6697_p2 = scmp.ne.s32.totalorder %s7302_s17, %s6696_s23  ;;  %p6703_p11 = scmp.lt.u32.totalorder %s6701_s30, %s6696_s23 }
  0xfb   : > { %p6705_p12 = scmp.lt.u32.totalorder %s6696_s23, %s7302_s17 }
  0xfc   : > { %p6699_p13 = pnand %p6697_p2, %p8285_p8  ;;  %p6704_p9 = por %p6703_p11, %p6702_p7 }
  0xfe   : > { %p6700_p1 = pneg %p6699_p13  ;;  %p6706_p0 = por %p6705_p12, %p6704_p9 }
 0x100   : > { %p6707_p3 = pnand %p6706_p0, %p6700_p1 }
 0x102   : > { %6710 = shalt.err (!%p6707_p3)
}
 0x103   : > { %s6711_s18 = scalar_lea.vmem %s7304_s26, 24576  ;;  %s6914_s10 = smov [#allocation14]  }
 0x104   : > { %p6712_p4 = scmp.ne.s32.totalorder %s7304_s26, %s6711_s18  ;;  %s6716_s12 = sshll.u32 %s6914_s10, 4  ;;  %s6717_s12 = int_to_ptr.vmem [resolvable:$false] %s6716_s12 }
 0x105   : > { %s6718_s13 = scalar_lea.vmem %s6717_s12, 49152  ;;  %p6719_p13 = scmp.lt.s32.totalorder %s7304_s26, %s6717_s12 }
 0x106   : > { %p6714_p6 = pnand %p6712_p4, %p8285_p8  ;;  %p6720_p5 = scmp.lt.s32.totalorder %s6718_s13, %s6711_s18 }
 0x108   : > { %p6715_p2 = pneg %p6714_p6  ;;  %p6721_p7 = por %p6720_p5, %p6719_p13 }
 0x10a   : > { %p6722_p11 = pnand %p6721_p7, %p6715_p2 }
 0x10c   : > { %6725 = shalt.err (!%p6722_p11)
}
 0x10d   : > { %s6915_s15 = smov 768   ;;  %s6916_s7 = smov 48  }
 0x10e   : > { %p8286_p1 = scmp.ne.s32.totalorder %s8270_s1, 0  ;;  %s6917_s24 = smov [#allocation16]  }
 0x10f   : > { %s444_s19 = sshll.u32 %s6917_s24, 4  ;;  %s6918_s23 = smov [#allocation17]   ;;  %s445_s19 = int_to_ptr.vmem [resolvable:$true] %s444_s19 }
 0x110   : > { %5671 = dma.hbm_to_vmem [thread:$0]  (!%p8286_p1), %s7302_s17, 24576, %s7304_s26, %s7113_s22, %s6915_s15, %s6915_s15, %s6916_s7  }
 0x111   : > { %s454_s5 = sshll.u32 %s6918_s23, 4  ;;  %s6726_s14 = scalar_lea.hbm %s8205_s11, 32  ;;  %s455_s5 = int_to_ptr.vmem [resolvable:$true] %s454_s5 }
 0x112   : > { %p6727_p5 = scmp.ne.s32.totalorder %s8205_s11, %s6726_s14  ;;  %p6733_p0 = scmp.lt.u32.totalorder %s6726_s14, %s8205_s11 }
 0x114   : > { %p6729_p9 = pnand %p6727_p5, %p8283_p10 }
 0x116   : > { %p6730_p12 = pneg %p6729_p9 }
 0x118   : > { %p6735_p3 = pnand %p6733_p0, %p6730_p12 }
 0x11a   : > { %6738 = shalt.err (!%p6735_p3)
}
 0x11b   : > { %s6739_s26 = scalar_lea.vmem %s445_s19, 32  ;;  %p6747_p13 = scmp.lt.s32.totalorder %s445_s19, %s445_s19 }
 0x11c   : > { %p6740_p4 = scmp.ne.s32.totalorder %s445_s19, %s6739_s26  ;;  %p6748_p7 = scmp.lt.s32.totalorder %s6739_s26, %s6739_s26 }
 0x11e   : > { %p6742_p6 = pnand %p6740_p4, %p8283_p10  ;;  %p6749_p11 = por %p6748_p7, %p6747_p13 }
 0x120   : > { %p6743_p2 = pneg %p6742_p6 }
 0x122   : > { %p6750_p1 = pnand %p6749_p11, %p6743_p2 }
 0x124   : > { %6753 = shalt.err (!%p6750_p1)
}
 0x125   : > { %p8287_p5 = scmp.ne.s32.totalorder %s8261_s21, 0  ;;  %s8288_s24 = sld [smem:[#allocation41_spill]] }
 0x127   : > { %5649 = dma.hbm_to_vmem [thread:$0]  (!%p8287_p5), %s8205_s11, 32, %s445_s19, [#allocation6]  }
 0x12b   : > { %s6754_s23 = scalar_lea.hbm %s8288_s24, 2048 }
 0x12c   : > { %p6755_p9 = scmp.ne.s32.totalorder %s8288_s24, %s6754_s23  ;;  %p6761_p1 = scmp.lt.u32.totalorder %s6754_s23, %s8288_s24 }
 0x12e   : > { %p6757_p12 = pnand %p6755_p9, %p8283_p10 }
 0x130   : > { %p6758_p0 = pneg %p6757_p12 }
 0x132   : > { %p6763_p3 = pnand %p6761_p1, %p6758_p0 }
 0x134   : > { %6766 = shalt.err (!%p6763_p3)
}
 0x135   : > { %s6767_s18 = scalar_lea.vmem %s455_s5, 2048  ;;  %p6775_p13 = scmp.lt.s32.totalorder %s455_s5, %s455_s5 }
 0x136   : > { %p6768_p4 = scmp.ne.s32.totalorder %s455_s5, %s6767_s18  ;;  %p6776_p7 = scmp.lt.s32.totalorder %s6767_s18, %s6767_s18 }
 0x138   : > { %p6770_p6 = pnand %p6768_p4, %p8283_p10  ;;  %p6777_p11 = por %p6776_p7, %p6775_p13 }
 0x13a   : > { %p6771_p2 = pneg %p6770_p6 }
 0x13c   : > { %p6778_p8 = pnand %p6777_p11, %p6771_p2 }
 0x13e   : > { %6781 = shalt.err (!%p6778_p8)
}
 0x13f   : > { %s6919_s19 = smov 64   ;;  %s6920_s10 = smov 4  }
 0x140   : > { %5652 = dma.hbm_to_vmem [thread:$0]  (!%p8287_p5), %s8288_s24, 2048, %s455_s5, [#allocation9], %s6919_s19, %s6919_s19, %s6920_s10  }
 0x141   : > { %s6921_s17 = smov [#allocation18]   ;;  %s8289_s15 = smul.u32 12288, %s6898_s16 }
 0x142   : > { %s468_s13 = sshll.u32 %s6921_s17, 4  ;;  %s8290_s20 = sld [smem:[#allocation40_spill]]  ;;  %s469_s13 = int_to_ptr.vmem [resolvable:$true] %s468_s13 }
 0x143   : > { %s8291_s18 = sld [smem:[#allocation42_spill]] }
 0x148   : > { %s7369_s30 = scalar_lea.hbm %s8290_s20, %s8289_s15 }
 0x149   : > { %s6782_s6 = scalar_lea.hbm %s8291_s18, 16 }
 0x14a   : > { %p6783_p8 = scmp.ne.s32.totalorder %s8291_s18, %s6782_s6  ;;  %p6789_p0 = scmp.lt.u32.totalorder %s6782_s6, %s8291_s18 }
 0x14c   : > { %p6785_p9 = pnand %p6783_p8, %p8283_p10 }
 0x14e   : > { %p6786_p12 = pneg %p6785_p9 }
 0x150   : > { %p6791_p1 = pnand %p6789_p0, %p6786_p12 }
 0x152   : > { %6794 = shalt.err (!%p6791_p1)
}
 0x153   : > { %s6795_s16 = scalar_lea.vmem %s469_s13, 16  ;;  %s6802_s10 = scalar_lea.vmem %s469_s13, 32 }
 0x154   : > { %p6796_p3 = scmp.ne.s32.totalorder %s469_s13, %s6795_s16  ;;  %p6803_p2 = scmp.lt.s32.totalorder %s469_s13, %s469_s13 }
 0x155   : > { %p6804_p13 = scmp.lt.s32.totalorder %s6802_s10, %s6795_s16 }
 0x156   : > { %p6798_p4 = pnand %p6796_p3, %p8283_p10 }
 0x157   : > { %p6805_p7 = por %p6804_p13, %p6803_p2 }
 0x158   : > { %p6799_p6 = pneg %p6798_p4 }
 0x15a   : > { %p6806_p11 = pnand %p6805_p7, %p6799_p6 }
 0x15c   : > { %6809 = shalt.err (!%p6806_p11)
}
 0x15d   : > { %5655 = dma.hbm_to_vmem [thread:$0]  (!%p8287_p5), %s8291_s18, 16, %s469_s13, [#allocation19]  }
 0x15e   : > { %s8292_s28 = smul.u32 768, %s7092_s25  ;;  %s6810_s26 = scalar_lea.hbm %s7369_s30, 12288 }
 0x15f   : > { %p6811_p10 = scmp.ne.s32.totalorder %s7369_s30, %s6810_s26  ;;  %p8293_p8 = scmp.ne.s32.totalorder %s8271_s29, 0 }
 0x160   : > { %s584_s6 = scalar_lea.vmem [#allocation15], %s8292_s28  ;;  %s6815_s15 = scalar_lea.hbm %s8290_s20, 24576 }
 0x161   : > { %s591_s12 = sshll.u32 %s584_s6, 4  ;;  %p6813_p9 = pnand %p6811_p10, %p8293_p8  ;;  %s7391_s12 = int_to_ptr.vmem [resolvable:$true] %s591_s12 }
 0x162   : > { %p6816_p0 = scmp.lt.u32.totalorder %s7369_s30, %s8290_s20  ;;  %p6817_p1 = scmp.lt.u32.totalorder %s6815_s15, %s6810_s26 }
 0x163   : > { %p6814_p12 = pneg %p6813_p9  ;;  %p6819_p3 = scmp.lt.u32.totalorder %s6810_s26, %s7369_s30 }
 0x164   : > { %p6818_p5 = por %p6817_p1, %p6816_p0 }
 0x166   : > { %p6820_p4 = por %p6819_p3, %p6818_p5 }
 0x168   : > { %p6821_p6 = pnand %p6820_p4, %p6814_p12 }
 0x16a   : > { %6824 = shalt.err (!%p6821_p6)
}
 0x16b   : > { %s6825_s25 = scalar_lea.vmem %s7391_s12, 12288  ;;  %s6922_s13 = smov [#allocation15]  }
 0x16c   : > { %p6826_p2 = scmp.ne.s32.totalorder %s7391_s12, %s6825_s25  ;;  %s6830_s14 = sshll.u32 %s6922_s13, 4  ;;  %s6831_s14 = int_to_ptr.vmem [resolvable:$false] %s6830_s14 }
 0x16d   : > { %s6832_s0 = scalar_lea.vmem %s6831_s14, 24576  ;;  %p6833_p11 = scmp.lt.s32.totalorder %s7391_s12, %s6831_s14 }
 0x16e   : > { %p6828_p13 = pnand %p6826_p2, %p8293_p8  ;;  %p6834_p10 = scmp.lt.s32.totalorder %s6832_s0, %s6825_s25 }
 0x170   : > { %p6829_p7 = pneg %p6828_p13  ;;  %p6835_p9 = por %p6834_p10, %p6833_p11 }
 0x172   : > { %p6836_p0 = pnand %p6835_p9, %p6829_p7 }
 0x174   : > { %6839 = shalt.err (!%p6836_p0)
}
 0x175   : > { %p8294_p12 = scmp.ne.s32.totalorder %s8270_s1, 0  ;;  %s8295_s5 = smov 8  }
 0x176   : > { %s8296_s19 = smov 128   ;;  %s8297_s29 = sld [smem:[#allocation30_spill]] }
 0x177   : > { %5674 = dma.hbm_to_vmem [thread:$0]  (!%p8294_p12), %s7369_s30, 12288, %s7391_s12, %s7113_s22, %s8296_s19, %s8296_s19, %s8295_s5  }
 0x17c   : > { %p8298_p8 = scmp.ne.s32.totalorder %s8297_s29, 0 }
 0x17d   : > { %s8299_s16 = sld [smem:[#allocation29_spill]] (!%p8298_p8) }
 0x17e   : > { %603 = sbr.rel (%p8298_p8) target bundleno = 3764 (0xeb4), region = 76 }
 0x183   : > { %p8300_p1 = scmp.eq.s32.totalorder (!%p8298_p8), %s8299_s16, 0 }
 0x185   : > { %6857 = dma.done.wait (%p8300_p1), [#allocation4], 512   ;;  %p8301_p5 = pmov %p8300_p1 }
 0x186   : > { %p8302_p3 = pmov %p8300_p1 }
 0x187   : > { %6859 = vsyncadd (%p8301_p5), [#allocation4], 4294966784 }
 0x188   : > { %6861 = dma.done.wait (%p8302_p3), [#allocation6], 1024   ;;  %p8303_p4 = pmov %p8300_p1 }
 0x189   : > { %p8304_p6 = pmov %p8300_p1 }
 0x18a   : > { %6863 = vsyncadd (%p8303_p4), [#allocation6], 4294966272 }
 0x18b   : > { %6865 = dma.done.wait (%p8304_p6), [#allocation9], 128   ;;  %p8305_p2 = pmov %p8300_p1 }
 0x18c   : > { %s8306_s1 = sld [smem:[#allocation27_spill]]  ;;  %s8307_s22 = sld [smem:[#allocation33_spill]] }
 0x18d   : > { %6867 = vsyncadd (%p8305_p2), [#allocation9], 4294967168  ;;  %s621_s30 = sand.u32 1, %s8299_s16  }
 0x18e   : > { %s622_s27 = scalar_lea.sflag [#allocation4], %s621_s30 }
 0x192   : > { %s623_s10 = sand.u32 1, %s8306_s1   ;;  %p8308_p13 = scmp.ne.s32.totalorder %s8307_s22, 0 }
 0x193   : > { %s5026_s2 = sshll.u32 %s623_s10, 1 }
 0x194   : > { %s7434_s28 = scalar_lea.vmem [#allocation10], %s5026_s2 }
 0x195   : > { %6869 = dma.done.wait (%p8308_p13), %s622_s27, 53312  }
 0x196   : > { %6871 = vsyncadd (%p8308_p13), %s622_s27, 4294913984  ;;  %s5592_s6 = smul.u32 768, %s623_s10  ;;  %s5027_s12 = sshll.u32 %s623_s10, 8 }
 0x197   : > { %s5593_s26 = smul.u32 1536, %s623_s10  ;;  %s7442_s17 = scalar_lea.vmem [#allocation12], %s5027_s12 }
 0x198   : > { %s7440_s21 = scalar_lea.vmem [#allocation11], %s5592_s6  ;;  %s7444_s15 = scalar_lea.vmem [#allocation13], %s5026_s2 }
 0x199   : > { %s7446_s7 = scalar_lea.vmem [#allocation14], %s5593_s26  ;;  %s7448_s23 = scalar_lea.vmem [#allocation15], %s5592_s6 }
 0x19a   : > { %p8309_p7 = pmov %p8300_p1 }
 0x19b   : > { %p8310_p11 = pmov %p8300_p1 }
 0x19c   : > { %6873 = dma.done.wait (%p8309_p7), [#allocation6], 32  }
 0x19d   : > { %6875 = vsyncadd (%p8310_p11), [#allocation6], 4294967264  ;;  %p8311_p10 = pmov %p8300_p1 }
 0x19e   : > { %p8312_p9 = pmov %p8300_p1 }
 0x19f   : > { %6877 = dma.done.wait (%p8311_p10), [#allocation9], 2048  }
 0x1a0   : > { %6879 = vsyncadd (%p8312_p9), [#allocation9], 4294965248  ;;  %p8313_p0 = pmov %p8300_p1 }
 0x1a2   : > { %6881 = dma.done.wait (%p8313_p0), [#allocation19], 16   ;;  %p8314_p12 = pmov %p8313_p0 }
 0x1a3   : > { %p8315_p8 = scmp.ne.s32.totalorder %s8299_s16, 0 }
 0x1a4   : > { %6883 = vsyncadd (%p8314_p12), [#allocation19], 4294967280  ;;  %s8316_s14 = sld [smem:[#allocation34_spill]] (!%p8315_p8) }
 0x1a5   : > { %751 = sbr.rel (%p8315_p8) target bundleno = 429 (0x1ad), region = 132 }
 0x1aa   : > { %v752_v0 = vld [vmem:[%s8316_s14] sm:$0xff] (!%p8315_p8)  ;;  %v753_v1 = vld [vmem:[%s8316_s14 + $0x8] sm:$0xff] (!%p8315_p8)  ;;  %v754_v2 = vld [vmem:[%s8316_s14 + $0x10] sm:$0xff] (!%p8315_p8) }
 0x1ab   : > { %756 = vst [vmem:[#allocation2] sm:$0xff] (!%p8315_p8), %v752_v0  ;;  %757 = vst [vmem:[#allocation2 + $0x8] sm:$0xff] (!%p8315_p8), %v753_v1  ;;  %v755_v3 = vld [vmem:[%s8316_s14 + $0x18] sm:$0xff] (!%p8315_p8) }
 0x1ac   : > { %758 = vst [vmem:[#allocation2 + $0x10] sm:$0xff] %v754_v2  ;;  %759 = vst [vmem:[#allocation2 + $0x18] sm:$0xff] %v755_v3 }
 0x1ad PF: > { %v5744_v12 = vld [vmem:[%s7440_s21 + $0x4] ss:$24 sps:$4 sm:$0xff]   ;;  %v5746_v13 = vld [vmem:[%s7440_s21] ss:$24 sps:$4 sm:$0xff]   ;;  %v5747_v15 = vld [vmem:[%s7440_s21 + $0x34] ss:$24 sps:$4 sm:$0xff]   ;;  %v800_v52 = vlaneseq }
 0x1ae   : > { %1392 = vmatprep.subr.bf16.mxu0 %v5744_v12  ;;  %v5749_v17 = vld [vmem:[%s7440_s21 + $0x30] ss:$24 sps:$4 sm:$0xff]   ;;  %v5750_v18 = vld [vmem:[%s7440_s21 + $0x64] ss:$24 sps:$4 sm:$0xff]   ;;  %v5752_v19 = vld [vmem:[%s7440_s21 + $0x60] ss:$24 sps:$4 sm:$0xff]  }
 0x1af   : > { %1393 = vmatpush1.bf16.msra.mxu0 %v5746_v13  ;;  %v5753_v20 = vld [vmem:[%s7440_s21 + $0x94] ss:$24 sps:$4 sm:$0xff]   ;;  %v5755_v21 = vld [vmem:[%s7440_s21 + $0x90] ss:$24 sps:$4 sm:$0xff]   ;;  %v5756_v22 = vld [vmem:[%s7440_s21 + $0xc4] ss:$24 sps:$4 sm:$0xff]  }
 0x1b0   : > { %1394 = vmatprep.subr.bf16.mxu0 %v5747_v15  ;;  %v5758_v23 = vld [vmem:[%s7440_s21 + $0xc0] ss:$24 sps:$4 sm:$0xff]   ;;  %v5759_v24 = vld [vmem:[%s7440_s21 + $0xf4] ss:$24 sps:$4 sm:$0xff]   ;;  %v5761_v25 = vld [vmem:[%s7440_s21 + $0xf0] ss:$24 sps:$4 sm:$0xff]  }
 0x1b1   : > { %v5762_v26 = vld [vmem:[%s7440_s21 + $0x124] ss:$24 sps:$4 sm:$0xff]   ;;  %v5764_v27 = vld [vmem:[%s7440_s21 + $0x120] ss:$24 sps:$4 sm:$0xff]   ;;  %v5765_v28 = vld [vmem:[%s7440_s21 + $0x154] ss:$24 sps:$4 sm:$0xff]  }
 0x1b2   : > { %v5767_v29 = vld [vmem:[%s7440_s21 + $0x150] ss:$24 sps:$4 sm:$0xff]   ;;  %v5768_v30 = vld [vmem:[%s7440_s21 + $0x184] ss:$24 sps:$4 sm:$0xff]   ;;  %v5770_v31 = vld [vmem:[%s7440_s21 + $0x180] ss:$24 sps:$4 sm:$0xff]  }
 0x1b3   : > { %v7476_v4 = vld [vmem:[#allocation2] sm:$0xff]  ;;  %v7478_v5 = vld [vmem:[#allocation2 + $0x8] sm:$0xff]  ;;  %v7480_v6 = vld [vmem:[#allocation2 + $0x10] sm:$0xff]  ;;  %1395 = vmatpush1.bf16.msra.mxu0 %v5749_v17  ;;  %v801_v54 = vshrl.u32 %v800_v52, 7  ;;  %s6923_s16 = smov 127   ;;  %s6924_s30 = smov 1  }
 0x1b4   : > { %v778_v7 = vmul.f32 %v7476_v4, %v7476_v4  ;;  %v779_v8 = vmul.f32 %v7478_v5, %v7478_v5  ;;  %v7486_v9 = vld [vmem:[#allocation2 + $0x18] sm:$0xff]  ;;  %v780_v10 = vmul.f32 %v7480_v6, %v7480_v6  ;;  %1396 = vmatprep.subr.bf16.mxu0 %v5750_v18  ;;  %v5774_v34 = vld [vmem:[%s7440_s21 + $0x1e4] ss:$24 sps:$4 sm:$0xff]   ;;  %v5776_v35 = vld [vmem:[%s7440_s21 + $0x1e0] ss:$24 sps:$4 sm:$0xff]   ;;  %vm6926_vm0 = vmmov 0  }
 0x1b5   : > { %v781_v11 = vmul.f32 %v7486_v9, %v7486_v9  ;;  %v5771_v32 = vld [vmem:[%s7440_s21 + $0x1b4] ss:$24 sps:$4 sm:$0xff]   ;;  %v5773_v33 = vld [vmem:[%s7440_s21 + $0x1b0] ss:$24 sps:$4 sm:$0xff]   ;;  %v5780_v38 = vld [vmem:[%s7440_s21 + $0x244] ss:$24 sps:$4 sm:$0xff]  }
 0x1b6   : > { %v782_v14 = vadd.f32 %v779_v8, %v778_v7  ;;  %v5777_v36 = vld [vmem:[%s7440_s21 + $0x214] ss:$24 sps:$4 sm:$0xff]   ;;  %v5779_v37 = vld [vmem:[%s7440_s21 + $0x210] ss:$24 sps:$4 sm:$0xff]   ;;  %v5782_v39 = vld [vmem:[%s7440_s21 + $0x240] ss:$24 sps:$4 sm:$0xff]  }
 0x1b7   : > { %v785_v16 = vadd.f32 %v781_v11, %v780_v10  ;;  %1397 = vmatpush1.bf16.msra.mxu0 %v5752_v19  ;;  %v5783_v40 = vld [vmem:[%s7440_s21 + $0x274] ss:$24 sps:$4 sm:$0xff]   ;;  %v5785_v41 = vld [vmem:[%s7440_s21 + $0x270] ss:$24 sps:$4 sm:$0xff]   ;;  %v5786_v42 = vld [vmem:[%s7440_s21 + $0x2a4] ss:$24 sps:$4 sm:$0xff]  }
 0x1b8   : > { %783 = vadd.xlane.f32.xlu0 %v782_v14  ;;  %1398 = vmatprep.subr.bf16.mxu0 %v5753_v20  ;;  %v5788_v43 = vld [vmem:[%s7440_s21 + $0x2a0] ss:$24 sps:$4 sm:$0xff]   ;;  %v5789_v44 = vld [vmem:[%s7440_s21 + $0x2d4] ss:$24 sps:$4 sm:$0xff]   ;;  %v5791_v45 = vld [vmem:[%s7440_s21 + $0x2d0] ss:$24 sps:$4 sm:$0xff]  }
 0x1b9   : > { %v5794_v46 = vld [vmem:[%s7440_s21 + $0xc] ss:$24 sps:$4 sm:$0xff]   ;;  %v777_v55 = vld [vmem:[%s7434_s28] sm:$0x3]  ;;  %v7527_v56 = vsub.s32 1, %v801_v54  ;;  %v7529_v57 = vsub.s32 0, %v801_v54 }
 0x1ba   : > { %v5792_v7 = vld [vmem:[%s7440_s21 + $0x8] ss:$24 sps:$4 sm:$0xff]   ;;  %v5797_v10 = vld [vmem:[%s7440_s21 + $0x3c] ss:$24 sps:$4 sm:$0xff]   ;;  %v5801_v14 = vld [vmem:[%s7440_s21 + $0x98] ss:$24 sps:$4 sm:$0xff]  }
 0x1bb   : > { %1399 = vmatpush1.bf16.msra.mxu0 %v5755_v21  ;;  %v807_v60 = vrot.slane %v777_v55, %v7527_v56  ;;  %v803_v62 = vrot.slane %v777_v55, %v7529_v57  ;;  %v5798_v12 = vld [vmem:[%s7440_s21 + $0x68] ss:$24 sps:$4 sm:$0xff]   ;;  %v5803_v13 = vld [vmem:[%s7440_s21 + $0x9c] ss:$24 sps:$4 sm:$0xff]   ;;  %v5806_v15 = vld [vmem:[%s7440_s21 + $0xcc] ss:$24 sps:$4 sm:$0xff]  }
 0x1bc   : > { %786 = vadd.xlane.f32.xlu0 %v785_v16  ;;  %1400 = vmatprep.subr.bf16.mxu0 %v5756_v22  ;;  %v5804_v16 = vld [vmem:[%s7440_s21 + $0xc8] ss:$24 sps:$4 sm:$0xff]   ;;  %v5809_v17 = vld [vmem:[%s7440_s21 + $0xfc] ss:$24 sps:$4 sm:$0xff]   ;;  %v5807_v18 = vld [vmem:[%s7440_s21 + $0xf8] ss:$24 sps:$4 sm:$0xff]  }
 0x1bd   : > { %v5812_v19 = vld [vmem:[%s7440_s21 + $0x12c] ss:$24 sps:$4 sm:$0xff]   ;;  %v5810_v20 = vld [vmem:[%s7440_s21 + $0x128] ss:$24 sps:$4 sm:$0xff]   ;;  %v5815_v21 = vld [vmem:[%s7440_s21 + $0x15c] ss:$24 sps:$4 sm:$0xff]  }
 0x1be   : > { %v5813_v22 = vld [vmem:[%s7440_s21 + $0x158] ss:$24 sps:$4 sm:$0xff]   ;;  %v5863_v54 = vld [vmem:[%s7440_s21 + $0x164] ss:$24 sps:$4 sm:$0xff]   ;;  %vm1763_vm2 = vcmask 1043456   ;;  %vm1735_vm4 = vcmask 64512  }
 0x1bf   : > { %1401 = vmatpush1.bf16.msra.mxu0 %v5758_v23  ;;  %v5818_v23 = vld [vmem:[%s7440_s21 + $0x18c] ss:$24 sps:$4 sm:$0xff]   ;;  %v5861_v55 = vld [vmem:[%s7440_s21 + $0x160] ss:$24 sps:$4 sm:$0xff]   ;;  %s8317_s10 = sld [smem:[#allocation29_spill]] }
 0x1c0   : > { %1402 = vmatprep.subr.bf16.mxu0 %v5759_v24  ;;  %v5816_v24 = vld [vmem:[%s7440_s21 + $0x188] ss:$24 sps:$4 sm:$0xff]  }
 0x1c3   : > { %1403 = vmatpush1.bf16.msra.mxu0 %v5761_v25  ;;  %v5821_v25 = vld [vmem:[%s7440_s21 + $0x1bc] ss:$24 sps:$4 sm:$0xff]  }
 0x1c4   : > { %1404 = vmatprep.subr.bf16.mxu0 %v5762_v26  ;;  %v5819_v26 = vld [vmem:[%s7440_s21 + $0x1b8] ss:$24 sps:$4 sm:$0xff]  }
 0x1c5   : > { %p5465_p1 = scmp.ne.s32.totalorder %s8317_s10, 1 }
 0x1c6   : > { %s8318_s28 = sld [smem:[#allocation43_spill]] (!%p5465_p1) }
 0x1c7   : > { %1405 = vmatpush1.bf16.msra.mxu0 %v5764_v27  ;;  %v5824_v27 = vld [vmem:[%s7440_s21 + $0x1ec] ss:$24 sps:$4 sm:$0xff]  }
 0x1c8   : > { %1406 = vmatprep.subr.bf16.mxu0 %v5765_v28  ;;  %v5822_v28 = vld [vmem:[%s7440_s21 + $0x1e8] ss:$24 sps:$4 sm:$0xff]  }
 0x1cb   : > { %1407 = vmatpush1.bf16.msra.mxu0 %v5767_v29  ;;  %v5827_v29 = vld [vmem:[%s7440_s21 + $0x21c] ss:$24 sps:$4 sm:$0xff]  }
 0x1cc   : > { %1408 = vmatprep.subr.bf16.mxu0 %v5768_v30  ;;  %v5825_v30 = vld [vmem:[%s7440_s21 + $0x218] ss:$24 sps:$4 sm:$0xff]  }
 0x1cf   : > { %1409 = vmatpush1.bf16.msra.mxu0 %v5770_v31  ;;  %v5830_v31 = vld [vmem:[%s7440_s21 + $0x24c] ss:$24 sps:$4 sm:$0xff]  }
 0x1d0   : > { %1410 = vmatprep.subr.bf16.mxu0 %v5771_v32  ;;  %v5828_v32 = vld [vmem:[%s7440_s21 + $0x248] ss:$24 sps:$4 sm:$0xff]  }
 0x1d3   : > { %1411 = vmatpush1.bf16.msra.mxu0 %v5773_v33  ;;  %v5833_v33 = vld [vmem:[%s7440_s21 + $0x27c] ss:$24 sps:$4 sm:$0xff]  }
 0x1d4   : > { %1412 = vmatprep.subr.bf16.mxu0 %v5774_v34  ;;  %v5831_v34 = vld [vmem:[%s7440_s21 + $0x278] ss:$24 sps:$4 sm:$0xff]  }
 0x1d7   : > { %1413 = vmatpush1.bf16.msra.mxu0 %v5776_v35  ;;  %v5836_v35 = vld [vmem:[%s7440_s21 + $0x2ac] ss:$24 sps:$4 sm:$0xff]  }
 0x1d8   : > { %1414 = vmatprep.subr.bf16.mxu0 %v5777_v36  ;;  %v5834_v36 = vld [vmem:[%s7440_s21 + $0x2a8] ss:$24 sps:$4 sm:$0xff]  }
 0x1db   : > { %1415 = vmatpush1.bf16.msra.mxu0 %v5779_v37  ;;  %v5839_v37 = vld [vmem:[%s7440_s21 + $0x2dc] ss:$24 sps:$4 sm:$0xff]  }
 0x1dc   : > { %1416 = vmatprep.subr.bf16.mxu0 %v5780_v38  ;;  %v5837_v38 = vld [vmem:[%s7440_s21 + $0x2d8] ss:$24 sps:$4 sm:$0xff]  }
 0x1df   : > { %1417 = vmatpush1.bf16.msra.mxu0 %v5782_v39  ;;  %v5842_v39 = vld [vmem:[%s7440_s21 + $0x14] ss:$24 sps:$4 sm:$0xff]  }
 0x1e0   : > { %1418 = vmatprep.subr.bf16.mxu0 %v5783_v40  ;;  %v5840_v40 = vld [vmem:[%s7440_s21 + $0x10] ss:$24 sps:$4 sm:$0xff]  }
 0x1e3   : > { %1419 = vmatpush1.bf16.msra.mxu0 %v5785_v41  ;;  %v5845_v41 = vld [vmem:[%s7440_s21 + $0x44] ss:$24 sps:$4 sm:$0xff]  }
 0x1e4   : > { %1420 = vmatprep.subr.bf16.mxu0 %v5786_v42  ;;  %v5843_v42 = vld [vmem:[%s7440_s21 + $0x40] ss:$24 sps:$4 sm:$0xff]  }
 0x1e7   : > { %1421 = vmatpush1.bf16.msra.mxu0 %v5788_v43  ;;  %v5848_v43 = vld [vmem:[%s7440_s21 + $0x74] ss:$24 sps:$4 sm:$0xff]  }
 0x1e8   : > { %1422 = vmatprep.subr.bf16.mxu0 %v5789_v44  ;;  %v5846_v44 = vld [vmem:[%s7440_s21 + $0x70] ss:$24 sps:$4 sm:$0xff]  }
 0x1eb   : > { %1423 = vmatpush1.bf16.msra.mxu0 %v5791_v45  ;;  %v5851_v45 = vld [vmem:[%s7440_s21 + $0xa4] ss:$24 sps:$4 sm:$0xff]  }
 0x1ec   : > { %1435 = vmatprep.subr.bf16.mxu0 %v5794_v46  ;;  %v5849_v46 = vld [vmem:[%s7440_s21 + $0xa0] ss:$24 sps:$4 sm:$0xff]  }
 0x245   : > { %v784_v47 = vpop.xlane.xlu0 %783 }
 0x246   : > { %v789_v48 = vmul.f32 0.00390625, %v784_v47  ;;  %v5854_v47 = vld [vmem:[%s7440_s21 + $0xd4] ss:$24 sps:$4 sm:$0xff]  }
 0x248   : > { %v791_v49 = vadd.f32 1e-05, %v789_v48  ;;  %v5852_v48 = vld [vmem:[%s7440_s21 + $0xd0] ss:$24 sps:$4 sm:$0xff]  }
 0x249   : > { %v787_v50 = vpop.xlane.xlu0 %786 }
 0x24a   : > { %6368 = vrsqrt.f32 %v791_v49  ;;  %v790_v51 = vmul.f32 0.00390625, %v787_v50  ;;  %v5857_v49 = vld [vmem:[%s7440_s21 + $0x104] ss:$24 sps:$4 sm:$0xff]   ;;  %v5855_v50 = vld [vmem:[%s7440_s21 + $0x100] ss:$24 sps:$4 sm:$0xff]  }
 0x24c   : > { %v792_v53 = vadd.f32 1e-05, %v790_v51  ;;  %v5860_v51 = vld [vmem:[%s7440_s21 + $0x134] ss:$24 sps:$4 sm:$0xff]  }
 0x24e   : > { %6370 = vrsqrt.f32 %v792_v53  ;;  %v5858_v53 = vld [vmem:[%s7440_s21 + $0x130] ss:$24 sps:$4 sm:$0xff]  }
 0x254   : > { %v6369_v58 = vpop.eup %6368 }
 0x255   : > { %v796_v59 = vmul.f32 %v6369_v58, %v7478_v5  ;;  %v795_v61 = vmul.f32 %v6369_v58, %v7476_v4  ;;  %v5866_v58 = vld [vmem:[%s7440_s21 + $0x194] ss:$24 sps:$4 sm:$0xff]  }
 0x257   : > { %v811_v2 = vmul.f32 %v807_v60, %v796_v59  ;;  %v810_v8 = vmul.f32 %v803_v62, %v795_v61  ;;  %v5864_v59 = vld [vmem:[%s7440_s21 + $0x190] ss:$24 sps:$4 sm:$0xff]   ;;  %v5867_v61 = vld [vmem:[%s7440_s21 + $0x1c0] ss:$24 sps:$4 sm:$0xff]  }
 0x258   : > { %v6371_v63 = vpop.eup %6370 }
 0x259   : > { %v798_v0 = vmul.f32 %v6371_v63, %v7486_v9  ;;  %v797_v1 = vmul.f32 %v6371_v63, %v7480_v6  ;;  %v5795_v6 = vld [vmem:[%s7440_s21 + $0x38] ss:$24 sps:$4 sm:$0xff]   ;;  %v5800_v9 = vld [vmem:[%s7440_s21 + $0x6c] ss:$24 sps:$4 sm:$0xff]  }
 0x25a   : > { %v5870_v63 = vld [vmem:[%s7440_s21 + $0x1f0] ss:$24 sps:$4 sm:$0xff]  }
 0x25b   : > { %v813_v3 = vmul.f32 %v807_v60, %v798_v0  ;;  %v812_v5 = vmul.f32 %v803_v62, %v797_v1  ;;  %v5869_v60 = vld [vmem:[%s7440_s21 + $0x1c4] ss:$24 sps:$4 sm:$0xff]   ;;  %v5872_v62 = vld [vmem:[%s7440_s21 + $0x1f4] ss:$24 sps:$4 sm:$0xff]   ;;  %v5873_v1 = vld [vmem:[%s7440_s21 + $0x220] ss:$24 sps:$4 sm:$0xff]  }
 0x25c   : > { %v5875_v0 = vld [vmem:[%s7440_s21 + $0x224] ss:$24 sps:$4 sm:$0xff]  }
 0x25d   : > { %v7539_v11 = vpack.c.bf16 %v813_v3, %v811_v2  ;;  %v7541_v4 = vpack.c.bf16 %v812_v5, %v810_v8  ;;  %v5878_v2 = vld [vmem:[%s7440_s21 + $0x254] ss:$24 sps:$4 sm:$0xff]   ;;  %v5876_v3 = vld [vmem:[%s7440_s21 + $0x250] ss:$24 sps:$4 sm:$0xff]   ;;  %v5879_v8 = vld [vmem:[%s7440_s21 + $0x280] ss:$24 sps:$4 sm:$0xff]  }
 0x25e   : > { %v5884_v5 = vld [vmem:[%s7440_s21 + $0x2b4] ss:$24 sps:$4 sm:$0xff]  }
 0x25f   : > { %1424 = vmatprep.mubr.bf16.mxu0 %v7539_v11 }
 0x260   : > { %1425 = vmatmul.mubr.bf16.vlgmr.msra.gmra.mrb[0].mxu0 %v7541_v4 }
 0x261   : > { %1436 = vmatpush1.bf16.msra.mxu0 %v5792_v7  ;;  %1467 = vmatprep.mubr.bf16.mxu0 %v7539_v11  ;;  %v5881_v7 = vld [vmem:[%s7440_s21 + $0x284] ss:$24 sps:$4 sm:$0xff]  }
 0x262   : > { %1437 = vmatprep.subr.bf16.mxu0 %v5797_v10  ;;  %v5882_v10 = vld [vmem:[%s7440_s21 + $0x2b0] ss:$24 sps:$4 sm:$0xff]  }
 0x265   : > { %1438 = vmatpush1.bf16.msra.mxu0 %v5795_v6  ;;  %v5885_v6 = vld [vmem:[%s7440_s21 + $0x2e0] ss:$24 sps:$4 sm:$0xff]  }
 0x266   : > { %1439 = vmatprep.subr.bf16.mxu0 %v5800_v9 }
 0x269   : > { %1440 = vmatpush1.bf16.msra.mxu0 %v5798_v12 }
 0x26a   : > { %1441 = vmatprep.subr.bf16.mxu0 %v5803_v13 }
 0x26d   : > { %1442 = vmatpush1.bf16.msra.mxu0 %v5801_v14 }
 0x26e   : > { %1443 = vmatprep.subr.bf16.mxu0 %v5806_v15 }
 0x271   : > { %1444 = vmatpush1.bf16.msra.mxu0 %v5804_v16 }
 0x272   : > { %1445 = vmatprep.subr.bf16.mxu0 %v5809_v17 }
 0x275   : > { %1446 = vmatpush1.bf16.msra.mxu0 %v5807_v18 }
 0x276   : > { %1447 = vmatprep.subr.bf16.mxu0 %v5812_v19 }
 0x279   : > { %1448 = vmatpush1.bf16.msra.mxu0 %v5810_v20  ;;  %v7634_v20 = vand.u32 127, %v800_v52 }
 0x27a   : > { %1449 = vmatprep.subr.bf16.mxu0 %v5815_v21 }
 0x27b   : > { %vm1531_vm1 = vcmp.lt.s32.totalorder %v7634_v20, 127  ;;  %vm1544_vm3 = vcmp.lt.s32.totalorder %v7634_v20, 1 }
 0x27d   : > { %1450 = vmatpush1.bf16.msra.mxu0 %v5813_v22  ;;  %v765_v22 = vld [vmem:[#allocation3 + $0x8] sm:$0xff] }
 0x27e   : > { %1451 = vmatprep.subr.bf16.mxu0 %v5818_v23  ;;  %v769_v23 = vld [vmem:[#allocation5 + $0x8] sm:$0xff] }
 0x281   : > { %1452 = vmatpush1.bf16.msra.mxu0 %v5816_v24 }
 0x282   : > { %1453 = vmatprep.subr.bf16.mxu0 %v5821_v25 }
 0x285   : > { %1454 = vmatpush1.bf16.msra.mxu0 %v5819_v26 }
 0x286   : > { %1455 = vmatprep.subr.bf16.mxu0 %v5824_v27 }
 0x289   : > { %1456 = vmatpush1.bf16.msra.mxu0 %v5822_v28 }
 0x28a   : > { %1457 = vmatprep.subr.bf16.mxu0 %v5827_v29 }
 0x28d   : > { %1458 = vmatpush1.bf16.msra.mxu0 %v5825_v30 }
 0x28e   : > { %1459 = vmatprep.subr.bf16.mxu0 %v5830_v31 }
 0x291   : > { %1460 = vmatpush1.bf16.msra.mxu0 %v5828_v32 }
 0x292   : > { %1461 = vmatprep.subr.bf16.mxu0 %v5833_v33 }
 0x295   : > { %1462 = vmatpush1.bf16.msra.mxu0 %v5831_v34 }
 0x296   : > { %1463 = vmatprep.subr.bf16.mxu0 %v5836_v35 }
 0x299   : > { %1464 = vmatpush1.bf16.msra.mxu0 %v5834_v36 }
 0x29a   : > { %1465 = vmatprep.subr.bf16.mxu0 %v5839_v37 }
 0x29d   : > { %1466 = vmatpush1.bf16.msra.mxu0 %v5837_v38  ;;  %v768_v38 = vld [vmem:[#allocation5] sm:$0xff] }
 0x29e   : > { %1478 = vmatprep.subr.bf16.mxu0 %v5842_v39 }
 0x2a0   : > { %1468 = vmatmul.mubr.bf16.vlgmr.msra.gmra.mrb[4].mxu0 %v7541_v4 }
 0x2a1   : > { %1479 = vmatpush1.bf16.msra.mxu0 %v5840_v40  ;;  %1510 = vmatprep.mubr.bf16.mxu0 %v7539_v11  ;;  %v5887_v11 = vld [vmem:[%s7440_s21 + $0x2e4] ss:$24 sps:$4 sm:$0xff]   ;;  %v764_v40 = vld [vmem:[#allocation3] sm:$0xff] }
 0x2a2   : > { %1480 = vmatprep.subr.bf16.mxu0 %v5845_v41 }
 0x2a5   : > { %1481 = vmatpush1.bf16.msra.mxu0 %v5843_v42 }
 0x2a6   : > { %1482 = vmatprep.subr.bf16.mxu0 %v5848_v43 }
 0x2a9   : > { %1483 = vmatpush1.bf16.msra.mxu0 %v5846_v44 }
 0x2aa   : > { %1484 = vmatprep.subr.bf16.mxu0 %v5851_v45  ;;  %v772_v45 = vld [vmem:[#allocation7] sm:$0xff] }
 0x2ad   : > { %1485 = vmatpush1.bf16.msra.mxu0 %v5849_v46  ;;  %v773_v46 = vld [vmem:[#allocation7 + $0x8] sm:$0xff] }
 0x2ae   : > { %1486 = vmatprep.subr.bf16.mxu0 %v5854_v47 }
 0x2b1   : > { %1487 = vmatpush1.bf16.msra.mxu0 %v5852_v48 }
 0x2b2   : > { %1488 = vmatprep.subr.bf16.mxu0 %v5857_v49 }
 0x2b5   : > { %1489 = vmatpush1.bf16.msra.mxu0 %v5855_v50 }
 0x2b6   : > { %1490 = vmatprep.subr.bf16.mxu0 %v5860_v51 }
 0x2b9   : > { %1491 = vmatpush1.bf16.msra.mxu0 %v5858_v53 }
 0x2ba   : > { %1492 = vmatprep.subr.bf16.mxu0 %v5863_v54 }
 0x2bd   : > { %1493 = vmatpush1.bf16.msra.mxu0 %v5861_v55 }
 0x2be   : > { %1494 = vmatprep.subr.bf16.mxu0 %v5866_v58 }
 0x2c1   : > { %1495 = vmatpush1.bf16.msra.mxu0 %v5864_v59 }
 0x2c2   : > { %1496 = vmatprep.subr.bf16.mxu0 %v5869_v60 }
 0x2c5   : > { %1497 = vmatpush1.bf16.msra.mxu0 %v5867_v61 }
 0x2c6   : > { %1498 = vmatprep.subr.bf16.mxu0 %v5872_v62 }
 0x2c9   : > { %1499 = vmatpush1.bf16.msra.mxu0 %v5870_v63 }
 0x2ca   : > { %1500 = vmatprep.subr.bf16.mxu0 %v5875_v0 }
 0x2cd   : > { %1501 = vmatpush1.bf16.msra.mxu0 %v5873_v1 }
 0x2ce   : > { %1502 = vmatprep.subr.bf16.mxu0 %v5878_v2 }
 0x2d1   : > { %1503 = vmatpush1.bf16.msra.mxu0 %v5876_v3 }
 0x2d2   : > { %1504 = vmatprep.subr.bf16.mxu0 %v5881_v7 }
 0x2d5   : > { %1505 = vmatpush1.bf16.msra.mxu0 %v5879_v8 }
 0x2d6   : > { %1506 = vmatprep.subr.bf16.mxu0 %v5884_v5 }
 0x2d9   : > { %1507 = vmatpush1.bf16.msra.mxu0 %v5882_v10 }
 0x2da   : > { %1508 = vmatprep.subr.bf16.mxu0 %v5887_v11 }
 0x2dd   : > { %1509 = vmatpush1.bf16.msra.mxu0 %v5885_v6 }
 0x2e0   : > { %1511 = vmatmul.mubr.bf16.vlgmr.msra.gmra.mrb[8].mxu0 %v7541_v4  ;;  %v6925_v4 = vmov 0.0  }
 0x2e1   : > { %5526 = vmatprep.subr.bf16.mxu1 %v6925_v4  ;;  %5528 = vmatprep.mubr.msk.bf16.mxu1 %vm6926_vm0, %v6925_v4 }
 0x333   : > { %v1426_v9 = vpop.f32.mrb[0].mxu0 }
 0x334   : > { %1521 = vrot.lane.b32.xlu1 %v1426_v9, %s6923_s16  ;;  %v1428_v12 = vpop.f32.mrb[1].mxu0  ;;  %v1549_v44 = vmul.f32 %v1426_v9, %v764_v40 }
 0x335   : > { %v7610_v13 = vpop.f32.mrb[2].mxu0  ;;  %v1550_v26 = vmul.f32 %v1428_v12, %v765_v22 }
 0x336   : > { %v7612_v14 = vpop.f32.mrb[3].mxu0 }
 0x338   : > { %1536 = vrot.lane.b32.xlu1 %v1426_v9, %s6924_s30 }
 0x33c   : > { %1525 = vrot.lane.b32.xlu1 %v1428_v12, %s6923_s16 }
 0x373   : > { %v7614_v15 = vpop.f32.mrb[4].mxu0 }
 0x374   : > { %1581 = vrot.lane.b32.xlu0 %v7614_v15, %s6924_s30  ;;  %1569 = vrot.lane.b32.xlu1 %v7614_v15, %s6923_s16  ;;  %v1471_v16 = vpop.f32.mrb[5].mxu0  ;;  %v1593_v62 = vmul.f32 %v7614_v15, %v764_v40  ;;  %v770_v15 = vld [vmem:[#allocation5 + $0x10] sm:$0xff] }
 0x375   : > { %v7618_v17 = vpop.f32.mrb[6].mxu0  ;;  %v1594_v47 = vmul.f32 %v1471_v16, %v765_v22  ;;  %v767_v22 = vld [vmem:[#allocation3 + $0x18] sm:$0xff] }
 0x376   : > { %v7621_v18 = vpop.f32.mrb[7].mxu0 }
 0x378   : > { %1540 = vrot.lane.b32.xlu0 %v1428_v12, %s6924_s30  ;;  %1573 = vrot.lane.b32.xlu1 %v1471_v16, %s6923_s16 }
 0x37c   : > { %1585 = vrot.lane.b32.xlu1 %v1471_v16, %s6924_s30  ;;  %1587 = vrot.lane.b32.xlu0 %v7621_v18, %s6924_s30  ;;  %v771_v16 = vld [vmem:[#allocation5 + $0x18] sm:$0xff] }
 0x380   : > { %1571 = vrot.lane.b32.xlu1 %v7618_v17, %s6923_s16  ;;  %1527 = vrot.lane.b32.xlu0 %v7612_v14, %s6923_s16 }
 0x384   : > { %1542 = vrot.lane.b32.xlu0 %v7612_v14, %s6924_s30  ;;  %1575 = vrot.lane.b32.xlu1 %v7621_v18, %s6923_s16 }
 0x388   : > { %1583 = vrot.lane.b32.xlu1 %v7618_v17, %s6924_s30 }
 0x38c   : > { %1523 = vrot.lane.b32.xlu1 %v7610_v13, %s6923_s16 }
 0x390   : > { %1538 = vrot.lane.b32.xlu1 %v7610_v13, %s6924_s30 }
 0x3a6   : > { %v1522_v19 = vpop.permute.xlu1 %1521 }
 0x3aa   : > { %v1537_v21 = vpop.permute.xlu1 %1536 }
 0x3ae   : > { %v1526_v24 = vpop.permute.xlu1 %1525 }
 0x3af   : > { %v1534_v25 = vsel %vm1531_vm1, %v1526_v24, %v1522_v19  ;;  %v1532_v39 = vsel %vm1531_vm1, %v1522_v19, %v1526_v24 }
 0x3b0   : > { %v1554_v27 = vmul.f32 %v1534_v25, %v769_v23  ;;  %v1553_v41 = vmul.f32 %v1532_v39, %v768_v38  ;;  %v1596_v25 = vmul.f32 %v7621_v18, %v767_v22 }
 0x3b2   : > { %v1558_v28 = vadd.f32 %v1554_v27, %v1550_v26  ;;  %v1557_v48 = vadd.f32 %v1553_v41, %v1549_v44 }
 0x3b3   : > { %v7639_v29 = vpop.f32.mrb[8].mxu0 }
 0x3b4   : > { %v1514_v30 = vpop.f32.mrb[9].mxu0 }
 0x3b5   : > { %v1858_v31 = vpack.c.bf16 %v1514_v30, %v1514_v30  ;;  %v1516_v32 = vpop.f32.mrb[10].mxu0  ;;  %v774_v30 = vld [vmem:[#allocation7 + $0x10] sm:$0xff] }
 0x3b6   : > { %v1650_v52 = vpack.c.bf16 %v1516_v32, %v1516_v32  ;;  %v1518_v33 = vpop.f32.mrb[11].mxu0 }
 0x3b7   : > { %v7642_v34 = vsel %vm1763_vm2, %v1858_v31, 0  ;;  %v1859_v35 = vpack.c.bf16 %v1518_v33, %v1518_v33  ;;  %v775_v31 = vld [vmem:[#allocation7 + $0x18] sm:$0xff] }
 0x3b8   : > { %v7645_v36 = vsel %vm1763_vm2, %v1650_v52, 0 }
 0x3b9   : > { %v7648_v37 = vsel %vm1763_vm2, %v1859_v35, 0 }
 0x3e6   : > { %v1582_v42 = vpop.permute.xlu0 %1581  ;;  %v1570_v43 = vpop.permute.xlu1 %1569 }
 0x3ea   : > { %v1541_v49 = vpop.permute.xlu0 %1540  ;;  %v1574_v50 = vpop.permute.xlu1 %1573 }
 0x3eb   : > { %v1545_v51 = vsel %vm1544_vm3, %v1537_v21, %v1541_v49  ;;  %v1547_v53 = vsel %vm1544_vm3, %v1541_v49, %v1537_v21  ;;  %v1577_v54 = vsel %vm1531_vm1, %v1570_v43, %v1574_v50  ;;  %v1579_v55 = vsel %vm1531_vm1, %v1574_v50, %v1570_v43 }
 0x3ec   : > { %v1561_v58 = vmul.f32 %v1547_v53, %v772_v45  ;;  %v1562_v59 = vmul.f32 %v1545_v51, %v773_v46  ;;  %v1597_v60 = vmul.f32 %v1577_v54, %v768_v38  ;;  %v1598_v61 = vmul.f32 %v1579_v55, %v769_v23 }
 0x3ee   : > { %v7662_v63 = vadd.f32 %v1562_v59, %v1558_v28  ;;  %v1602_v0 = vadd.f32 %v1598_v61, %v1594_v47  ;;  %v1586_v1 = vpop.permute.xlu1 %1585  ;;  %v1565_v2 = vadd.f32 %v1561_v58, %v1557_v48  ;;  %v1601_v10 = vadd.f32 %v1597_v60, %v1593_v62  ;;  %v1588_v19 = vpop.permute.xlu0 %1587  ;;  %v766_v28 = vld [vmem:[#allocation3 + $0x10] sm:$0xff] }
 0x3ef   : > { %v1589_v3 = vsel %vm1544_vm3, %v1582_v42, %v1586_v1  ;;  %v1591_v7 = vsel %vm1544_vm3, %v1586_v1, %v1582_v42  ;;  %v1595_v32 = vmul.f32 %v7618_v17, %v766_v28  ;;  %v1552_v47 = vmul.f32 %v7612_v14, %v767_v22 }
 0x3f0   : > { %v1605_v8 = vmul.f32 %v1591_v7, %v772_v45  ;;  %v1606_v5 = vmul.f32 %v1589_v3, %v773_v46  ;;  %v1645_v39 = vpack.c.bf16 %v1565_v2, %v1565_v2  ;;  %v1551_v51 = vmul.f32 %v7610_v13, %v766_v28  ;;  %v7704_v3 = vld [vmem:[#allocation8] sm:$0xff] }
 0x3f1   : > { %v1649_v62 = vpack.c.bf16 %v7639_v29, %v7639_v29 }
 0x3f2   : > { %v7668_v11 = vadd.f32 %v1606_v5, %v1602_v0  ;;  %v1572_v6 = vpop.permute.xlu1 %1571  ;;  %v1609_v9 = vadd.f32 %v1605_v8, %v1601_v10  ;;  %v1528_v40 = vpop.permute.xlu0 %1527 }
 0x3f3   : > { %v1765_v2 = vsel %vm1763_vm2, %v1649_v62, 0 }
 0x3f4   : > { %v1647_v12 = vpack.c.bf16 %v1609_v9, %v1609_v9 }
 0x3f6   : > { %5527 = vmatpush3.bf16.xpose.msra.mxu1 %v1647_v12  ;;  %v1576_v21 = vpop.permute.xlu1 %1575  ;;  %v1543_v53 = vpop.permute.xlu0 %1542 }
 0x3f7   : > { %v1578_v23 = vsel %vm1531_vm1, %v1572_v6, %v1576_v21  ;;  %v1580_v24 = vsel %vm1531_vm1, %v1576_v21, %v1572_v6  ;;  %5532 = vmatprep.subr.bf16.mxu1 %v6925_v4 }
 0x3f8   : > { %v1599_v26 = vmul.f32 %v1578_v23, %v770_v15  ;;  %v1600_v27 = vmul.f32 %v1580_v24, %v771_v16 }
 0x3fa   : > { %v1604_v52 = vadd.f32 %v1600_v27, %v1596_v25  ;;  %v1584_v33 = vpop.permute.xlu1 %1583  ;;  %v1603_v41 = vadd.f32 %v1599_v26, %v1595_v32 }
 0x3fb   : > { %v1590_v35 = vsel %vm1544_vm3, %v1584_v33, %v1588_v19  ;;  %v1592_v38 = vsel %vm1544_vm3, %v1588_v19, %v1584_v33 }
 0x3fc   : > { %v1607_v42 = vmul.f32 %v1592_v38, %v774_v30  ;;  %v1608_v18 = vmul.f32 %v1590_v35, %v775_v31 }
 0x3fd   : > { %5529 = vmatmul.mubr.bf16.vlgmr.msra.gmra.mrb[0].mxu1 %v1645_v39 }
 0x3fe   : > { %v1611_v43 = vadd.f32 %v1607_v42, %v1603_v41  ;;  %v7681_v44 = vadd.f32 %v1608_v18, %v1604_v52  ;;  %v1524_v45 = vpop.permute.xlu1 %1523  ;;  %5534 = vmatprep.mubr.msk.bf16.mxu1 %vm6926_vm0, %v6925_v4 }
 0x3ff   : > { %v1533_v17 = vsel %vm1531_vm1, %v1524_v45, %v1528_v40  ;;  %v1535_v46 = vsel %vm1531_vm1, %v1528_v40, %v1524_v45 }
 0x400   : > { %v1648_v48 = vpack.c.bf16 %v1611_v43, %v1611_v43  ;;  %v1555_v49 = vmul.f32 %v1533_v17, %v770_v15  ;;  %v1556_v50 = vmul.f32 %v1535_v46, %v771_v16  ;;  %v1856_v43 = vpack.c.bf16 %v7668_v11, %v7668_v11 }
 0x401   : > { %v1857_v45 = vpack.c.bf16 %v7681_v44, %v7681_v44 }
 0x402   : > { %v1560_v54 = vadd.f32 %v1556_v50, %v1552_v47  ;;  %5533 = vmatpush3.bf16.xpose.msra.mxu1 %v1648_v48  ;;  %v1539_v55 = vpop.permute.xlu1 %1538  ;;  %v1559_v60 = vadd.f32 %v1555_v49, %v1551_v51 }
 0x403   : > { %v1546_v58 = vsel %vm1544_vm3, %v1539_v55, %v1543_v53  ;;  %v1548_v59 = vsel %vm1544_vm3, %v1543_v53, %v1539_v55  ;;  %5538 = vmatprep.subr.bf16.mxu1 %v6925_v4 }
 0x404   : > { %v1563_v61 = vmul.f32 %v1548_v59, %v774_v30  ;;  %v1564_v14 = vmul.f32 %v1546_v58, %v775_v31 }
 0x406   : > { %v1567_v0 = vadd.f32 %v1563_v61, %v1559_v60  ;;  %v7698_v13 = vadd.f32 %v1564_v14, %v1560_v54 }
 0x408   : > { %v1646_v1 = vpack.c.bf16 %v1567_v0, %v1567_v0  ;;  %v1855_v11 = vpack.c.bf16 %v7698_v13, %v7698_v13 }
 0x40a   : > { %5535 = vmatmul.mubr.bf16.vlgmr.msra.gmra.mrb[4].mxu1 %v1646_v1 }
 0x40b   : > { %5539 = vmatpush3.bf16.msra.mxu1 %v1765_v2  ;;  %5540 = vmatprep.mubr.msk.bf16.mxu1 %vm6926_vm0, %v6925_v4 }
 0x40c   : > { %5544 = vmatprep.subr.bf16.mxu1 %v6925_v4 }
 0x4d0   : > { %v1685_v20 = vpop.f32.mrb[0].mxu1 }
 0x4d1   : > { %v1731_v7 = vmul.f32 0.088388346, %v1685_v20  ;;  %v5530_v8 = vpop.f32.mrb[1].mxu1 }
 0x4d2   : > { %v1688_v5 = vpop.f32.mrb[2].mxu1 }
 0x4d3   : > { %v5531_v29 = vpop.f32.mrb[3].mxu1  ;;  %v1733_v10 = vadd.f32 %v1731_v7, %v7704_v3 }
 0x4d5   : > { %v1736_v6 = vsel %vm1735_vm4, %v1733_v10, -inf }
 0x4d6   : > { %1737 = vmax.xlane.f32.xlu1 %v1736_v6 }
 0x4dd   : > { %v1725_v9 = vpop.f32.mrb[4].mxu1 }
 0x4de   : > { %v1732_v12 = vmul.f32 0.088388346, %v1725_v9  ;;  %v5536_v15 = vpop.f32.mrb[5].mxu1 }
 0x4df   : > { %v1728_v16 = vpop.f32.mrb[6].mxu1  ;;  %v5888_v15 = vld [vmem:[%s7442_s17 + $0x80] ss:$8 sps:$4 sm:$0xff]  }
 0x4e0   : > { %v5537_v19 = vpop.f32.mrb[7].mxu1  ;;  %v1734_v21 = vadd.f32 %v1732_v12, %v7704_v3  ;;  %v5890_v16 = vld [vmem:[%s7442_s17 + $0x84] ss:$8 sps:$4 sm:$0xff]  }
 0x4e1   : > { %v5893_v19 = vld [vmem:[%s7442_s17 + $0x94] ss:$8 sps:$4 sm:$0xff]   ;;  %2141 = vmatprep.subr.bf16.mxu0 %v5890_v16  ;;  %v5959_v16 = vld [vmem:[%s7446_s7 + $0x12c] ss:$48 sps:$4 sm:$0xff]  }
 0x4e2   : > { %v1739_v22 = vsel %vm1735_vm4, %v1734_v21, -inf  ;;  %2142 = vmatpush1.bf16.msra.mxu0 %v5888_v15  ;;  %v5956_v15 = vld [vmem:[%s7446_s7 + $0x124] ss:$48 sps:$4 sm:$0xff]  }
 0x4e3   : > { %1740 = vmax.xlane.f32.xlu0 %v1739_v22  ;;  %2143 = vmatprep.subr.bf16.mxu0 %v5893_v19  ;;  %v5896_v22 = vld [vmem:[%s7442_s17 + $0xa4] ss:$8 sps:$4 sm:$0xff]  }
 0x4e4   : > { %v5954_v19 = vld [vmem:[%s7446_s7 + $0x120] ss:$48 sps:$4 sm:$0xff]  }
 0x563   : > { %v1738_v23 = vpop.xlane.xlu1 %1737 }
 0x564   : > { %v1742_v24 = vsub.f32 %v1733_v10, %v1738_v23  ;;  %v5894_v23 = vld [vmem:[%s7442_s17 + $0xa0] ss:$8 sps:$4 sm:$0xff]  }
 0x566   : > { %v1744_v25 = vmul.f32 1.442695, %v1742_v24  ;;  %v5899_v24 = vld [vmem:[%s7442_s17 + $0xb4] ss:$8 sps:$4 sm:$0xff]  }
 0x568   : > { %6372 = vpow2.f32 %v1744_v25  ;;  %v5897_v25 = vld [vmem:[%s7442_s17 + $0xb0] ss:$8 sps:$4 sm:$0xff]  }
 0x570   : > { %v1741_v26 = vpop.xlane.xlu0 %1740 }
 0x571   : > { %v1743_v27 = vsub.f32 %v1734_v21, %v1741_v26  ;;  %v5891_v21 = vld [vmem:[%s7442_s17 + $0x90] ss:$8 sps:$4 sm:$0xff]   ;;  %v5902_v26 = vld [vmem:[%s7442_s17 + $0xc4] ss:$8 sps:$4 sm:$0xff]  }
 0x572   : > { %v6373_v28 = vpop.eup %6372  ;;  %2144 = vmatpush1.bf16.msra.mxu0 %v5891_v21  ;;  %v5957_v21 = vld [vmem:[%s7446_s7 + $0x128] ss:$48 sps:$4 sm:$0xff]  }
 0x573   : > { %v1746_v30 = vmul.f32 1.442695, %v1743_v27  ;;  %v1748_v31 = vsel %vm1735_vm4, %v6373_v28, 0.0  ;;  %2145 = vmatprep.subr.bf16.mxu0 %v5896_v22  ;;  %v5900_v27 = vld [vmem:[%s7442_s17 + $0xc0] ss:$8 sps:$4 sm:$0xff]  }
 0x574   : > { %1749 = vadd.xlane.f32.xlu0 %v1748_v31  ;;  %v5962_v22 = vld [vmem:[%s7446_s7 + $0x184] ss:$48 sps:$4 sm:$0xff]  }
 0x575   : > { %6374 = vpow2.f32 %v1746_v30  ;;  %v5903_v30 = vld [vmem:[%s7442_s17 + $0xd0] ss:$8 sps:$4 sm:$0xff]  }
 0x576   : > { %2146 = vmatpush1.bf16.msra.mxu0 %v5894_v23  ;;  %v5965_v23 = vld [vmem:[%s7446_s7 + $0x18c] ss:$48 sps:$4 sm:$0xff]  }
 0x577   : > { %2147 = vmatprep.subr.bf16.mxu0 %v5899_v24  ;;  %v5960_v24 = vld [vmem:[%s7446_s7 + $0x180] ss:$48 sps:$4 sm:$0xff]  }
 0x57a   : > { %2148 = vmatpush1.bf16.msra.mxu0 %v5897_v25  ;;  %v5963_v25 = vld [vmem:[%s7446_s7 + $0x188] ss:$48 sps:$4 sm:$0xff]  }
 0x57b   : > { %2149 = vmatprep.subr.bf16.mxu0 %v5902_v26  ;;  %v5968_v26 = vld [vmem:[%s7446_s7 + $0x1e4] ss:$48 sps:$4 sm:$0xff]  }
 0x57e   : > { %2150 = vmatpush1.bf16.msra.mxu0 %v5900_v27  ;;  %v5971_v27 = vld [vmem:[%s7446_s7 + $0x1ec] ss:$48 sps:$4 sm:$0xff]  }
 0x57f   : > { %v6375_v32 = vpop.eup %6374 }
 0x580   : > { %v1751_v52 = vsel %vm1735_vm4, %v6375_v32, 0.0 }
 0x581   : > { %1752 = vadd.xlane.f32.xlu1 %v1751_v52 }
 0x601   : > { %v1750_v33 = vpop.xlane.xlu0 %1749 }
 0x602   : > { %6376 = vrcp.f32 %v1750_v33 }
 0x60c   : > { %v6377_v35 = vpop.eup %6376 }
 0x60d   : > { %v1756_v38 = vmul.f32 %v6377_v35, %v6373_v28  ;;  %v5905_v28 = vld [vmem:[%s7442_s17 + $0xd4] ss:$8 sps:$4 sm:$0xff]  }
 0x60e   : > { %v1753_v39 = vpop.xlane.xlu1 %1752  ;;  %2151 = vmatprep.subr.bf16.mxu0 %v5905_v28  ;;  %v5966_v28 = vld [vmem:[%s7446_s7 + $0x1e0] ss:$48 sps:$4 sm:$0xff]  }
 0x60f   : > { %6378 = vrcp.f32 %v1753_v39  ;;  %v1758_v40 = vpack.c.bf16 %v1756_v38, %v1756_v38  ;;  %2152 = vmatpush1.bf16.msra.mxu0 %v5903_v30  ;;  %v5969_v30 = vld [vmem:[%s7446_s7 + $0x1e8] ss:$48 sps:$4 sm:$0xff]  }
 0x611   : > { %5541 = vmatmul.mubr.msk.bf16.vlgmr.msra.gmra.mrb[8].mxu1 %vm1735_vm4, %v1758_v40 }
 0x612   : > { %5545 = vmatpush3.bf16.msra.mxu1 %v7645_v36  ;;  %5546 = vmatprep.mubr.msk.bf16.mxu1 %vm6926_vm0, %v6925_v4  ;;  %v1854_v36 = vpack.c.bf16 %v7662_v63, %v7662_v63 }
 0x613   : > { %5550 = vmatprep.subr.bf16.mxu1 %v6925_v4 }
 0x619   : > { %v6379_v41 = vpop.eup %6378 }
 0x61a   : > { %v1757_v42 = vmul.f32 %v6379_v41, %v6375_v32  ;;  %v5908_v41 = vld [vmem:[%s7442_s17 + $0xe4] ss:$8 sps:$4 sm:$0xff]  }
 0x61b   : > { %2153 = vmatprep.subr.bf16.mxu0 %v5908_v41  ;;  %v5986_v41 = vld [vmem:[%s7446_s7 + $0x304] ss:$48 sps:$4 sm:$0xff]  }
 0x61c   : > { %v1759_v18 = vpack.c.bf16 %v1757_v42, %v1757_v42  ;;  %v5906_v42 = vld [vmem:[%s7442_s17 + $0xe0] ss:$8 sps:$4 sm:$0xff]  }
 0x61d   : > { %2154 = vmatpush1.bf16.msra.mxu0 %v5906_v42  ;;  %v5989_v42 = vld [vmem:[%s7446_s7 + $0x30c] ss:$48 sps:$4 sm:$0xff]  }
 0x61e   : > { %5547 = vmatmul.mubr.msk.bf16.vlgmr.msra.gmra.mrb[12].mxu1 %vm1735_vm4, %v1759_v18  ;;  %v5911_v18 = vld [vmem:[%s7442_s17 + $0xf4] ss:$8 sps:$4 sm:$0xff]  }
 0x61f   : > { %5551 = vmatpush3.bf16.xpose.msra.mxu1 %v1856_v43  ;;  %5552 = vmatprep.mubr.msk.bf16.mxu1 %vm6926_vm0, %v6925_v4  ;;  %v5909_v43 = vld [vmem:[%s7442_s17 + $0xf0] ss:$8 sps:$4 sm:$0xff]  }
 0x620   : > { %5556 = vmatprep.subr.bf16.mxu1 %v6925_v4  ;;  %2155 = vmatprep.subr.bf16.mxu0 %v5911_v18  ;;  %v5984_v18 = vld [vmem:[%s7446_s7 + $0x300] ss:$48 sps:$4 sm:$0xff]  }
 0x621   : > { %2156 = vmatpush1.bf16.msra.mxu0 %v5909_v43  ;;  %v5987_v43 = vld [vmem:[%s7446_s7 + $0x308] ss:$48 sps:$4 sm:$0xff]  }
 0x626   : > { %5553 = vmatmul.mubr.bf16.vlgmr.msra.gmra.mrb[16].mxu1 %v1854_v36  ;;  %v5914_v36 = vld [vmem:[%s7442_s17 + $0x4] ss:$8 sps:$4 sm:$0xff]  }
 0x627   : > { %5557 = vmatpush3.bf16.xpose.msra.mxu1 %v1857_v45  ;;  %5558 = vmatprep.mubr.msk.bf16.mxu1 %vm6926_vm0, %v6925_v4 }
 0x628   : > { %5562 = vmatprep.subr.bf16.mxu1 %v6925_v4  ;;  %2264 = vmatprep.subr.bf16.mxu0 %v5914_v36  ;;  %v5992_v36 = vld [vmem:[%s7446_s7 + $0x364] ss:$48 sps:$4 sm:$0xff]  }
 0x62e   : > { %5559 = vmatmul.mubr.bf16.vlgmr.msra.gmra.mrb[20].mxu1 %v1855_v11 }
 0x62f   : > { %5563 = vmatpush3.bf16.msra.mxu1 %v7642_v34  ;;  %5564 = vmatprep.mubr.msk.bf16.mxu1 %vm6926_vm0, %v6925_v4 }
 0x630   : > { %5568 = vmatprep.subr.bf16.mxu1 %v6925_v4 }
 0x6e4   : > { %v7736_v63 = vpop.f32.mrb[8].mxu1 }
 0x6e5   : > { %v5542_v44 = vpop.f32.mrb[9].mxu1 }
 0x6e6   : > { %v1804_v17 = vpop.f32.mrb[10].mxu1 }
 0x6e7   : > { %v5543_v46 = vpop.f32.mrb[11].mxu1 }
 0x6e8   : > { %v5912_v46 = vld [vmem:[%s7442_s17] ss:$8 sps:$4 sm:$0xff]  }
 0x6f1   : > { %v7738_v47 = vpop.f32.mrb[12].mxu1 }
 0x6f2   : > { %v1853_v48 = vpack.c.bf16 %v7738_v47, %v7736_v63  ;;  %v5548_v49 = vpop.f32.mrb[13].mxu1  ;;  %v5945_v63 = vld [vmem:[%s7446_s7 + $0x68] ss:$48 sps:$4 sm:$0xff]   ;;  %v5950_v47 = vld [vmem:[%s7446_s7 + $0xc4] ss:$48 sps:$4 sm:$0xff]  }
 0x6f3   : > { %v1850_v50 = vpop.f32.mrb[14].mxu1 }
 0x6f4   : > { %v5549_v51 = vpop.f32.mrb[15].mxu1 }
 0x6f5   : > { %v5917_v51 = vld [vmem:[%s7442_s17 + $0x14] ss:$8 sps:$4 sm:$0xff]  }
 0x6f9   : > { %v1894_v53 = vpop.f32.mrb[16].mxu1 }
 0x6fa   : > { %v1940_v34 = vmul.f32 0.088388346, %v1894_v53  ;;  %v5554_v54 = vpop.f32.mrb[17].mxu1 }
 0x6fb   : > { %v1897_v55 = vpop.f32.mrb[18].mxu1  ;;  %v5915_v54 = vld [vmem:[%s7442_s17 + $0x10] ss:$8 sps:$4 sm:$0xff]  }
 0x6fc   : > { %v5555_v58 = vpop.f32.mrb[19].mxu1  ;;  %v1942_v59 = vadd.f32 %v1940_v34, %v7704_v3  ;;  %v5920_v55 = vld [vmem:[%s7442_s17 + $0x24] ss:$8 sps:$4 sm:$0xff]  }
 0x6fd   : > { %v5918_v58 = vld [vmem:[%s7442_s17 + $0x20] ss:$8 sps:$4 sm:$0xff]  }
 0x6fe   : > { %v1944_v60 = vsel %vm1735_vm4, %v1942_v59, -inf }
 0x6ff   : > { %1945 = vmax.xlane.f32.xlu0 %v1944_v60  ;;  %v5921_v60 = vld [vmem:[%s7442_s17 + $0x30] ss:$8 sps:$4 sm:$0xff]  }
 0x701   : > { %v1934_v61 = vpop.f32.mrb[20].mxu1 }
 0x702   : > { %v1941_v14 = vmul.f32 0.088388346, %v1934_v61  ;;  %v5560_v62 = vpop.f32.mrb[21].mxu1  ;;  %v5926_v61 = vld [vmem:[%s7442_s17 + $0x44] ss:$8 sps:$4 sm:$0xff]  }
 0x703   : > { %v1937_v0 = vpop.f32.mrb[22].mxu1  ;;  %v5929_v62 = vld [vmem:[%s7442_s17 + $0x54] ss:$8 sps:$4 sm:$0xff]  }
 0x704   : > { %v5561_v13 = vpop.f32.mrb[23].mxu1  ;;  %v1943_v1 = vadd.f32 %v1941_v14, %v7704_v3  ;;  %v5924_v14 = vld [vmem:[%s7442_s17 + $0x40] ss:$8 sps:$4 sm:$0xff]   ;;  %v5927_v0 = vld [vmem:[%s7442_s17 + $0x50] ss:$8 sps:$4 sm:$0xff]  }
 0x705   : > { %v5932_v13 = vld [vmem:[%s7442_s17 + $0x64] ss:$8 sps:$4 sm:$0xff]  }
 0x706   : > { %v1947_v2 = vsel %vm1735_vm4, %v1943_v1, -inf }
 0x707   : > { %1948 = vmax.xlane.f32.xlu1 %v1947_v2  ;;  %v5935_v2 = vld [vmem:[%s7442_s17 + $0x74] ss:$8 sps:$4 sm:$0xff]  }
 0x78c   : > { %v1946_v20 = vpop.xlane.xlu0 %1945 }
 0x78d   : > { %v1950_v7 = vsub.f32 %v1942_v59, %v1946_v20  ;;  %v5923_v59 = vld [vmem:[%s7442_s17 + $0x34] ss:$8 sps:$4 sm:$0xff]   ;;  %v5933_v20 = vld [vmem:[%s7442_s17 + $0x70] ss:$8 sps:$4 sm:$0xff]  }
 0x78f   : > { %v1952_v8 = vmul.f32 1.442695, %v1950_v7  ;;  %v5936_v7 = vld [vmem:[%s7446_s7] ss:$48 sps:$4 sm:$0xff]  }
 0x791   : > { %6380 = vpow2.f32 %v1952_v8  ;;  %v5938_v8 = vld [vmem:[%s7446_s7 + $0x4] ss:$48 sps:$4 sm:$0xff]  }
 0x794   : > { %v1949_v5 = vpop.xlane.xlu1 %1948 }
 0x795   : > { %v1951_v29 = vsub.f32 %v1943_v1, %v1949_v5  ;;  %v5930_v1 = vld [vmem:[%s7442_s17 + $0x60] ss:$8 sps:$4 sm:$0xff]   ;;  %v5939_v5 = vld [vmem:[%s7446_s7 + $0x8] ss:$48 sps:$4 sm:$0xff]  }
 0x797   : > { %v1954_v10 = vmul.f32 1.442695, %v1951_v29  ;;  %v5941_v29 = vld [vmem:[%s7446_s7 + $0xc] ss:$48 sps:$4 sm:$0xff]  }
 0x799   : > { %6382 = vpow2.f32 %v1954_v10  ;;  %v5944_v10 = vld [vmem:[%s7446_s7 + $0x64] ss:$48 sps:$4 sm:$0xff]  }
 0x79b   : > { %v6381_v6 = vpop.eup %6380 }
 0x79c   : > { %v1956_v3 = vsel %vm1735_vm4, %v6381_v6, 0.0 }
 0x79d   : > { %1957 = vadd.xlane.f32.xlu0 %v1956_v3  ;;  %v5942_v3 = vld [vmem:[%s7446_s7 + $0x60] ss:$48 sps:$4 sm:$0xff]  }
 0x7a3   : > { %v6383_v9 = vpop.eup %6382 }
 0x7a4   : > { %v1959_v12 = vsel %vm1735_vm4, %v6383_v9, 0.0 }
 0x7a5   : > { %1960 = vadd.xlane.f32.xlu1 %v1959_v12  ;;  %v5951_v12 = vld [vmem:[%s7446_s7 + $0xc8] ss:$48 sps:$4 sm:$0xff]  }
 0x82a   : > { %v1958_v31 = vpop.xlane.xlu0 %1957 }
 0x82b   : > { %6384 = vrcp.f32 %v1958_v31  ;;  %v5974_v31 = vld [vmem:[%s7446_s7 + $0x244] ss:$48 sps:$4 sm:$0xff]  }
 0x832   : > { %v1961_v32 = vpop.xlane.xlu1 %1960 }
 0x833   : > { %6386 = vrcp.f32 %v1961_v32  ;;  %v5977_v32 = vld [vmem:[%s7446_s7 + $0x24c] ss:$48 sps:$4 sm:$0xff]  }
 0x835   : > { %v6385_v52 = vpop.eup %6384 }
 0x836   : > { %v1964_v33 = vmul.f32 %v6385_v52, %v6381_v6  ;;  %v5947_v6 = vld [vmem:[%s7446_s7 + $0x6c] ss:$48 sps:$4 sm:$0xff]   ;;  %v5972_v52 = vld [vmem:[%s7446_s7 + $0x240] ss:$48 sps:$4 sm:$0xff]  }
 0x838   : > { %v1966_v35 = vpack.c.bf16 %v1964_v33, %v1964_v33  ;;  %v5975_v33 = vld [vmem:[%s7446_s7 + $0x248] ss:$48 sps:$4 sm:$0xff]  }
 0x83a   : > { %5565 = vmatmul.mubr.msk.bf16.vlgmr.msra.gmra.mrb[24].mxu1 %vm1735_vm4, %v1966_v35  ;;  %v5980_v35 = vld [vmem:[%s7446_s7 + $0x2a4] ss:$48 sps:$4 sm:$0xff]  }
 0x83b   : > { %5569 = vmatpush3.bf16.msra.mxu1 %v7648_v37  ;;  %5570 = vmatprep.mubr.msk.bf16.mxu1 %vm6926_vm0, %v6925_v4  ;;  %v6927_v37 = vmov 0  }
 0x83c   : > { %2173 = vmatprep.mubr.bf16.mxu0 %v6927_v37  ;;  %3501 = vmatprep.subr.bf16.mxu1 %v5938_v8  ;;  %v6007_v8 = vld [vmem:[%s7446_s7 + $0x42c] ss:$48 sps:$4 sm:$0xff]  }
 0x83d   : > { %v6387_v38 = vpop.eup %6386 }
 0x83e   : > { %v1965_v39 = vmul.f32 %v6387_v38, %v6383_v9  ;;  %v5948_v9 = vld [vmem:[%s7446_s7 + $0xc0] ss:$48 sps:$4 sm:$0xff]   ;;  %v5983_v38 = vld [vmem:[%s7446_s7 + $0x2ac] ss:$48 sps:$4 sm:$0xff]  }
 0x840   : > { %v1967_v40 = vpack.c.bf16 %v1965_v39, %v1965_v39  ;;  %v5978_v39 = vld [vmem:[%s7446_s7 + $0x2a0] ss:$48 sps:$4 sm:$0xff]  }
 0x842   : > { %5571 = vmatmul.mubr.msk.bf16.vlgmr.msra.gmra.mrb[28].mxu1 %vm1735_vm4, %v1967_v40  ;;  %v5981_v40 = vld [vmem:[%s7446_s7 + $0x2a8] ss:$48 sps:$4 sm:$0xff]  }
 0x843   : > { %3502 = vmatpush1.bf16.msra.mxu1 %v5936_v7  ;;  %v6004_v7 = vld [vmem:[%s7446_s7 + $0x424] ss:$48 sps:$4 sm:$0xff]  }
 0x844   : > { %3503 = vmatprep.subr.bf16.mxu1 %v5944_v10  ;;  %v6010_v10 = vld [vmem:[%s7446_s7 + $0x484] ss:$48 sps:$4 sm:$0xff]  }
 0x847   : > { %3504 = vmatpush1.bf16.msra.mxu1 %v5942_v3  ;;  %v6008_v3 = vld [vmem:[%s7446_s7 + $0x480] ss:$48 sps:$4 sm:$0xff]  }
 0x848   : > { %3505 = vmatprep.subr.bf16.mxu1 %v5950_v47  ;;  %v6016_v47 = vld [vmem:[%s7446_s7 + $0x4e4] ss:$48 sps:$4 sm:$0xff]  }
 0x84b   : > { %3506 = vmatpush1.bf16.msra.mxu1 %v5948_v9  ;;  %v6014_v9 = vld [vmem:[%s7446_s7 + $0x4e0] ss:$48 sps:$4 sm:$0xff]  }
 0x84c   : > { %3507 = vmatprep.subr.bf16.mxu1 %v5956_v15  ;;  %v6022_v15 = vld [vmem:[%s7446_s7 + $0x544] ss:$48 sps:$4 sm:$0xff]  }
 0x84f   : > { %3508 = vmatpush1.bf16.msra.mxu1 %v5954_v19  ;;  %v6020_v19 = vld [vmem:[%s7446_s7 + $0x540] ss:$48 sps:$4 sm:$0xff]  }
 0x850   : > { %3509 = vmatprep.subr.bf16.mxu1 %v5962_v22  ;;  %v6028_v22 = vld [vmem:[%s7446_s7 + $0x5a4] ss:$48 sps:$4 sm:$0xff]  }
 0x853   : > { %3510 = vmatpush1.bf16.msra.mxu1 %v5960_v24  ;;  %v6026_v24 = vld [vmem:[%s7446_s7 + $0x5a0] ss:$48 sps:$4 sm:$0xff]  }
 0x854   : > { %3511 = vmatprep.subr.bf16.mxu1 %v5968_v26  ;;  %v6034_v26 = vld [vmem:[%s7446_s7 + $0x14] ss:$48 sps:$4 sm:$0xff]  }
 0x857   : > { %3512 = vmatpush1.bf16.msra.mxu1 %v5966_v28 }
 0x858   : > { %3513 = vmatprep.subr.bf16.mxu1 %v5974_v31 }
 0x85b   : > { %3514 = vmatpush1.bf16.msra.mxu1 %v5972_v52 }
 0x85c   : > { %3515 = vmatprep.subr.bf16.mxu1 %v5980_v35  ;;  %v2311_v35 = vld [vmem:[%s7444_s15] sm:$0x3] }
 0x85f   : > { %3516 = vmatpush1.bf16.msra.mxu1 %v5978_v39  ;;  %v2340_v39 = vrot.slane %v2311_v35, %v7527_v56 }
 0x860   : > { %3517 = vmatprep.subr.bf16.mxu1 %v5986_v41 }
 0x863   : > { %3518 = vmatpush1.bf16.msra.mxu1 %v5984_v18 }
 0x864   : > { %3519 = vmatprep.subr.bf16.mxu1 %v5992_v36 }
 0x90d   : > { %v2008_v4 = vpop.f32.mrb[24].mxu1 }
 0x90e   : > { %v5566_v45 = vpop.f32.mrb[25].mxu1 }
 0x90f   : > { %v2011_v11 = vpop.f32.mrb[26].mxu1  ;;  %v5993_v45 = vld [vmem:[%s7446_s7 + $0x368] ss:$48 sps:$4 sm:$0xff]  }
 0x910   : > { %v5567_v44 = vpop.f32.mrb[27].mxu1  ;;  %v5998_v11 = vld [vmem:[%s7446_s7 + $0x3c4] ss:$48 sps:$4 sm:$0xff]  }
 0x911   : > { %v6001_v44 = vld [vmem:[%s7446_s7 + $0x3cc] ss:$48 sps:$4 sm:$0xff]  }
 0x915   : > { %v2054_v17 = vpop.f32.mrb[28].mxu1 }
 0x916   : > { %v2060_v49 = vpack.c.bf16 %v2054_v17, %v2008_v4  ;;  %v5572_v50 = vpop.f32.mrb[29].mxu1  ;;  %v5990_v4 = vld [vmem:[%s7446_s7 + $0x360] ss:$48 sps:$4 sm:$0xff]  }
 0x917   : > { %v2057_v53 = vpop.f32.mrb[30].mxu1  ;;  %3520 = vmatpush1.bf16.msra.mxu1 %v5990_v4  ;;  %v5996_v17 = vld [vmem:[%s7446_s7 + $0x3c0] ss:$48 sps:$4 sm:$0xff]  }
 0x918   : > { %v5573_v34 = vpop.f32.mrb[31].mxu1  ;;  %2174 = vmatmul.mubr.bf16.vlgmr.msra.gmra.mrb[12].mxu0 %v2060_v49  ;;  %3521 = vmatprep.subr.bf16.mxu1 %v5998_v11  ;;  %v6440_v50 = vld [vmem:[#allocation2] sm:$0xff] }
 0x919   : > { %2265 = vmatpush1.bf16.msra.mxu0 %v5912_v46  ;;  %2296 = vmatprep.mubr.bf16.mxu0 %v6927_v37  ;;  %v5995_v37 = vld [vmem:[%s7446_s7 + $0x36c] ss:$48 sps:$4 sm:$0xff]   ;;  %v5999_v46 = vld [vmem:[%s7446_s7 + $0x3c8] ss:$48 sps:$4 sm:$0xff]  }
 0x91a   : > { %2266 = vmatprep.subr.bf16.mxu0 %v5917_v51  ;;  %v6441_v34 = vld [vmem:[#allocation2 + $0x8] sm:$0xff] }
 0x91b   : > { %3522 = vmatpush1.bf16.msra.mxu1 %v5996_v17 }
 0x91c   : > { %3523 = vmatprep.subr.bf16.mxu1 %v6004_v7  ;;  %v6061_v7 = vld [vmem:[%s7446_s7 + $0x19c] ss:$48 sps:$4 sm:$0xff]  }
 0x91d   : > { %2267 = vmatpush1.bf16.msra.mxu0 %v5915_v54 }
 0x91e   : > { %2268 = vmatprep.subr.bf16.mxu0 %v5920_v55 }
 0x921   : > { %2269 = vmatpush1.bf16.msra.mxu0 %v5918_v58  ;;  %v6442_v58 = vld [vmem:[#allocation2 + $0x10] sm:$0xff] }
 0x922   : > { %2270 = vmatprep.subr.bf16.mxu0 %v5923_v59 }
 0x925   : > { %2271 = vmatpush1.bf16.msra.mxu0 %v5921_v60 }
 0x926   : > { %2272 = vmatprep.subr.bf16.mxu0 %v5926_v61 }
 0x929   : > { %2273 = vmatpush1.bf16.msra.mxu0 %v5924_v14  ;;  %v6443_v14 = vld [vmem:[#allocation2 + $0x18] sm:$0xff] }
 0x92a   : > { %2274 = vmatprep.subr.bf16.mxu0 %v5929_v62 }
 0x92d   : > { %2275 = vmatpush1.bf16.msra.mxu0 %v5927_v0 }
 0x92e   : > { %2276 = vmatprep.subr.bf16.mxu0 %v5932_v13 }
 0x931   : > { %2277 = vmatpush1.bf16.msra.mxu0 %v5930_v1 }
 0x932   : > { %2278 = vmatprep.subr.bf16.mxu0 %v5935_v2 }
 0x935   : > { %2279 = vmatpush1.bf16.msra.mxu0 %v5933_v20 }
 0x936   : > { %3544 = vmatprep.subr.bf16.mxu0 %v5941_v29  ;;  %v6005_v29 = vld [vmem:[%s7446_s7 + $0x428] ss:$48 sps:$4 sm:$0xff]  }
 0x938   : > { %2297 = vmatmul.mubr.bf16.vlgmr.msra.gmra.mrb[12].mxu0 %v1853_v48  ;;  %v5953_v48 = vld [vmem:[%s7446_s7 + $0xcc] ss:$48 sps:$4 sm:$0xff]  }
 0x939   : > { %3545 = vmatpush1.bf16.msra.mxu0 %v5939_v5  ;;  %v6002_v5 = vld [vmem:[%s7446_s7 + $0x420] ss:$48 sps:$4 sm:$0xff]  }
 0x93a   : > { %3546 = vmatprep.subr.bf16.mxu0 %v5947_v6  ;;  %3524 = vmatpush1.bf16.msra.mxu1 %v6002_v5  ;;  %v6013_v6 = vld [vmem:[%s7446_s7 + $0x48c] ss:$48 sps:$4 sm:$0xff]   ;;  %v6059_v5 = vld [vmem:[%s7446_s7 + $0x198] ss:$48 sps:$4 sm:$0xff]  }
 0x93b   : > { %3525 = vmatprep.subr.bf16.mxu1 %v6010_v10  ;;  %v6067_v10 = vld [vmem:[%s7446_s7 + $0x1fc] ss:$48 sps:$4 sm:$0xff]  }
 0x93d   : > { %3547 = vmatpush1.bf16.msra.mxu0 %v5945_v63  ;;  %v6011_v63 = vld [vmem:[%s7446_s7 + $0x488] ss:$48 sps:$4 sm:$0xff]  }
 0x93e   : > { %3548 = vmatprep.subr.bf16.mxu0 %v5953_v48  ;;  %3526 = vmatpush1.bf16.msra.mxu1 %v6008_v3  ;;  %v6019_v48 = vld [vmem:[%s7446_s7 + $0x4ec] ss:$48 sps:$4 sm:$0xff]   ;;  %v6065_v3 = vld [vmem:[%s7446_s7 + $0x1f8] ss:$48 sps:$4 sm:$0xff]  }
 0x93f   : > { %3527 = vmatprep.subr.bf16.mxu1 %v6016_v47  ;;  %v6073_v47 = vld [vmem:[%s7446_s7 + $0x25c] ss:$48 sps:$4 sm:$0xff]  }
 0x941   : > { %3549 = vmatpush1.bf16.msra.mxu0 %v5951_v12  ;;  %v6017_v12 = vld [vmem:[%s7446_s7 + $0x4e8] ss:$48 sps:$4 sm:$0xff]  }
 0x942   : > { %3550 = vmatprep.subr.bf16.mxu0 %v5959_v16  ;;  %3528 = vmatpush1.bf16.msra.mxu1 %v6014_v9  ;;  %v6025_v16 = vld [vmem:[%s7446_s7 + $0x54c] ss:$48 sps:$4 sm:$0xff]   ;;  %v6071_v9 = vld [vmem:[%s7446_s7 + $0x258] ss:$48 sps:$4 sm:$0xff]  }
 0x943   : > { %3529 = vmatprep.subr.bf16.mxu1 %v6022_v15  ;;  %v6079_v15 = vld [vmem:[%s7446_s7 + $0x2bc] ss:$48 sps:$4 sm:$0xff]  }
 0x945   : > { %3551 = vmatpush1.bf16.msra.mxu0 %v5957_v21  ;;  %v6023_v21 = vld [vmem:[%s7446_s7 + $0x548] ss:$48 sps:$4 sm:$0xff]  }
 0x946   : > { %3552 = vmatprep.subr.bf16.mxu0 %v5965_v23  ;;  %3530 = vmatpush1.bf16.msra.mxu1 %v6020_v19  ;;  %v6031_v23 = vld [vmem:[%s7446_s7 + $0x5ac] ss:$48 sps:$4 sm:$0xff]   ;;  %v6077_v19 = vld [vmem:[%s7446_s7 + $0x2b8] ss:$48 sps:$4 sm:$0xff]  }
 0x947   : > { %3531 = vmatprep.subr.bf16.mxu1 %v6028_v22  ;;  %v6085_v22 = vld [vmem:[%s7446_s7 + $0x31c] ss:$48 sps:$4 sm:$0xff]  }
 0x949   : > { %3553 = vmatpush1.bf16.msra.mxu0 %v5963_v25  ;;  %v6029_v25 = vld [vmem:[%s7446_s7 + $0x5a8] ss:$48 sps:$4 sm:$0xff]  }
 0x94a   : > { %3554 = vmatprep.subr.bf16.mxu0 %v5971_v27  ;;  %3532 = vmatpush1.bf16.msra.mxu1 %v6026_v24  ;;  %v6037_v27 = vld [vmem:[%s7446_s7 + $0x1c] ss:$48 sps:$4 sm:$0xff]   ;;  %v6083_v24 = vld [vmem:[%s7446_s7 + $0x318] ss:$48 sps:$4 sm:$0xff]  }
 0x94b   : > { %3587 = vmatprep.subr.bf16.mxu1 %v6034_v26  ;;  %v6091_v26 = vld [vmem:[%s7446_s7 + $0x37c] ss:$48 sps:$4 sm:$0xff]  }
 0x94d   : > { %3555 = vmatpush1.bf16.msra.mxu0 %v5969_v30 }
 0x94e   : > { %3556 = vmatprep.subr.bf16.mxu0 %v5977_v32 }
 0x951   : > { %3557 = vmatpush1.bf16.msra.mxu0 %v5975_v33 }
 0x952   : > { %3558 = vmatprep.subr.bf16.mxu0 %v5983_v38 }
 0x955   : > { %3559 = vmatpush1.bf16.msra.mxu0 %v5981_v40  ;;  %v2336_v40 = vrot.slane %v2311_v35, %v7529_v57  ;;  %v6103_v35 = vld [vmem:[%s7446_s7 + $0x43c] ss:$48 sps:$4 sm:$0xff]  }
 0x956   : > { %3560 = vmatprep.subr.bf16.mxu0 %v5989_v42 }
 0x959   : > { %3561 = vmatpush1.bf16.msra.mxu0 %v5987_v43 }
 0x95a   : > { %3562 = vmatprep.subr.bf16.mxu0 %v5995_v37 }
 0x95d   : > { %3563 = vmatpush1.bf16.msra.mxu0 %v5993_v45 }
 0x95e   : > { %3564 = vmatprep.subr.bf16.mxu0 %v6001_v44 }
 0x961   : > { %3565 = vmatpush1.bf16.msra.mxu0 %v5999_v46  ;;  %v6032_v46 = vld [vmem:[%s7446_s7 + $0x10] ss:$48 sps:$4 sm:$0xff]  }
 0x962   : > { %3566 = vmatprep.subr.bf16.mxu0 %v6007_v8  ;;  %v6056_v8 = vld [vmem:[%s7446_s7 + $0x190] ss:$48 sps:$4 sm:$0xff]  }
 0x965   : > { %3567 = vmatpush1.bf16.msra.mxu0 %v6005_v29  ;;  %v6064_v29 = vld [vmem:[%s7446_s7 + $0x1f4] ss:$48 sps:$4 sm:$0xff]  }
 0x966   : > { %3568 = vmatprep.subr.bf16.mxu0 %v6013_v6  ;;  %v6062_v6 = vld [vmem:[%s7446_s7 + $0x1f0] ss:$48 sps:$4 sm:$0xff]  }
 0x969   : > { %3569 = vmatpush1.bf16.msra.mxu0 %v6011_v63  ;;  %v6070_v63 = vld [vmem:[%s7446_s7 + $0x254] ss:$48 sps:$4 sm:$0xff]  }
 0x96a   : > { %3570 = vmatprep.subr.bf16.mxu0 %v6019_v48  ;;  %v6068_v48 = vld [vmem:[%s7446_s7 + $0x250] ss:$48 sps:$4 sm:$0xff]  }
 0x96d   : > { %3571 = vmatpush1.bf16.msra.mxu0 %v6017_v12  ;;  %v6076_v12 = vld [vmem:[%s7446_s7 + $0x2b4] ss:$48 sps:$4 sm:$0xff]  }
 0x96e   : > { %3572 = vmatprep.subr.bf16.mxu0 %v6025_v16  ;;  %v6074_v16 = vld [vmem:[%s7446_s7 + $0x2b0] ss:$48 sps:$4 sm:$0xff]  }
 0x971   : > { %3573 = vmatpush1.bf16.msra.mxu0 %v6023_v21  ;;  %v6082_v21 = vld [vmem:[%s7446_s7 + $0x314] ss:$48 sps:$4 sm:$0xff]  }
 0x972   : > { %3574 = vmatprep.subr.bf16.mxu0 %v6031_v23  ;;  %v6080_v23 = vld [vmem:[%s7446_s7 + $0x310] ss:$48 sps:$4 sm:$0xff]  }
 0x975   : > { %3575 = vmatpush1.bf16.msra.mxu0 %v6029_v25  ;;  %v6088_v25 = vld [vmem:[%s7446_s7 + $0x374] ss:$48 sps:$4 sm:$0xff]  }
 0x976   : > { %3630 = vmatprep.subr.bf16.mxu0 %v6037_v27  ;;  %v6086_v27 = vld [vmem:[%s7446_s7 + $0x370] ss:$48 sps:$4 sm:$0xff]  }
 0xa0b   : > { %v2298_v49 = vpop.f32.mrb[12].mxu0 }
 0xa0c   : > { %v7832_v51 = vadd.f32 %v6440_v50, %v2298_v49  ;;  %v2300_v53 = vpop.f32.mrb[13].mxu0  ;;  %v6035_v49 = vld [vmem:[%s7446_s7 + $0x18] ss:$48 sps:$4 sm:$0xff]   ;;  %v6040_v50 = vld [vmem:[%s7446_s7 + $0x74] ss:$48 sps:$4 sm:$0xff]  }
 0xa0d   : > { %v7834_v54 = vadd.f32 %v6441_v34, %v2300_v53  ;;  %v2302_v55 = vpop.f32.mrb[14].mxu0  ;;  %v6043_v53 = vld [vmem:[%s7446_s7 + $0x7c] ss:$48 sps:$4 sm:$0xff]   ;;  %v6038_v34 = vld [vmem:[%s7446_s7 + $0x70] ss:$48 sps:$4 sm:$0xff]  }
 0xa0e   : > { %v7836_v59 = vadd.f32 %v6442_v58, %v2302_v55  ;;  %v2304_v60 = vpop.f32.mrb[15].mxu0  ;;  %v2312_v61 = vmul.f32 %v7832_v51, %v7832_v51  ;;  %v6041_v55 = vld [vmem:[%s7446_s7 + $0x78] ss:$48 sps:$4 sm:$0xff]   ;;  %v6046_v58 = vld [vmem:[%s7446_s7 + $0xd4] ss:$48 sps:$4 sm:$0xff]  }
 0xa0f   : > { %v7840_v62 = vadd.f32 %v6443_v14, %v2304_v60  ;;  %v2313_v0 = vmul.f32 %v7834_v54, %v7834_v54  ;;  %v6049_v60 = vld [vmem:[%s7446_s7 + $0xdc] ss:$48 sps:$4 sm:$0xff]   ;;  %v6047_v14 = vld [vmem:[%s7446_s7 + $0xd8] ss:$48 sps:$4 sm:$0xff]  }
 0xa10   : > { %v2314_v13 = vmul.f32 %v7836_v59, %v7836_v59 }
 0xa11   : > { %v2316_v1 = vadd.f32 %v2313_v0, %v2312_v61  ;;  %v2315_v2 = vmul.f32 %v7840_v62, %v7840_v62  ;;  %v6044_v61 = vld [vmem:[%s7446_s7 + $0xd0] ss:$48 sps:$4 sm:$0xff]   ;;  %v6052_v0 = vld [vmem:[%s7446_s7 + $0x134] ss:$48 sps:$4 sm:$0xff]  }
 0xa13   : > { %2317 = vadd.xlane.f32.xlu0 %v2316_v1  ;;  %v2319_v20 = vadd.f32 %v2315_v2, %v2314_v13  ;;  %v6055_v13 = vld [vmem:[%s7446_s7 + $0x13c] ss:$48 sps:$4 sm:$0xff]   ;;  %v6050_v1 = vld [vmem:[%s7446_s7 + $0x130] ss:$48 sps:$4 sm:$0xff]   ;;  %v6053_v2 = vld [vmem:[%s7446_s7 + $0x138] ss:$48 sps:$4 sm:$0xff]  }
 0xa15   : > { %2320 = vadd.xlane.f32.xlu1 %v2319_v20  ;;  %v6058_v20 = vld [vmem:[%s7446_s7 + $0x194] ss:$48 sps:$4 sm:$0xff]  }
 0xaa0   : > { %v2318_v28 = vpop.xlane.xlu0 %2317 }
 0xaa1   : > { %v2322_v30 = vmul.f32 0.00390625, %v2318_v28  ;;  %v6089_v28 = vld [vmem:[%s7446_s7 + $0x378] ss:$48 sps:$4 sm:$0xff]  }
 0xaa2   : > { %v2321_v31 = vpop.xlane.xlu1 %2320 }
 0xaa3   : > { %v2324_v32 = vadd.f32 1e-05, %v2322_v30  ;;  %v2323_v52 = vmul.f32 0.00390625, %v2321_v31  ;;  %v6094_v30 = vld [vmem:[%s7446_s7 + $0x3d4] ss:$48 sps:$4 sm:$0xff]  }
 0xaa4   : > { %v6097_v31 = vld [vmem:[%s7446_s7 + $0x3dc] ss:$48 sps:$4 sm:$0xff]  }
 0xaa5   : > { %6388 = vrsqrt.f32 %v2324_v32  ;;  %v2325_v33 = vadd.f32 1e-05, %v2323_v52  ;;  %v6092_v32 = vld [vmem:[%s7446_s7 + $0x3d0] ss:$48 sps:$4 sm:$0xff]   ;;  %v6095_v52 = vld [vmem:[%s7446_s7 + $0x3d8] ss:$48 sps:$4 sm:$0xff]  }
 0xaa7   : > { %6390 = vrsqrt.f32 %v2325_v33  ;;  %v6100_v33 = vld [vmem:[%s7446_s7 + $0x434] ss:$48 sps:$4 sm:$0xff]  }
 0xaaf   : > { %v6389_v38 = vpop.eup %6388 }
 0xab0   : > { %v2328_v41 = vmul.f32 %v6389_v38, %v7832_v51  ;;  %v2329_v42 = vmul.f32 %v6389_v38, %v7834_v54  ;;  %v6098_v38 = vld [vmem:[%s7446_s7 + $0x430] ss:$48 sps:$4 sm:$0xff]  }
 0xab1   : > { %v6391_v18 = vpop.eup %6390 }
 0xab2   : > { %v2330_v43 = vmul.f32 %v6391_v18, %v7836_v59  ;;  %v2331_v36 = vmul.f32 %v6391_v18, %v7840_v62  ;;  %v2343_v37 = vmul.f32 %v2336_v40, %v2328_v41  ;;  %v2344_v4 = vmul.f32 %v2340_v39, %v2329_v42  ;;  %v6109_v41 = vld [vmem:[%s7446_s7 + $0x49c] ss:$48 sps:$4 sm:$0xff]   ;;  %v6104_v42 = vld [vmem:[%s7446_s7 + $0x490] ss:$48 sps:$4 sm:$0xff]   ;;  %v6107_v18 = vld [vmem:[%s7446_s7 + $0x498] ss:$48 sps:$4 sm:$0xff]  }
 0xab4   : > { %v2345_v45 = vmul.f32 %v2336_v40, %v2330_v43  ;;  %v2346_v11 = vmul.f32 %v2340_v39, %v2331_v36  ;;  %v6101_v39 = vld [vmem:[%s7446_s7 + $0x438] ss:$48 sps:$4 sm:$0xff]   ;;  %v6106_v40 = vld [vmem:[%s7446_s7 + $0x494] ss:$48 sps:$4 sm:$0xff]   ;;  %v6115_v36 = vld [vmem:[%s7446_s7 + $0x4fc] ss:$48 sps:$4 sm:$0xff]  }
 0xab5   : > { %v6112_v43 = vld [vmem:[%s7446_s7 + $0x4f4] ss:$48 sps:$4 sm:$0xff]  }
 0xab6   : > { %v7877_v44 = vpack.c.bf16 %v2345_v45, %v2343_v37  ;;  %v7879_v17 = vpack.c.bf16 %v2346_v11, %v2344_v4  ;;  %v6110_v37 = vld [vmem:[%s7446_s7 + $0x4f0] ss:$48 sps:$4 sm:$0xff]   ;;  %v6113_v4 = vld [vmem:[%s7446_s7 + $0x4f8] ss:$48 sps:$4 sm:$0xff]   ;;  %v6118_v45 = vld [vmem:[%s7446_s7 + $0x554] ss:$48 sps:$4 sm:$0xff]  }
 0xab7   : > { %v6121_v11 = vld [vmem:[%s7446_s7 + $0x55c] ss:$48 sps:$4 sm:$0xff]  }
 0xab8   : > { %3533 = vmatprep.mubr.bf16.mxu1 %v7879_v17  ;;  %3576 = vmatprep.mubr.bf16.mxu0 %v7879_v17 }
 0xab9   : > { %3534 = vmatmul.mubr.bf16.vlgmr.msra.gmra.mrb[32].mxu1 %v7877_v44  ;;  %3577 = vmatmul.mubr.bf16.vlgmr.msra.gmra.mrb[16].mxu0 %v7877_v44 }
 0xaba   : > { %3588 = vmatpush1.bf16.msra.mxu1 %v6032_v46  ;;  %3631 = vmatpush1.bf16.msra.mxu0 %v6035_v49  ;;  %v6116_v46 = vld [vmem:[%s7446_s7 + $0x550] ss:$48 sps:$4 sm:$0xff]   ;;  %v6119_v49 = vld [vmem:[%s7446_s7 + $0x558] ss:$48 sps:$4 sm:$0xff]  }
 0xabb   : > { %3619 = vmatprep.mubr.bf16.mxu1 %v7879_v17  ;;  %3662 = vmatprep.mubr.bf16.mxu0 %v7879_v17 }
 0xabc   : > { %3589 = vmatprep.subr.bf16.mxu1 %v6040_v50  ;;  %3632 = vmatprep.subr.bf16.mxu0 %v6043_v53  ;;  %v6124_v50 = vld [vmem:[%s7446_s7 + $0x5b4] ss:$48 sps:$4 sm:$0xff]   ;;  %v6127_v53 = vld [vmem:[%s7446_s7 + $0x5bc] ss:$48 sps:$4 sm:$0xff]  }
 0xabe   : > { %3590 = vmatpush1.bf16.msra.mxu1 %v6038_v34  ;;  %3633 = vmatpush1.bf16.msra.mxu0 %v6041_v55  ;;  %v6122_v34 = vld [vmem:[%s7446_s7 + $0x5b0] ss:$48 sps:$4 sm:$0xff]   ;;  %v6125_v55 = vld [vmem:[%s7446_s7 + $0x5b8] ss:$48 sps:$4 sm:$0xff]  }
 0xabf   : > { %3591 = vmatprep.subr.bf16.mxu1 %v6046_v58  ;;  %3634 = vmatprep.subr.bf16.mxu0 %v6049_v60  ;;  %v6130_v58 = vld [vmem:[%s7446_s7 + $0x24] ss:$48 sps:$4 sm:$0xff]   ;;  %v6133_v60 = vld [vmem:[%s7446_s7 + $0x2c] ss:$48 sps:$4 sm:$0xff]  }
 0xac2   : > { %3592 = vmatpush1.bf16.msra.mxu1 %v6044_v61  ;;  %3635 = vmatpush1.bf16.msra.mxu0 %v6047_v14  ;;  %v6128_v61 = vld [vmem:[%s7446_s7 + $0x20] ss:$48 sps:$4 sm:$0xff]   ;;  %v6131_v14 = vld [vmem:[%s7446_s7 + $0x28] ss:$48 sps:$4 sm:$0xff]  }
 0xac3   : > { %3593 = vmatprep.subr.bf16.mxu1 %v6052_v0  ;;  %3636 = vmatprep.subr.bf16.mxu0 %v6055_v13  ;;  %v6136_v0 = vld [vmem:[%s7446_s7 + $0x84] ss:$48 sps:$4 sm:$0xff]   ;;  %v6139_v13 = vld [vmem:[%s7446_s7 + $0x8c] ss:$48 sps:$4 sm:$0xff]  }
 0xac6   : > { %3594 = vmatpush1.bf16.msra.mxu1 %v6050_v1  ;;  %3637 = vmatpush1.bf16.msra.mxu0 %v6053_v2  ;;  %v6134_v1 = vld [vmem:[%s7446_s7 + $0x80] ss:$48 sps:$4 sm:$0xff]   ;;  %v6137_v2 = vld [vmem:[%s7446_s7 + $0x88] ss:$48 sps:$4 sm:$0xff]  }
 0xac7   : > { %3595 = vmatprep.subr.bf16.mxu1 %v6058_v20  ;;  %3638 = vmatprep.subr.bf16.mxu0 %v6061_v7  ;;  %v6142_v20 = vld [vmem:[%s7446_s7 + $0xe4] ss:$48 sps:$4 sm:$0xff]   ;;  %v6145_v7 = vld [vmem:[%s7446_s7 + $0xec] ss:$48 sps:$4 sm:$0xff]  }
 0xaca   : > { %3596 = vmatpush1.bf16.msra.mxu1 %v6056_v8  ;;  %3639 = vmatpush1.bf16.msra.mxu0 %v6059_v5  ;;  %v6140_v8 = vld [vmem:[%s7446_s7 + $0xe0] ss:$48 sps:$4 sm:$0xff]   ;;  %v6143_v5 = vld [vmem:[%s7446_s7 + $0xe8] ss:$48 sps:$4 sm:$0xff]  }
 0xacb   : > { %3597 = vmatprep.subr.bf16.mxu1 %v6064_v29  ;;  %3640 = vmatprep.subr.bf16.mxu0 %v6067_v10  ;;  %v6148_v29 = vld [vmem:[%s7446_s7 + $0x144] ss:$48 sps:$4 sm:$0xff]   ;;  %v6151_v10 = vld [vmem:[%s7446_s7 + $0x14c] ss:$48 sps:$4 sm:$0xff]  }
 0xace   : > { %3598 = vmatpush1.bf16.msra.mxu1 %v6062_v6  ;;  %3641 = vmatpush1.bf16.msra.mxu0 %v6065_v3  ;;  %v6149_v6 = vld [vmem:[%s7446_s7 + $0x148] ss:$48 sps:$4 sm:$0xff]   ;;  %v6154_v3 = vld [vmem:[%s7446_s7 + $0x1a4] ss:$48 sps:$4 sm:$0xff]  }
 0xacf   : > { %3599 = vmatprep.subr.bf16.mxu1 %v6070_v63  ;;  %3642 = vmatprep.subr.bf16.mxu0 %v6073_v47  ;;  %v6157_v63 = vld [vmem:[%s7446_s7 + $0x1ac] ss:$48 sps:$4 sm:$0xff]   ;;  %v6152_v47 = vld [vmem:[%s7446_s7 + $0x1a0] ss:$48 sps:$4 sm:$0xff]  }
 0xad2   : > { %3600 = vmatpush1.bf16.msra.mxu1 %v6068_v48  ;;  %3643 = vmatpush1.bf16.msra.mxu0 %v6071_v9  ;;  %v6155_v48 = vld [vmem:[%s7446_s7 + $0x1a8] ss:$48 sps:$4 sm:$0xff]   ;;  %v6160_v9 = vld [vmem:[%s7446_s7 + $0x204] ss:$48 sps:$4 sm:$0xff]  }
 0xad3   : > { %3601 = vmatprep.subr.bf16.mxu1 %v6076_v12  ;;  %3644 = vmatprep.subr.bf16.mxu0 %v6079_v15  ;;  %v6163_v12 = vld [vmem:[%s7446_s7 + $0x20c] ss:$48 sps:$4 sm:$0xff]   ;;  %v6158_v15 = vld [vmem:[%s7446_s7 + $0x200] ss:$48 sps:$4 sm:$0xff]  }
 0xad6   : > { %3602 = vmatpush1.bf16.msra.mxu1 %v6074_v16  ;;  %3645 = vmatpush1.bf16.msra.mxu0 %v6077_v19  ;;  %v6161_v16 = vld [vmem:[%s7446_s7 + $0x208] ss:$48 sps:$4 sm:$0xff]   ;;  %v6166_v19 = vld [vmem:[%s7446_s7 + $0x264] ss:$48 sps:$4 sm:$0xff]  }
 0xad7   : > { %3603 = vmatprep.subr.bf16.mxu1 %v6082_v21  ;;  %3646 = vmatprep.subr.bf16.mxu0 %v6085_v22  ;;  %v6169_v21 = vld [vmem:[%s7446_s7 + $0x26c] ss:$48 sps:$4 sm:$0xff]   ;;  %v6164_v22 = vld [vmem:[%s7446_s7 + $0x260] ss:$48 sps:$4 sm:$0xff]  }
 0xada   : > { %3604 = vmatpush1.bf16.msra.mxu1 %v6080_v23  ;;  %3647 = vmatpush1.bf16.msra.mxu0 %v6083_v24  ;;  %v6167_v23 = vld [vmem:[%s7446_s7 + $0x268] ss:$48 sps:$4 sm:$0xff]   ;;  %v6172_v24 = vld [vmem:[%s7446_s7 + $0x2c4] ss:$48 sps:$4 sm:$0xff]  }
 0xadb   : > { %3605 = vmatprep.subr.bf16.mxu1 %v6088_v25  ;;  %3648 = vmatprep.subr.bf16.mxu0 %v6091_v26  ;;  %v6175_v25 = vld [vmem:[%s7446_s7 + $0x2cc] ss:$48 sps:$4 sm:$0xff]   ;;  %v6170_v26 = vld [vmem:[%s7446_s7 + $0x2c0] ss:$48 sps:$4 sm:$0xff]  }
 0xade   : > { %3606 = vmatpush1.bf16.msra.mxu1 %v6086_v27  ;;  %3649 = vmatpush1.bf16.msra.mxu0 %v6089_v28  ;;  %v6173_v27 = vld [vmem:[%s7446_s7 + $0x2c8] ss:$48 sps:$4 sm:$0xff]   ;;  %v6178_v28 = vld [vmem:[%s7446_s7 + $0x324] ss:$48 sps:$4 sm:$0xff]  }
 0xadf   : > { %3607 = vmatprep.subr.bf16.mxu1 %v6094_v30  ;;  %3650 = vmatprep.subr.bf16.mxu0 %v6097_v31  ;;  %v6181_v30 = vld [vmem:[%s7446_s7 + $0x32c] ss:$48 sps:$4 sm:$0xff]   ;;  %v6176_v31 = vld [vmem:[%s7446_s7 + $0x320] ss:$48 sps:$4 sm:$0xff]  }
 0xae2   : > { %3608 = vmatpush1.bf16.msra.mxu1 %v6092_v32  ;;  %3651 = vmatpush1.bf16.msra.mxu0 %v6095_v52  ;;  %v6179_v32 = vld [vmem:[%s7446_s7 + $0x328] ss:$48 sps:$4 sm:$0xff]   ;;  %v6184_v52 = vld [vmem:[%s7446_s7 + $0x384] ss:$48 sps:$4 sm:$0xff]  }
 0xae3   : > { %3609 = vmatprep.subr.bf16.mxu1 %v6100_v33  ;;  %3652 = vmatprep.subr.bf16.mxu0 %v6103_v35  ;;  %v6187_v33 = vld [vmem:[%s7446_s7 + $0x38c] ss:$48 sps:$4 sm:$0xff]   ;;  %v6182_v35 = vld [vmem:[%s7446_s7 + $0x380] ss:$48 sps:$4 sm:$0xff]  }
 0xae6   : > { %3610 = vmatpush1.bf16.msra.mxu1 %v6098_v38  ;;  %3653 = vmatpush1.bf16.msra.mxu0 %v6101_v39  ;;  %v6185_v38 = vld [vmem:[%s7446_s7 + $0x388] ss:$48 sps:$4 sm:$0xff]   ;;  %v6190_v39 = vld [vmem:[%s7446_s7 + $0x3e4] ss:$48 sps:$4 sm:$0xff]  }
 0xae7   : > { %3611 = vmatprep.subr.bf16.mxu1 %v6106_v40  ;;  %3654 = vmatprep.subr.bf16.mxu0 %v6109_v41  ;;  %v6193_v40 = vld [vmem:[%s7446_s7 + $0x3ec] ss:$48 sps:$4 sm:$0xff]   ;;  %v6188_v41 = vld [vmem:[%s7446_s7 + $0x3e0] ss:$48 sps:$4 sm:$0xff]  }
 0xaea   : > { %3612 = vmatpush1.bf16.msra.mxu1 %v6104_v42  ;;  %3655 = vmatpush1.bf16.msra.mxu0 %v6107_v18  ;;  %v6191_v42 = vld [vmem:[%s7446_s7 + $0x3e8] ss:$48 sps:$4 sm:$0xff]   ;;  %v6196_v18 = vld [vmem:[%s7446_s7 + $0x444] ss:$48 sps:$4 sm:$0xff]  }
 0xaeb   : > { %3613 = vmatprep.subr.bf16.mxu1 %v6112_v43  ;;  %3656 = vmatprep.subr.bf16.mxu0 %v6115_v36  ;;  %v6199_v43 = vld [vmem:[%s7446_s7 + $0x44c] ss:$48 sps:$4 sm:$0xff]   ;;  %v6194_v36 = vld [vmem:[%s7446_s7 + $0x440] ss:$48 sps:$4 sm:$0xff]  }
 0xaee   : > { %3614 = vmatpush1.bf16.msra.mxu1 %v6110_v37  ;;  %3657 = vmatpush1.bf16.msra.mxu0 %v6113_v4  ;;  %v6197_v37 = vld [vmem:[%s7446_s7 + $0x448] ss:$48 sps:$4 sm:$0xff]   ;;  %v6202_v4 = vld [vmem:[%s7446_s7 + $0x4a4] ss:$48 sps:$4 sm:$0xff]  }
 0xaef   : > { %3615 = vmatprep.subr.bf16.mxu1 %v6118_v45  ;;  %3658 = vmatprep.subr.bf16.mxu0 %v6121_v11  ;;  %v6205_v45 = vld [vmem:[%s7446_s7 + $0x4ac] ss:$48 sps:$4 sm:$0xff]   ;;  %v6200_v11 = vld [vmem:[%s7446_s7 + $0x4a0] ss:$48 sps:$4 sm:$0xff]  }
 0xaf2   : > { %3616 = vmatpush1.bf16.msra.mxu1 %v6116_v46  ;;  %3659 = vmatpush1.bf16.msra.mxu0 %v6119_v49  ;;  %v6203_v46 = vld [vmem:[%s7446_s7 + $0x4a8] ss:$48 sps:$4 sm:$0xff]   ;;  %v6208_v49 = vld [vmem:[%s7446_s7 + $0x504] ss:$48 sps:$4 sm:$0xff]  }
 0xaf3   : > { %3617 = vmatprep.subr.bf16.mxu1 %v6124_v50  ;;  %3660 = vmatprep.subr.bf16.mxu0 %v6127_v53  ;;  %v6211_v50 = vld [vmem:[%s7446_s7 + $0x50c] ss:$48 sps:$4 sm:$0xff]   ;;  %v6206_v53 = vld [vmem:[%s7446_s7 + $0x500] ss:$48 sps:$4 sm:$0xff]  }
 0xaf6   : > { %3618 = vmatpush1.bf16.msra.mxu1 %v6122_v34  ;;  %3661 = vmatpush1.bf16.msra.mxu0 %v6125_v55  ;;  %v6209_v34 = vld [vmem:[%s7446_s7 + $0x508] ss:$48 sps:$4 sm:$0xff]   ;;  %v6214_v55 = vld [vmem:[%s7446_s7 + $0x564] ss:$48 sps:$4 sm:$0xff]  }
 0xaf7   : > { %3673 = vmatprep.subr.bf16.mxu1 %v6130_v58  ;;  %3716 = vmatprep.subr.bf16.mxu0 %v6133_v60  ;;  %v6217_v58 = vld [vmem:[%s7446_s7 + $0x56c] ss:$48 sps:$4 sm:$0xff]   ;;  %v6212_v60 = vld [vmem:[%s7446_s7 + $0x560] ss:$48 sps:$4 sm:$0xff]  }
 0xaf9   : > { %3620 = vmatmul.mubr.bf16.vlgmr.msra.gmra.mrb[36].mxu1 %v7877_v44  ;;  %3663 = vmatmul.mubr.bf16.vlgmr.msra.gmra.mrb[20].mxu0 %v7877_v44 }
 0xafa   : > { %3674 = vmatpush1.bf16.msra.mxu1 %v6128_v61  ;;  %3705 = vmatprep.mubr.bf16.mxu1 %v7879_v17  ;;  %v6215_v61 = vld [vmem:[%s7446_s7 + $0x568] ss:$48 sps:$4 sm:$0xff]  }
 0xafb   : > { %3717 = vmatpush1.bf16.msra.mxu0 %v6131_v14  ;;  %3748 = vmatprep.mubr.bf16.mxu0 %v7879_v17  ;;  %v6146_v17 = vld [vmem:[%s7446_s7 + $0x140] ss:$48 sps:$4 sm:$0xff]   ;;  %v6220_v14 = vld [vmem:[%s7446_s7 + $0x5c4] ss:$48 sps:$4 sm:$0xff]  }
 0xafc   : > { %3675 = vmatprep.subr.bf16.mxu1 %v6136_v0  ;;  %3718 = vmatprep.subr.bf16.mxu0 %v6139_v13  ;;  %v6223_v0 = vld [vmem:[%s7446_s7 + $0x5cc] ss:$48 sps:$4 sm:$0xff]   ;;  %v6218_v13 = vld [vmem:[%s7446_s7 + $0x5c0] ss:$48 sps:$4 sm:$0xff]  }
 0xafe   : > { %3676 = vmatpush1.bf16.msra.mxu1 %v6134_v1  ;;  %v6221_v1 = vld [vmem:[%s7446_s7 + $0x5c8] ss:$48 sps:$4 sm:$0xff]  }
 0xaff   : > { %3719 = vmatpush1.bf16.msra.mxu0 %v6137_v2  ;;  %3677 = vmatprep.subr.bf16.mxu1 %v6142_v20  ;;  %v6226_v2 = vld [vmem:[%s7448_s23 + $0x4] ss:$8 sps:$4 sm:$0xff]   ;;  %v6224_v20 = vld [vmem:[%s7448_s23] ss:$8 sps:$4 sm:$0xff]  }
 0xb00   : > { %3720 = vmatprep.subr.bf16.mxu0 %v6145_v7  ;;  %v6229_v7 = vld [vmem:[%s7448_s23 + $0x14] ss:$8 sps:$4 sm:$0xff]  }
 0xb02   : > { %3678 = vmatpush1.bf16.msra.mxu1 %v6140_v8  ;;  %v6227_v8 = vld [vmem:[%s7448_s23 + $0x10] ss:$8 sps:$4 sm:$0xff]  }
 0xb03   : > { %3721 = vmatpush1.bf16.msra.mxu0 %v6143_v5  ;;  %3679 = vmatprep.subr.bf16.mxu1 %v6148_v29  ;;  %v6232_v5 = vld [vmem:[%s7448_s23 + $0x24] ss:$8 sps:$4 sm:$0xff]   ;;  %v6230_v29 = vld [vmem:[%s7448_s23 + $0x20] ss:$8 sps:$4 sm:$0xff]  }
 0xb04   : > { %3722 = vmatprep.subr.bf16.mxu0 %v6151_v10  ;;  %v6235_v10 = vld [vmem:[%s7448_s23 + $0x34] ss:$8 sps:$4 sm:$0xff]  }
 0xb06   : > { %3680 = vmatpush1.bf16.msra.mxu1 %v6146_v17  ;;  %v6233_v17 = vld [vmem:[%s7448_s23 + $0x30] ss:$8 sps:$4 sm:$0xff]  }
 0xb07   : > { %3723 = vmatpush1.bf16.msra.mxu0 %v6149_v6  ;;  %3681 = vmatprep.subr.bf16.mxu1 %v6154_v3  ;;  %v6238_v6 = vld [vmem:[%s7448_s23 + $0x44] ss:$8 sps:$4 sm:$0xff]   ;;  %v6241_v3 = vld [vmem:[%s7448_s23 + $0x54] ss:$8 sps:$4 sm:$0xff]  }
 0xb08   : > { %3724 = vmatprep.subr.bf16.mxu0 %v6157_v63  ;;  %v6239_v63 = vld [vmem:[%s7448_s23 + $0x50] ss:$8 sps:$4 sm:$0xff]  }
 0xb0a   : > { %3682 = vmatpush1.bf16.msra.mxu1 %v6152_v47  ;;  %v6244_v47 = vld [vmem:[%s7448_s23 + $0x64] ss:$8 sps:$4 sm:$0xff]  }
 0xb0b   : > { %3725 = vmatpush1.bf16.msra.mxu0 %v6155_v48  ;;  %3683 = vmatprep.subr.bf16.mxu1 %v6160_v9  ;;  %v6242_v48 = vld [vmem:[%s7448_s23 + $0x60] ss:$8 sps:$4 sm:$0xff]   ;;  %v6247_v9 = vld [vmem:[%s7448_s23 + $0x74] ss:$8 sps:$4 sm:$0xff]  }
 0xb0c   : > { %3726 = vmatprep.subr.bf16.mxu0 %v6163_v12  ;;  %v6245_v12 = vld [vmem:[%s7448_s23 + $0x70] ss:$8 sps:$4 sm:$0xff]  }
 0xb0e   : > { %3684 = vmatpush1.bf16.msra.mxu1 %v6158_v15  ;;  %v6250_v15 = vld [vmem:[%s7448_s23 + $0x84] ss:$8 sps:$4 sm:$0xff]  }
 0xb0f   : > { %3727 = vmatpush1.bf16.msra.mxu0 %v6161_v16  ;;  %3685 = vmatprep.subr.bf16.mxu1 %v6166_v19  ;;  %v6248_v16 = vld [vmem:[%s7448_s23 + $0x80] ss:$8 sps:$4 sm:$0xff]   ;;  %v6253_v19 = vld [vmem:[%s7448_s23 + $0x94] ss:$8 sps:$4 sm:$0xff]  }
 0xb10   : > { %3728 = vmatprep.subr.bf16.mxu0 %v6169_v21  ;;  %v6251_v21 = vld [vmem:[%s7448_s23 + $0x90] ss:$8 sps:$4 sm:$0xff]  }
 0xb12   : > { %3686 = vmatpush1.bf16.msra.mxu1 %v6164_v22  ;;  %v6256_v22 = vld [vmem:[%s7448_s23 + $0xa4] ss:$8 sps:$4 sm:$0xff]  }
 0xb13   : > { %3729 = vmatpush1.bf16.msra.mxu0 %v6167_v23  ;;  %3687 = vmatprep.subr.bf16.mxu1 %v6172_v24  ;;  %v6254_v23 = vld [vmem:[%s7448_s23 + $0xa0] ss:$8 sps:$4 sm:$0xff]   ;;  %v6259_v24 = vld [vmem:[%s7448_s23 + $0xb4] ss:$8 sps:$4 sm:$0xff]  }
 0xb14   : > { %3730 = vmatprep.subr.bf16.mxu0 %v6175_v25  ;;  %v6257_v25 = vld [vmem:[%s7448_s23 + $0xb0] ss:$8 sps:$4 sm:$0xff]  }
 0xb16   : > { %3688 = vmatpush1.bf16.msra.mxu1 %v6170_v26  ;;  %v6262_v26 = vld [vmem:[%s7448_s23 + $0xc4] ss:$8 sps:$4 sm:$0xff]  }
 0xb17   : > { %3731 = vmatpush1.bf16.msra.mxu0 %v6173_v27  ;;  %3689 = vmatprep.subr.bf16.mxu1 %v6178_v28  ;;  %v6260_v27 = vld [vmem:[%s7448_s23 + $0xc0] ss:$8 sps:$4 sm:$0xff]   ;;  %v6265_v28 = vld [vmem:[%s7448_s23 + $0xd4] ss:$8 sps:$4 sm:$0xff]  }
 0xb18   : > { %3732 = vmatprep.subr.bf16.mxu0 %v6181_v30  ;;  %v6263_v30 = vld [vmem:[%s7448_s23 + $0xd0] ss:$8 sps:$4 sm:$0xff]  }
 0xb1a   : > { %3690 = vmatpush1.bf16.msra.mxu1 %v6176_v31  ;;  %v6268_v31 = vld [vmem:[%s7448_s23 + $0xe4] ss:$8 sps:$4 sm:$0xff]  }
 0xb1b   : > { %3733 = vmatpush1.bf16.msra.mxu0 %v6179_v32  ;;  %3691 = vmatprep.subr.bf16.mxu1 %v6184_v52  ;;  %v6266_v32 = vld [vmem:[%s7448_s23 + $0xe0] ss:$8 sps:$4 sm:$0xff]   ;;  %v6271_v52 = vld [vmem:[%s7448_s23 + $0xf4] ss:$8 sps:$4 sm:$0xff]  }
 0xb1c   : > { %3734 = vmatprep.subr.bf16.mxu0 %v6187_v33  ;;  %v6269_v33 = vld [vmem:[%s7448_s23 + $0xf0] ss:$8 sps:$4 sm:$0xff]  }
 0xb1e   : > { %3692 = vmatpush1.bf16.msra.mxu1 %v6182_v35  ;;  %v6274_v35 = vld [vmem:[%s7448_s23 + $0x104] ss:$8 sps:$4 sm:$0xff]  }
 0xb1f   : > { %3735 = vmatpush1.bf16.msra.mxu0 %v6185_v38  ;;  %3693 = vmatprep.subr.bf16.mxu1 %v6190_v39 }
 0xb20   : > { %3736 = vmatprep.subr.bf16.mxu0 %v6193_v40 }
 0xb22   : > { %3694 = vmatpush1.bf16.msra.mxu1 %v6188_v41 }
 0xb23   : > { %3737 = vmatpush1.bf16.msra.mxu0 %v6191_v42  ;;  %3695 = vmatprep.subr.bf16.mxu1 %v6196_v18 }
 0xb24   : > { %3738 = vmatprep.subr.bf16.mxu0 %v6199_v43 }
 0xb26   : > { %3696 = vmatpush1.bf16.msra.mxu1 %v6194_v36 }
 0xb27   : > { %3739 = vmatpush1.bf16.msra.mxu0 %v6197_v37  ;;  %3697 = vmatprep.subr.bf16.mxu1 %v6202_v4 }
 0xb28   : > { %3740 = vmatprep.subr.bf16.mxu0 %v6205_v45 }
 0xb2a   : > { %3698 = vmatpush1.bf16.msra.mxu1 %v6200_v11 }
 0xb2b   : > { %3741 = vmatpush1.bf16.msra.mxu0 %v6203_v46  ;;  %3699 = vmatprep.subr.bf16.mxu1 %v6208_v49 }
 0xb2c   : > { %3742 = vmatprep.subr.bf16.mxu0 %v6211_v50 }
 0xb2e   : > { %3700 = vmatpush1.bf16.msra.mxu1 %v6206_v53 }
 0xb2f   : > { %3743 = vmatpush1.bf16.msra.mxu0 %v6209_v34  ;;  %3701 = vmatprep.subr.bf16.mxu1 %v6214_v55 }
 0xb30   : > { %3744 = vmatprep.subr.bf16.mxu0 %v6217_v58 }
 0xb32   : > { %3702 = vmatpush1.bf16.msra.mxu1 %v6212_v60 }
 0xb33   : > { %3745 = vmatpush1.bf16.msra.mxu0 %v6215_v61  ;;  %3703 = vmatprep.subr.bf16.mxu1 %v6220_v14 }
 0xb34   : > { %3746 = vmatprep.subr.bf16.mxu0 %v6223_v0 }
 0xb36   : > { %3704 = vmatpush1.bf16.msra.mxu1 %v6218_v13 }
 0xb37   : > { %3747 = vmatpush1.bf16.msra.mxu0 %v6221_v1  ;;  %4437 = vmatprep.subr.bf16.mxu1 %v6226_v2 }
 0xb39   : > { %3706 = vmatmul.mubr.bf16.vlgmr.msra.gmra.mrb[40].mxu1 %v7877_v44 }
 0xb3a   : > { %3749 = vmatmul.mubr.bf16.vlgmr.msra.gmra.mrb[24].mxu0 %v7877_v44  ;;  %4438 = vmatpush1.bf16.msra.mxu1 %v6224_v20  ;;  %v6236_v44 = vld [vmem:[%s7448_s23 + $0x40] ss:$8 sps:$4 sm:$0xff]  }
 0xb3b   : > { %4439 = vmatprep.subr.bf16.mxu1 %v6229_v7 }
 0xb3e   : > { %4440 = vmatpush1.bf16.msra.mxu1 %v6227_v8 }
 0xb3f   : > { %4441 = vmatprep.subr.bf16.mxu1 %v6232_v5 }
 0xb42   : > { %4442 = vmatpush1.bf16.msra.mxu1 %v6230_v29 }
 0xb43   : > { %4443 = vmatprep.subr.bf16.mxu1 %v6235_v10 }
 0xb46   : > { %4444 = vmatpush1.bf16.msra.mxu1 %v6233_v17 }
 0xb47   : > { %4445 = vmatprep.subr.bf16.mxu1 %v6238_v6 }
 0xb4a   : > { %4446 = vmatpush1.bf16.msra.mxu1 %v6236_v44 }
 0xb4b   : > { %4447 = vmatprep.subr.bf16.mxu1 %v6241_v3 }
 0xb4e   : > { %4448 = vmatpush1.bf16.msra.mxu1 %v6239_v63 }
 0xb4f   : > { %4449 = vmatprep.subr.bf16.mxu1 %v6244_v47 }
 0xb52   : > { %4450 = vmatpush1.bf16.msra.mxu1 %v6242_v48 }
 0xb53   : > { %4451 = vmatprep.subr.bf16.mxu1 %v6247_v9 }
 0xb56   : > { %4452 = vmatpush1.bf16.msra.mxu1 %v6245_v12 }
 0xb57   : > { %4453 = vmatprep.subr.bf16.mxu1 %v6250_v15 }
 0xb5a   : > { %4454 = vmatpush1.bf16.msra.mxu1 %v6248_v16  ;;  %v6272_v16 = vld [vmem:[%s7448_s23 + $0x100] ss:$8 sps:$4 sm:$0xff]  }
 0xb5b   : > { %4455 = vmatprep.subr.bf16.mxu1 %v6253_v19  ;;  %v6277_v19 = vld [vmem:[%s7448_s23 + $0x114] ss:$8 sps:$4 sm:$0xff]  }
 0xb5e   : > { %4456 = vmatpush1.bf16.msra.mxu1 %v6251_v21  ;;  %v6275_v21 = vld [vmem:[%s7448_s23 + $0x110] ss:$8 sps:$4 sm:$0xff]  }
 0xb5f   : > { %4457 = vmatprep.subr.bf16.mxu1 %v6256_v22  ;;  %v6280_v22 = vld [vmem:[%s7448_s23 + $0x124] ss:$8 sps:$4 sm:$0xff]  }
 0xb62   : > { %4458 = vmatpush1.bf16.msra.mxu1 %v6254_v23  ;;  %v6278_v23 = vld [vmem:[%s7448_s23 + $0x120] ss:$8 sps:$4 sm:$0xff]  }
 0xb63   : > { %4459 = vmatprep.subr.bf16.mxu1 %v6259_v24  ;;  %v6283_v24 = vld [vmem:[%s7448_s23 + $0x134] ss:$8 sps:$4 sm:$0xff]  }
 0xb66   : > { %4460 = vmatpush1.bf16.msra.mxu1 %v6257_v25  ;;  %v6281_v25 = vld [vmem:[%s7448_s23 + $0x130] ss:$8 sps:$4 sm:$0xff]  }
 0xb67   : > { %4461 = vmatprep.subr.bf16.mxu1 %v6262_v26  ;;  %v6286_v26 = vld [vmem:[%s7448_s23 + $0x144] ss:$8 sps:$4 sm:$0xff]  }
 0xb6a   : > { %4462 = vmatpush1.bf16.msra.mxu1 %v6260_v27  ;;  %v6284_v27 = vld [vmem:[%s7448_s23 + $0x140] ss:$8 sps:$4 sm:$0xff]  }
 0xb6b   : > { %4463 = vmatprep.subr.bf16.mxu1 %v6265_v28  ;;  %v6289_v28 = vld [vmem:[%s7448_s23 + $0x154] ss:$8 sps:$4 sm:$0xff]  }
 0xb6e   : > { %4464 = vmatpush1.bf16.msra.mxu1 %v6263_v30 }
 0xb6f   : > { %4465 = vmatprep.subr.bf16.mxu1 %v6268_v31  ;;  %v6287_v31 = vld [vmem:[%s7448_s23 + $0x150] ss:$8 sps:$4 sm:$0xff]  }
 0xb72   : > { %4466 = vmatpush1.bf16.msra.mxu1 %v6266_v32 }
 0xb73   : > { %4467 = vmatprep.subr.bf16.mxu1 %v6271_v52  ;;  %v6292_v52 = vld [vmem:[%s7448_s23 + $0x164] ss:$8 sps:$4 sm:$0xff]  }
 0xb76   : > { %4468 = vmatpush1.bf16.msra.mxu1 %v6269_v33 }
 0xb77   : > { %4480 = vmatprep.subr.bf16.mxu1 %v6274_v35 }
 0xb8c   : > { %v3535_v38 = vpop.f32.mrb[32].mxu1  ;;  %v8052_v39 = vpop.f32.mrb[16].mxu0 }
 0xb8d   : > { %v3537_v40 = vpop.f32.mrb[33].mxu1  ;;  %v8054_v41 = vpop.f32.mrb[17].mxu0  ;;  %v5357_v37 = vmul.f32 -1.442695, %v3535_v38  ;;  %v5359_v30 = vmul.f32 -1.442695, %v8052_v39 }
 0xb8e   : > { %v3539_v42 = vpop.f32.mrb[34].mxu1  ;;  %v8056_v18 = vpop.f32.mrb[18].mxu0  ;;  %v5358_v4 = vmul.f32 -1.442695, %v3537_v40  ;;  %v5360_v32 = vmul.f32 -1.442695, %v8054_v41 }
 0xb8f   : > { %v3541_v43 = vpop.f32.mrb[35].mxu1  ;;  %v8058_v36 = vpop.f32.mrb[19].mxu0  ;;  %v5363_v45 = vmul.f32 -1.442695, %v3539_v42  ;;  %6392 = vpow2.f32 %v5357_v37  ;;  %v5365_v33 = vmul.f32 -1.442695, %v8056_v18 }
 0xb90   : > { %v5364_v11 = vmul.f32 -1.442695, %v3541_v43  ;;  %6394 = vpow2.f32 %v5358_v4  ;;  %v5366_v35 = vmul.f32 -1.442695, %v8058_v36 }
 0xb91   : > { %6396 = vpow2.f32 %v5363_v45  ;;  %v6293_v45 = vld [vmem:[%s7448_s23 + $0x170] ss:$8 sps:$4 sm:$0xff]  }
 0xb92   : > { %6398 = vpow2.f32 %v5364_v11  ;;  %v6298_v11 = vld [vmem:[%s7448_s23 + $0x184] ss:$8 sps:$4 sm:$0xff]  }
 0xb99   : > { %v6393_v46 = vpop.eup %6392 }
 0xb9a   : > { %v6395_v49 = vpop.eup %6394  ;;  %v3795_v34 = vadd.f32 1.0, %v6393_v46  ;;  %v6296_v46 = vld [vmem:[%s7448_s23 + $0x180] ss:$8 sps:$4 sm:$0xff]  }
 0xb9b   : > { %v6397_v50 = vpop.eup %6396  ;;  %v3796_v55 = vadd.f32 1.0, %v6395_v49  ;;  %v6301_v49 = vld [vmem:[%s7448_s23 + $0x194] ss:$8 sps:$4 sm:$0xff]  }
 0xb9c   : > { %v6399_v53 = vpop.eup %6398  ;;  %v3801_v58 = vadd.f32 1.0, %v6397_v50  ;;  %6400 = vrcp.f32 %v3795_v34 }
 0xb9d   : > { %v3802_v60 = vadd.f32 1.0, %v6399_v53  ;;  %6402 = vrcp.f32 %v3796_v55  ;;  %v6299_v55 = vld [vmem:[%s7448_s23 + $0x190] ss:$8 sps:$4 sm:$0xff]  }
 0xb9e   : > { %6404 = vrcp.f32 %v3801_v58 }
 0xb9f   : > { %6406 = vrcp.f32 %v3802_v60 }
 0xba0   : > { %6408 = vpow2.f32 %v5359_v30 }
 0xba1   : > { %6410 = vpow2.f32 %v5360_v32 }
 0xba2   : > { %6412 = vpow2.f32 %v5365_v33 }
 0xba3   : > { %6414 = vpow2.f32 %v5366_v35 }
 0xba6   : > { %v6401_v61 = vpop.eup %6400 }
 0xba7   : > { %v6403_v14 = vpop.eup %6402  ;;  %v3831_v1 = vmul.f32 %v6401_v61, %v3535_v38  ;;  %v6304_v61 = vld [vmem:[%s7448_s23 + $0x1a4] ss:$8 sps:$4 sm:$0xff]  }
 0xba8   : > { %v6405_v0 = vpop.eup %6404  ;;  %v3832_v2 = vmul.f32 %v6403_v14, %v3537_v40  ;;  %v6290_v40 = vld [vmem:[%s7448_s23 + $0x160] ss:$8 sps:$4 sm:$0xff]  }
 0xba9   : > { %v6407_v13 = vpop.eup %6406  ;;  %v3837_v8 = vmul.f32 %v6405_v0, %v3539_v42 }
 0xbaa   : > { %v3838_v17 = vmul.f32 %v6407_v13, %v3541_v43  ;;  %v6295_v43 = vld [vmem:[%s7448_s23 + $0x174] ss:$8 sps:$4 sm:$0xff]   ;;  %v6409_v50 = vpop.eup %6408 }
 0xbab   : > { %v6411_v53 = vpop.eup %6410  ;;  %v3797_v60 = vadd.f32 1.0, %v6409_v50 }
 0xbac   : > { %v6413_v34 = vpop.eup %6412  ;;  %v3798_v0 = vadd.f32 1.0, %v6411_v53 }
 0xbad   : > { %v6415_v58 = vpop.eup %6414 }
 0xbcc   : > { %v8060_v20 = vpop.f32.mrb[36].mxu1  ;;  %v3664_v7 = vpop.f32.mrb[20].mxu0 }
 0xbcd   : > { %v3843_v5 = vmul.f32 %v3831_v1, %v3664_v7  ;;  %v8062_v29 = vpop.f32.mrb[37].mxu1  ;;  %v3666_v10 = vpop.f32.mrb[21].mxu0  ;;  %v5361_v38 = vmul.f32 -1.442695, %v8060_v20  ;;  %v3803_v1 = vadd.f32 1.0, %v6413_v34  ;;  %v3804_v7 = vadd.f32 1.0, %v6415_v58 }
 0xbce   : > { %v3844_v6 = vmul.f32 %v3832_v2, %v3666_v10  ;;  %v8064_v44 = vpop.f32.mrb[38].mxu1  ;;  %v3668_v3 = vpop.f32.mrb[22].mxu0  ;;  %v5362_v42 = vmul.f32 -1.442695, %v8062_v29  ;;  %v6322_v34 = vld [vmem:[%s7448_s23 + $0x204] ss:$8 sps:$4 sm:$0xff]  }
 0xbcf   : > { %v3849_v63 = vmul.f32 %v3837_v8, %v3668_v3  ;;  %v8066_v47 = vpop.f32.mrb[39].mxu1  ;;  %v3670_v48 = vpop.f32.mrb[23].mxu0  ;;  %v5367_v37 = vmul.f32 -1.442695, %v8064_v44  ;;  %6416 = vpow2.f32 %v5361_v38  ;;  %v6302_v8 = vld [vmem:[%s7448_s23 + $0x1a0] ss:$8 sps:$4 sm:$0xff]  }
 0xbd0   : > { %v3850_v9 = vmul.f32 %v3838_v17, %v3670_v48  ;;  %v5368_v4 = vmul.f32 -1.442695, %v8066_v47  ;;  %6418 = vpow2.f32 %v5362_v42  ;;  %v6307_v17 = vld [vmem:[%s7448_s23 + $0x1b4] ss:$8 sps:$4 sm:$0xff]   ;;  %v6305_v48 = vld [vmem:[%s7448_s23 + $0x1b0] ss:$8 sps:$4 sm:$0xff]  }
 0xbd1   : > { %v3855_v12 = vpack.c.bf16 %v3849_v63, %v3843_v5  ;;  %6420 = vpow2.f32 %v5367_v37 }
 0xbd2   : > { %v3856_v15 = vpack.c.bf16 %v3850_v9, %v3844_v6  ;;  %6422 = vpow2.f32 %v5368_v4  ;;  %v6310_v9 = vld [vmem:[%s7448_s23 + $0x1c4] ss:$8 sps:$4 sm:$0xff]  }
 0xbd3   : > { %6424 = vrcp.f32 %v3797_v60 }
 0xbd4   : > { %4469 = vmatprep.mubr.bf16.mxu1 %v3856_v15  ;;  %6426 = vrcp.f32 %v3798_v0  ;;  %v6313_v15 = vld [vmem:[%s7448_s23 + $0x1d4] ss:$8 sps:$4 sm:$0xff]  }
 0xbd5   : > { %4470 = vmatmul.mubr.bf16.vlgmr.msra.gmra.mrb[44].mxu1 %v3855_v12  ;;  %6428 = vrcp.f32 %v3803_v1  ;;  %v6308_v12 = vld [vmem:[%s7448_s23 + $0x1c0] ss:$8 sps:$4 sm:$0xff]   ;;  %v6323_v1 = vld [vmem:[%s7448_s23 + $0x210] ss:$8 sps:$4 sm:$0xff]  }
 0xbd6   : > { %4481 = vmatpush1.bf16.msra.mxu1 %v6272_v16  ;;  %6430 = vrcp.f32 %v3804_v7  ;;  %v6326_v7 = vld [vmem:[%s7448_s23 + $0x220] ss:$8 sps:$4 sm:$0xff]  }
 0xbd7   : > { %4482 = vmatprep.subr.bf16.mxu1 %v6277_v19 }
 0xbd9   : > { %v6417_v14 = vpop.eup %6416 }
 0xbda   : > { %4483 = vmatpush1.bf16.msra.mxu1 %v6275_v21  ;;  %v6419_v13 = vpop.eup %6418  ;;  %v3799_v10 = vadd.f32 1.0, %v6417_v14  ;;  %v6311_v21 = vld [vmem:[%s7448_s23 + $0x1d0] ss:$8 sps:$4 sm:$0xff]   ;;  %v6320_v14 = vld [vmem:[%s7448_s23 + $0x200] ss:$8 sps:$4 sm:$0xff]  }
 0xbdb   : > { %4484 = vmatprep.subr.bf16.mxu1 %v6280_v22  ;;  %v6421_v2 = vpop.eup %6420  ;;  %v3800_v6 = vadd.f32 1.0, %v6419_v13  ;;  %v6325_v13 = vld [vmem:[%s7448_s23 + $0x214] ss:$8 sps:$4 sm:$0xff]  }
 0xbdc   : > { %v6423_v5 = vpop.eup %6422  ;;  %v3805_v3 = vadd.f32 1.0, %v6421_v2  ;;  %6432 = vrcp.f32 %v3799_v10  ;;  %v6328_v2 = vld [vmem:[%s7448_s23 + $0x224] ss:$8 sps:$4 sm:$0xff]  }
 0xbdd   : > { %v3806_v63 = vadd.f32 1.0, %v6423_v5  ;;  %6434 = vrcp.f32 %v3800_v6  ;;  %v6425_v16 = vpop.eup %6424  ;;  %v6329_v5 = vld [vmem:[%s7448_s23 + $0x230] ss:$8 sps:$4 sm:$0xff]   ;;  %v6334_v10 = vld [vmem:[%s7448_s23 + $0x244] ss:$8 sps:$4 sm:$0xff]  }
 0xbde   : > { %4485 = vmatpush1.bf16.msra.mxu1 %v6278_v23  ;;  %6436 = vrcp.f32 %v3805_v3  ;;  %v6427_v19 = vpop.eup %6426  ;;  %v6316_v23 = vld [vmem:[%s7448_s23 + $0x1e4] ss:$8 sps:$4 sm:$0xff]   ;;  %v3833_v30 = vmul.f32 %v6425_v16, %v8052_v39  ;;  %v6337_v6 = vld [vmem:[%s7448_s23 + $0x254] ss:$8 sps:$4 sm:$0xff]   ;;  %v6335_v3 = vld [vmem:[%s7448_s23 + $0x250] ss:$8 sps:$4 sm:$0xff]  }
 0xbdf   : > { %4486 = vmatprep.subr.bf16.mxu1 %v6283_v24  ;;  %6438 = vrcp.f32 %v3806_v63  ;;  %v6429_v22 = vpop.eup %6428  ;;  %v6340_v63 = vld [vmem:[%s7448_s23 + $0x264] ss:$8 sps:$4 sm:$0xff]   ;;  %v6344_v16 = vld [vmem:[%s7448_s23 + $0x280] ss:$8 sps:$4 sm:$0xff]  }
 0xbe0   : > { %v6431_v24 = vpop.eup %6430  ;;  %v3839_v38 = vmul.f32 %v6429_v22, %v8056_v18  ;;  %v6352_v22 = vld [vmem:[%s7448_s23 + $0x2a4] ss:$8 sps:$4 sm:$0xff]  }
 0xbe1   : > { %v3840_v4 = vmul.f32 %v6431_v24, %v8058_v36  ;;  %v6355_v24 = vld [vmem:[%s7448_s23 + $0x2b4] ss:$8 sps:$4 sm:$0xff]  }
 0xbe2   : > { %4487 = vmatpush1.bf16.msra.mxu1 %v6281_v25 }
 0xbe3   : > { %4488 = vmatprep.subr.bf16.mxu1 %v6286_v26 }
 0xbe6   : > { %4489 = vmatpush1.bf16.msra.mxu1 %v6284_v27  ;;  %v6433_v25 = vpop.eup %6432  ;;  %v6314_v27 = vld [vmem:[%s7448_s23 + $0x1e0] ss:$8 sps:$4 sm:$0xff]  }
 0xbe7   : > { %4490 = vmatprep.subr.bf16.mxu1 %v6289_v28  ;;  %v6435_v26 = vpop.eup %6434  ;;  %v3835_v33 = vmul.f32 %v6433_v25, %v8060_v20  ;;  %v6317_v20 = vld [vmem:[%s7448_s23 + $0x1f0] ss:$8 sps:$4 sm:$0xff]  }
 0xbe8   : > { %v6437_v28 = vpop.eup %6436  ;;  %v6353_v25 = vld [vmem:[%s7448_s23 + $0x2b0] ss:$8 sps:$4 sm:$0xff]  }
 0xbe9   : > { %v6439_v32 = vpop.eup %6438  ;;  %v3841_v39 = vmul.f32 %v6437_v28, %v8064_v44  ;;  %v6361_v28 = vld [vmem:[%s7448_s23 + $0x2d4] ss:$8 sps:$4 sm:$0xff]  }
 0xbea   : > { %4491 = vmatpush1.bf16.msra.mxu1 %v6287_v31  ;;  %v6319_v31 = vld [vmem:[%s7448_s23 + $0x1f4] ss:$8 sps:$4 sm:$0xff]   ;;  %v3842_v18 = vmul.f32 %v6439_v32, %v8066_v47  ;;  %v6362_v32 = vld [vmem:[%s7448_s23 + $0x2e0] ss:$8 sps:$4 sm:$0xff]  }
 0xbeb   : > { %4492 = vmatprep.subr.bf16.mxu1 %v6292_v52  ;;  %v3834_v52 = vmul.f32 %v6427_v19, %v8054_v41  ;;  %v6349_v19 = vld [vmem:[%s7448_s23 + $0x294] ss:$8 sps:$4 sm:$0xff]  }
 0xbee   : > { %4493 = vmatpush1.bf16.msra.mxu1 %v6290_v40  ;;  %v3836_v40 = vmul.f32 %v6435_v26, %v8062_v29  ;;  %v6358_v26 = vld [vmem:[%s7448_s23 + $0x2c4] ss:$8 sps:$4 sm:$0xff]  }
 0xbef   : > { %4494 = vmatprep.subr.bf16.mxu1 %v6295_v43 }
 0xbf2   : > { %4495 = vmatpush1.bf16.msra.mxu1 %v6293_v45 }
 0xbf3   : > { %4496 = vmatprep.subr.bf16.mxu1 %v6298_v11 }
 0xbf6   : > { %4497 = vmatpush1.bf16.msra.mxu1 %v6296_v46 }
 0xbf7   : > { %4498 = vmatprep.subr.bf16.mxu1 %v6301_v49 }
 0xbfa   : > { %4499 = vmatpush1.bf16.msra.mxu1 %v6299_v55 }
 0xbfb   : > { %4500 = vmatprep.subr.bf16.mxu1 %v6304_v61 }
 0xbfe   : > { %4501 = vmatpush1.bf16.msra.mxu1 %v6302_v8  ;;  %v6331_v8 = vld [vmem:[%s7448_s23 + $0x234] ss:$8 sps:$4 sm:$0xff]  }
 0xbff   : > { %4502 = vmatprep.subr.bf16.mxu1 %v6307_v17  ;;  %v6332_v17 = vld [vmem:[%s7448_s23 + $0x240] ss:$8 sps:$4 sm:$0xff]  }
 0xc02   : > { %4503 = vmatpush1.bf16.msra.mxu1 %v6305_v48  ;;  %v6338_v48 = vld [vmem:[%s7448_s23 + $0x260] ss:$8 sps:$4 sm:$0xff]  }
 0xc03   : > { %4504 = vmatprep.subr.bf16.mxu1 %v6310_v9  ;;  %v6343_v9 = vld [vmem:[%s7448_s23 + $0x274] ss:$8 sps:$4 sm:$0xff]  }
 0xc06   : > { %4505 = vmatpush1.bf16.msra.mxu1 %v6308_v12  ;;  %v6341_v12 = vld [vmem:[%s7448_s23 + $0x270] ss:$8 sps:$4 sm:$0xff]  }
 0xc07   : > { %4506 = vmatprep.subr.bf16.mxu1 %v6313_v15  ;;  %v6346_v15 = vld [vmem:[%s7448_s23 + $0x284] ss:$8 sps:$4 sm:$0xff]  }
 0xc0a   : > { %4507 = vmatpush1.bf16.msra.mxu1 %v6311_v21  ;;  %v6347_v21 = vld [vmem:[%s7448_s23 + $0x290] ss:$8 sps:$4 sm:$0xff]  }
 0xc0b   : > { %4508 = vmatprep.subr.bf16.mxu1 %v6316_v23  ;;  %v6350_v23 = vld [vmem:[%s7448_s23 + $0x2a0] ss:$8 sps:$4 sm:$0xff]  }
 0xc0c   : > { %v3707_v35 = vpop.f32.mrb[40].mxu1 }
 0xc0d   : > { %v3845_v42 = vmul.f32 %v3833_v30, %v3707_v35  ;;  %v3750_v43 = vpop.f32.mrb[24].mxu0  ;;  %v3709_v37 = vpop.f32.mrb[41].mxu1  ;;  %v6359_v30 = vld [vmem:[%s7448_s23 + $0x2d0] ss:$8 sps:$4 sm:$0xff]  }
 0xc0e   : > { %v8113_v45 = vmul.f32 %v3835_v33, %v3750_v43  ;;  %v3846_v11 = vmul.f32 %v3834_v52, %v3709_v37  ;;  %v3752_v46 = vpop.f32.mrb[25].mxu0  ;;  %4509 = vmatpush1.bf16.msra.mxu1 %v6314_v27  ;;  %v3711_v41 = vpop.f32.mrb[42].mxu1  ;;  %v6356_v27 = vld [vmem:[%s7448_s23 + $0x2c0] ss:$8 sps:$4 sm:$0xff]   ;;  %v6367_v52 = vld [vmem:[%s7448_s23 + $0x2f4] ss:$8 sps:$4 sm:$0xff]  }
 0xc0f   : > { %v3848_v49 = vmul.f32 %v3836_v40, %v3752_v46  ;;  %v3851_v29 = vmul.f32 %v3839_v38, %v3711_v41  ;;  %v3754_v50 = vpop.f32.mrb[26].mxu0  ;;  %v3713_v53 = vpop.f32.mrb[43].mxu1  ;;  %4510 = vmatprep.subr.bf16.mxu1 %v6319_v31  ;;  %v6364_v31 = vld [vmem:[%s7448_s23 + $0x2e4] ss:$8 sps:$4 sm:$0xff]   ;;  %v6365_v33 = vld [vmem:[%s7448_s23 + $0x2f0] ss:$8 sps:$4 sm:$0xff]  }
 0xc10   : > { %v8118_v36 = vmul.f32 %v3841_v39, %v3754_v50  ;;  %v3852_v44 = vmul.f32 %v3840_v4, %v3713_v53  ;;  %v3756_v55 = vpop.f32.mrb[27].mxu0  ;;  %v6445_v46 = vld [vmem:[#allocation17] sm:$0xff] (!%p5465_p1)   ;;  %v6450_v50 = vld [vmem:[#allocation17 + $0x58] sm:$0xff] (!%p5465_p1)  }
 0xc11   : > { %v3857_v58 = vpack.c.bf16 %v3851_v29, %v3845_v42  ;;  %v3854_v60 = vmul.f32 %v3842_v18, %v3756_v55  ;;  %v6449_v29 = vld [vmem:[#allocation17 + $0x10] sm:$0xff] (!%p5465_p1)   ;;  %v6451_v53 = vld [vmem:[#allocation17 + $0x18] sm:$0xff] (!%p5465_p1)   ;;  %v6455_v55 = vld [vmem:[#allocation17 + $0x28] sm:$0xff] (!%p5465_p1)  }
 0xc12   : > { %v3859_v61 = vpack.c.bf16 %v8118_v36, %v8113_v45  ;;  %v3858_v47 = vpack.c.bf16 %v3852_v44, %v3846_v11  ;;  %4511 = vmatpush1.bf16.msra.mxu1 %v6317_v20  ;;  %v6446_v20 = vld [vmem:[#allocation17 + $0x48] sm:$0xff] (!%p5465_p1)   ;;  %v6453_v36 = vld [vmem:[#allocation17 + $0x20] sm:$0xff] (!%p5465_p1)  }
 0xc13   : > { %v3860_v0 = vpack.c.bf16 %v3854_v60, %v3848_v49  ;;  %4523 = vmatprep.subr.bf16.mxu1 %v6322_v34  ;;  %v6448_v49 = vld [vmem:[#allocation17 + $0x50] sm:$0xff] (!%p5465_p1)   ;;  %v6452_v34 = vld [vmem:[#allocation17 + $0x60] sm:$0xff] (!%p5465_p1)   ;;  %v6454_v44 = vld [vmem:[#allocation17 + $0x68] sm:$0xff] (!%p5465_p1)  }
 0xc14   : > { %4512 = vmatprep.mubr.bf16.mxu1 %v3858_v47  ;;  %v6457_v60 = vld [vmem:[#allocation17 + $0x30] sm:$0xff] (!%p5465_p1)   ;;  %v6459_v47 = vld [vmem:[#allocation17 + $0x38] sm:$0xff] (!%p5465_p1)  }
 0xc15   : > { %4513 = vmatmul.mubr.bf16.vlgmr.msra.gmra.mrb[44].mxu1 %v3857_v58  ;;  %v6456_v58 = vld [vmem:[#allocation17 + $0x70] sm:$0xff] (!%p5465_p1)  }
 0xc16   : > { %4524 = vmatpush1.bf16.msra.mxu1 %v6320_v14  ;;  %4555 = vmatprep.mubr.bf16.mxu1 %v3860_v0 }
 0xc17   : > { %4525 = vmatprep.subr.bf16.mxu1 %v6325_v13 }
 0xc1a   : > { %4526 = vmatpush1.bf16.msra.mxu1 %v6323_v1 }
 0xc1b   : > { %4527 = vmatprep.subr.bf16.mxu1 %v6328_v2 }
 0xc1e   : > { %4528 = vmatpush1.bf16.msra.mxu1 %v6326_v7 }
 0xc1f   : > { %4529 = vmatprep.subr.bf16.mxu1 %v6331_v8 }
 0xc22   : > { %4530 = vmatpush1.bf16.msra.mxu1 %v6329_v5  ;;  %v4578_v5 = vld [vmem:[#allocation16] sm:$0x3] (!%p5465_p1) }
 0xc23   : > { %4531 = vmatprep.subr.bf16.mxu1 %v6334_v10 }
 0xc26   : > { %4532 = vmatpush1.bf16.msra.mxu1 %v6332_v17  ;;  %v4603_v17 = vrot.slane (!%p5465_p1), %v4578_v5, %v7529_v57 }
 0xc27   : > { %4533 = vmatprep.subr.bf16.mxu1 %v6337_v6  ;;  %v4607_v6 = vrot.slane (!%p5465_p1), %v4578_v5, %v7527_v56 }
 0xc2a   : > { %4534 = vmatpush1.bf16.msra.mxu1 %v6335_v3 }
 0xc2b   : > { %4535 = vmatprep.subr.bf16.mxu1 %v6340_v63 }
 0xc2e   : > { %4536 = vmatpush1.bf16.msra.mxu1 %v6338_v48 }
 0xc2f   : > { %4537 = vmatprep.subr.bf16.mxu1 %v6343_v9 }
 0xc32   : > { %4538 = vmatpush1.bf16.msra.mxu1 %v6341_v12 }
 0xc33   : > { %4539 = vmatprep.subr.bf16.mxu1 %v6346_v15 }
 0xc36   : > { %4540 = vmatpush1.bf16.msra.mxu1 %v6344_v16 }
 0xc37   : > { %4541 = vmatprep.subr.bf16.mxu1 %v6349_v19 }
 0xc3a   : > { %4542 = vmatpush1.bf16.msra.mxu1 %v6347_v21 }
 0xc3b   : > { %4543 = vmatprep.subr.bf16.mxu1 %v6352_v22 }
 0xc3e   : > { %4544 = vmatpush1.bf16.msra.mxu1 %v6350_v23 }
 0xc3f   : > { %4545 = vmatprep.subr.bf16.mxu1 %v6355_v24  ;;  %v5466_v24 = vld [vmem:[#allocation18] ss:$0 sm:$0xff] (!%p5465_p1) }
 0xc42   : > { %4546 = vmatpush1.bf16.msra.mxu1 %v6353_v25 }
 0xc43   : > { %4547 = vmatprep.subr.bf16.mxu1 %v6358_v26 }
 0xc46   : > { %4548 = vmatpush1.bf16.msra.mxu1 %v6356_v27 }
 0xc47   : > { %4549 = vmatprep.subr.bf16.mxu1 %v6361_v28 }
 0xc4a   : > { %4550 = vmatpush1.bf16.msra.mxu1 %v6359_v30 }
 0xc4b   : > { %4551 = vmatprep.subr.bf16.mxu1 %v6364_v31 }
 0xc4e   : > { %4552 = vmatpush1.bf16.msra.mxu1 %v6362_v32 }
 0xc4f   : > { %4553 = vmatprep.subr.bf16.mxu1 %v6367_v52 }
 0xc52   : > { %4554 = vmatpush1.bf16.msra.mxu1 %v6365_v33 }
 0xc55   : > { %4556 = vmatmul.mubr.bf16.vlgmr.msra.gmra.mrb[44].mxu1 %v3859_v61  ;;  %v6458_v61 = vld [vmem:[#allocation17 + $0x78] sm:$0xff] (!%p5465_p1)  }
 0xd28   : > { %v4557_v35 = vpop.f32.mrb[44].mxu1  ;;  %4577 = sbr.rel (%p5465_p1) target bundleno = 3764 (0xeb4), region = 136 }
 0xd29   : > { %v8157_v38 = vadd.f32 %v4557_v35, %v7832_v51  ;;  %v4559_v40 = vpop.f32.mrb[45].mxu1 }
 0xd2a   : > { %v4567_v42 = vadd.f32 %v4559_v40, %v7834_v54  ;;  %v4561_v43 = vpop.f32.mrb[46].mxu1 }
 0xd2b   : > { %4570 = vst [vmem:[#allocation2] sm:$0xff] %v8157_v38  ;;  %v8162_v37 = vadd.f32 %v4561_v43, %v7836_v59  ;;  %v4563_v4 = vpop.f32.mrb[47].mxu1  ;;  %v4579_v51 = vmul.f32 (!%p5465_p1), %v8157_v38, %v8157_v38  ;;  %v6444_v59 = vld [vmem:[#allocation17 + $0x40] sm:$0xff] (!%p5465_p1)  }
 0xd2c   : > { %4571 = vst [vmem:[#allocation2 + $0x8] sm:$0xff] %v4567_v42  ;;  %v4569_v39 = vadd.f32 %v4563_v4, %v7840_v62  ;;  %v4580_v54 = vmul.f32 (!%p5465_p1), %v4567_v42, %v4567_v42  ;;  %5504 = vmatprep.subr.bf16.mxu0 (!%p5465_p1), %v6444_v59  ;;  %v6447_v62 = vld [vmem:[#allocation17 + $0x8] sm:$0xff] (!%p5465_p1)  }
 0xd2d   : > { %4572 = vst [vmem:[#allocation2 + $0x10] sm:$0xff] %v8162_v37  ;;  %v4581_v45 = vmul.f32 (!%p5465_p1), %v8162_v37, %v8162_v37  ;;  %5505 = vmatpush3.bf16.msra.mxu0 (!%p5465_p1), %v6445_v46 }
 0xd2e   : > { %4573 = vst [vmem:[#allocation2 + $0x18] sm:$0xff] %v4569_v39  ;;  %v4582_v11 = vmul.f32 (!%p5465_p1), %v4569_v39, %v4569_v39  ;;  %v4583_v41 = vadd.f32 (!%p5465_p1), %v4580_v54, %v4579_v51  ;;  %5506 = vmatprep.subr.bf16.mxu0 (!%p5465_p1), %v6446_v20 }
 0xd30   : > { %4584 = vadd.xlane.f32.xlu0 %v4583_v41  ;;  %v4586_v18 = vadd.f32 %v4582_v11, %v4581_v45 }
 0xd31   : > { %5507 = vmatpush3.bf16.msra.mxu0 %v6447_v62 }
 0xd32   : > { %5508 = vmatprep.subr.bf16.mxu0 %v6448_v49 }
 0xd34   : > { %4587 = vadd.xlane.f32.xlu0 %v4586_v18 }
 0xd35   : > { %5509 = vmatpush3.bf16.msra.mxu0 %v6449_v29 }
 0xd36   : > { %5510 = vmatprep.subr.bf16.mxu0 %v6450_v50 }
 0xd39   : > { %5511 = vmatpush3.bf16.msra.mxu0 %v6451_v53 }
 0xd3a   : > { %5512 = vmatprep.subr.bf16.mxu0 %v6452_v34 }
 0xd3d   : > { %5513 = vmatpush3.bf16.msra.mxu0 %v6453_v36 }
 0xd3e   : > { %5514 = vmatprep.subr.bf16.mxu0 %v6454_v44 }
 0xd41   : > { %5515 = vmatpush3.bf16.msra.mxu0 %v6455_v55 }
 0xd42   : > { %5516 = vmatprep.subr.bf16.mxu0 %v6456_v58 }
 0xd45   : > { %5517 = vmatpush3.bf16.msra.mxu0 %v6457_v60 }
 0xd46   : > { %5518 = vmatprep.subr.bf16.mxu0 %v6458_v61 }
 0xd49   : > { %5519 = vmatpush3.bf16.msra.mxu0 %v6459_v47 }
 0xdbd   : > { %v4585_v14 = vpop.xlane.xlu0 %4584 }
 0xdbe   : > { %v4589_v0 = vmul.f32 0.00390625, %v4585_v14 }
 0xdc0   : > { %v4591_v13 = vadd.f32 1e-05, %v4589_v0 }
 0xdc1   : > { %v4588_v1 = vpop.xlane.xlu0 %4587 }
 0xdc2   : > { %6460 = vrsqrt.f32 %v4591_v13  ;;  %v4590_v2 = vmul.f32 0.00390625, %v4588_v1 }
 0xdc4   : > { %v4592_v7 = vadd.f32 1e-05, %v4590_v2 }
 0xdc6   : > { %6462 = vrsqrt.f32 %v4592_v7 }
 0xdcc   : > { %v6461_v8 = vpop.eup %6460 }
 0xdcd   : > { %v4596_v10 = vmul.f32 %v6461_v8, %v4567_v42  ;;  %v4595_v3 = vmul.f32 %v6461_v8, %v8157_v38 }
 0xdcf   : > { %v4611_v12 = vmul.f32 %v4607_v6, %v4596_v10  ;;  %v4610_v16 = vmul.f32 %v4603_v17, %v4595_v3 }
 0xdd0   : > { %v6463_v63 = vpop.eup %6462 }
 0xdd1   : > { %v4598_v48 = vmul.f32 %v6463_v63, %v4569_v39  ;;  %v4597_v9 = vmul.f32 %v6463_v63, %v8162_v37 }
 0xdd3   : > { %v4613_v15 = vmul.f32 %v4607_v6, %v4598_v48  ;;  %v4612_v19 = vmul.f32 %v4603_v17, %v4597_v9 }
 0xdd5   : > { %v4615_v21 = vpack.c.bf16 %v4613_v15, %v4611_v12  ;;  %v4614_v22 = vpack.c.bf16 %v4612_v19, %v4610_v16 }
 0xdd7   : > { %4783 = vmatprep.mubr.bf16.mxu0 %v4615_v21 }
 0xdd8   : > { %4784 = vmatmul.mubr.bf16.vlgmr.msra.gmra.mrb[0].mxu0 %v4614_v22 }
 0xeab   : > { %v5520_v23 = vpop.f32.mrb[0].mxu0 }
 0xeac   : > { %v5521_v25 = vpop.f32.mrb[1].mxu0 }
 0xead   : > { %v5522_v57 = vadd.f32 %v5521_v25, %v5520_v23  ;;  %v5523_v26 = vpop.f32.mrb[2].mxu0 }
 0xeae   : > { %v5524_v56 = vpop.f32.mrb[3].mxu0 }
 0xeaf   : > { %v4786_v27 = vadd.f32 %v5522_v57, %v5466_v24  ;;  %v5525_v28 = vadd.f32 %v5524_v56, %v5523_v26 }
 0xeb1   : > { %4792 = vst [vmem:[%s8318_s28] sm:$0xff] %v4786_v27  ;;  %v4789_v30 = vadd.f32 %v5525_v28, %v5466_v24 }
 0xeb3   : > { %4793 = vst [vmem:[%s8318_s28 + $0x8] sm:$0xff] %v4789_v30 }
 0xeb4 PF: > { %s8319_s16 = sld [smem:[#allocation31_spill]]  ;;  %s8320_s29 = sld [smem:[#allocation27_spill]] }
 0xeb5   : > { %s8321_s30 = sld [smem:[#allocation28_spill]]  ;;  %s8322_s15 = sld [smem:[#allocation32_spill]] }
 0xeba   : > { %p25_p5 = scmp.ge.s32.totalorder %s8319_s16, 4  }
 0xebc   :  { %27 = sbr.rel (!%p25_p5) target bundleno = 16 (0x10), region = 202 }
 0xec3   :  { %4805 = vsyncpa [#allocation4], 1 }
 0xec4   :  { %4807 = vsyncpa [#allocation4 + $0x1], 1 }
 0xec5   :  { %4808 = vsyncpa [#allocation6], 1 }
 0xec6   :  { %4809 = vsyncpa [#allocation9], 1 }
 0xec7   :  { %4810 = vsyncpa [#allocation19], 1 }

</bundles_post_ra>
